<compile_context>
chip_gen: v7x
topology: tpu7x:2x2x1
jax: 0.10.0
libtpu: 0.0.40
codegen_flags: <defaults>
</compile_context>

<pallas_src>
import jax
import jax.numpy as jnp
from jax.experimental import pallas as pl
from jax.experimental.pallas import tpu as pltpu


def _swish_kernel(x_ref, o_ref):
    # Upcast to f32 for the transcendental (v5e has no bf16 EUP/VPU path).
    x = x_ref[...].astype(jnp.float32)
    # Numerically stable sigmoid: sigmoid(x) = 0.5 * tanh(x/2) + 0.5.
    sig = 0.5 * jnp.tanh(0.5 * x) + 0.5
    o_ref[...] = (x * sig).astype(o_ref.dtype)


# Byte-targeted block size: ~2 MiB per pipeline buffer regardless of dtype.
_TARGET_BLOCK_BYTES = 2 * 1024 * 1024
# Below this total size, let XLA fuse the activation (launch overhead wins).
_SMALL_BYTES = 256 * 1024


def _round_up(a: int, b: int) -> int:
    return ((a + b - 1) // b) * b


def _swish_pallas_2d(x2d: jax.Array) -> jax.Array:
    rows, lanes = x2d.shape
    itemsize = jnp.dtype(x2d.dtype).itemsize
    n = rows * lanes

    # Dtype-aware tile: keep block *bytes* ~constant.
    block_elems = max(_TARGET_BLOCK_BYTES // itemsize, 8 * lanes)
    tile_target = max(((block_elems // lanes) // 8) * 8, 8)

    if rows > tile_target:
        tile_rows = tile_target
    elif rows >= 16:
        # Split into at least 2 grid steps so the parallel axis can shard
        # across both v7x TensorCores (no effect on v5e/v6e).
        tile_rows = _round_up(pl.cdiv(rows, 2), 8)
    else:
        tile_rows = rows  # single full-extent block (always legal)

    grid = (pl.cdiv(rows, tile_rows),)

    cost = pl.CostEstimate(
        flops=4 * n,
        transcendentals=n,
        bytes_accessed=2 * n * itemsize,
    )

    return pl.pallas_call(
        _swish_kernel,
        out_shape=jax.ShapeDtypeStruct((rows, lanes), x2d.dtype),
        grid_spec=pltpu.PrefetchScalarGridSpec(
            num_scalar_prefetch=0,
            grid=grid,
            in_specs=[pl.BlockSpec((tile_rows, lanes), lambda i: (i, 0))],
            out_specs=pl.BlockSpec((tile_rows, lanes), lambda i: (i, 0)),
        ),
        compiler_params=pltpu.CompilerParams(
            dimension_semantics=("parallel",),
            vmem_limit_bytes=32 * 1024 * 1024,
        ),
        cost_estimate=cost,
    )(x2d)


def swish(x: jax.Array) -> jax.Array:
    """Elementwise Swish (x * sigmoid(x)); accepts any shape/dtype."""
    orig_shape = x.shape
    n = x.size
    if n == 0:
        return x

    itemsize = jnp.dtype(x.dtype).itemsize
    # Fast path: tiny tensors (pallas launch/per-step overhead dominates; let
    # XLA fuse) and irregular sizes (a pad + kernel + slice path would be ~3x
    # the HBM traffic of XLA's fused 1R+1W elementwise).
    if (n * itemsize < _SMALL_BYTES) or (n % 128 != 0):
        return x * jax.nn.sigmoid(x)

    # Widest lane-dense last dim that reshapes cleanly (no pad); prefer a
    # sublane-aligned (multiple-of-8) row count.
    lanes = 128
    for cand in (1024, 512, 256, 128):
        if n % (cand * 8) == 0:
            lanes = cand
            break
    else:
        for cand in (1024, 512, 256, 128):
            if n % cand == 0:
                lanes = cand
                break

    rows = n // lanes
    out2d = _swish_pallas_2d(jnp.ravel(x).reshape(rows, lanes))
    return out2d.reshape(orig_shape)


if __name__ == "__main__":
    key = jax.random.PRNGKey(0)
    k0, k1, k2, k3, k4 = jax.random.split(key, 5)

    def ref_swish(v):
        v32 = v.astype(jnp.float32)
        return (v32 * jax.nn.sigmoid(v32)).astype(v.dtype)

    # 1) NCHW input matching the PyTorch module usage (small -> fast path).
    x = jax.random.normal(k0, (2, 4, 16, 16), dtype=jnp.float32)
    out = jax.block_until_ready(swish(x))
    assert out.shape == x.shape and out.dtype == x.dtype
    assert jnp.max(jnp.abs(out - ref_swish(x))) < 1e-5

    # 2) Larger f32 tensor -> exercises the Pallas streaming path (grid > 1).
    x_big = jax.random.normal(k1, (8, 64, 64, 64), dtype=jnp.float32)
    out_big = jax.block_until_ready(swish(x_big))
    assert out_big.shape == x_big.shape and out_big.dtype == x_big.dtype
    assert jnp.max(jnp.abs(out_big - ref_swish(x_big))) < 1e-5

    # 3) bf16 tensor through the Pallas path (byte-targeted tiling).
    x_bf = jax.random.normal(k2, (4, 256, 512), dtype=jnp.bfloat16)
    out_bf = jax.block_until_ready(swish(x_bf))
    assert out_bf.shape == x_bf.shape and out_bf.dtype == x_bf.dtype
    diff_bf = jnp.max(jnp.abs(out_bf.astype(jnp.float32)
                              - ref_swish(x_bf).astype(jnp.float32)))
    assert diff_bf < 2e-2

    # 4) Pallas path with a partial boundary block (rows not tile-aligned).
    x_part = jax.random.normal(k3, (5, 3, 64, 128), dtype=jnp.float32)
    out_part = jax.block_until_ready(swish(x_part))
    assert jnp.max(jnp.abs(out_part - ref_swish(x_part))) < 1e-5

    # 5) Irregular element count -> XLA-fused fallback path.
    x_irr = jax.random.normal(k4, (2, 3, 7, 5), dtype=jnp.float32)
    out_irr = jax.block_until_ready(swish(x_irr))
    assert out_irr.shape == x_irr.shape and out_irr.dtype == x_irr.dtype
    assert jnp.max(jnp.abs(out_irr - ref_swish(x_irr))) < 1e-5

    print("KERNEL_OK")
</pallas_src>

<mosaic_0001>
module attributes {stable_mosaic.version = 11 : i64} {
  func.func @_swish_kernel(%arg0: i32, %arg1: memref<512x1024xf32, #tpu.memory_space<vmem>>, %arg2: memref<512x1024xf32, #tpu.memory_space<vmem>>) attributes {dimension_semantics = [#tpu.dimension_semantics<parallel>], iteration_bounds = array<i64: 4>, scalar_prefetch = 0 : i64, scratch_operands = 0 : i64, tpu.core_type = #tpu.core_type<tc>, window_params = [{transform_indices = @transform_0, window_bounds = array<i64: 512, 1024>}, {transform_indices = @transform_1, window_bounds = array<i64: 512, 1024>}]} {
    %c0 = arith.constant 0 : index
    %c0_0 = arith.constant 0 : index
    %0 = vector.load %arg1[%c0, %c0_0] : memref<512x1024xf32, #tpu.memory_space<vmem>>, vector<512x1024xf32>
    %cst = arith.constant 5.000000e-01 : f32
    %1 = vector.broadcast %cst : f32 to vector<512x1024xf32>
    %2 = arith.mulf %1, %0 : vector<512x1024xf32>
    %3 = math.tanh %2 : vector<512x1024xf32>
    %cst_1 = arith.constant 5.000000e-01 : f32
    %4 = vector.broadcast %cst_1 : f32 to vector<512x1024xf32>
    %5 = arith.mulf %4, %3 : vector<512x1024xf32>
    %cst_2 = arith.constant 5.000000e-01 : f32
    %6 = vector.broadcast %cst_2 : f32 to vector<512x1024xf32>
    %7 = arith.addf %5, %6 : vector<512x1024xf32>
    %8 = arith.mulf %0, %7 : vector<512x1024xf32>
    %c0_3 = arith.constant 0 : index
    %c0_4 = arith.constant 0 : index
    %9 = vector.load %arg2[%c0_3, %c0_4] : memref<512x1024xf32, #tpu.memory_space<vmem>>, vector<512x1024xf32>
    tpu.vector_store %arg2[%c0_3, %c0_4], %8 {strides = array<i32>} : memref<512x1024xf32, #tpu.memory_space<vmem>>, vector<512x1024xf32>,
    return
  }
  func.func @transform_0(%arg0: i32) -> (i32, i32) {
    %c0_i32 = arith.constant 0 : i32
    %c0_i32_0 = arith.constant 0 : i32
    return %arg0, %c0_i32 : i32, i32
  }
  func.func @transform_1(%arg0: i32) -> (i32, i32) {
    %c0_i32 = arith.constant 0 : i32
    %c0_i32_0 = arith.constant 0 : i32
    return %arg0, %c0_i32 : i32, i32
  }
}

</mosaic_0001>

<bundles_post_ra>
// kernel: tpu_custom_call.1
= control target key start
LH: loop header
LB: loop body
LE: loop exit
PB: predicated region body
PF: predicated region fallthrough
CT: control target
= control target key end

     0   :  { %6 = vsyncpa [#allocation3], 0  ;;  %s8361_s0 = inlined_call_operand.hbm [shape: f32[2048,1024], index: 0, kind: input, shape index: {}]   ;;  %s8362_s1 = inlined_call_operand.hbm [shape: f32[2048,1024], index: 1, kind: output, shape index: {}]  }
   0x1   :  { %8 = vsyncpa [#allocation3 + $0x1], 0 }
   0x2   :  { %9 = vsyncpa [#allocation4], 0 }
   0x3   :  { %11 = vsyncpa [#allocation4 + $0x1], 0  ;;  %s5018_s6 = smov 0   ;;  %s5020_s7 = smov 0  }
   0x4   :  { %s5022_s8 = smov 0   ;;  %s5024_s9 = smov 0  }
   0x5 LB: > { %s5039_s10 = sadd.s32 4294967295, %s5000_s9   ;;  %s3810_s11 = sadd.s32 4294967294, %s5000_s9   ;;  %s5000_s9 = sphi %s5024_s9, %s8449_s9   ;;  %s4996_s8 = sphi %s5022_s8, %s8448_s8   ;;  %s4992_s7 = sphi %s5020_s7, %s8447_s7   ;;  %s4988_s6 = sphi %s5018_s6, %s8446_s6  }
   0x6   : > { %s5043_s12 = sadd.s32 1, %s5000_s9   ;;  %s24_s13 = sadd.s32 1, %s4996_s8 }
   0x7   : > { %s21_s14 = ssub.s32 %s5000_s9, %s5043_s12  ;;  %p31_p0 = scmp.ne.s32.totalorder %s4996_s8, %s4992_s7 }
   0x8   : > { %p22_p1 = scmp.eq.s32.totalorder %s21_s14, 0  ;;  %p32_p2 = scmp.eq.s32.totalorder %s5000_s9, 0 }
   0x9   : > { %p37_p3 = scmp.ne.s32.totalorder %s4992_s7, %s4988_s6  ;;  %p38_p4 = scmp.eq.s32.totalorder %s5039_s10, 0 }
   0xa   : > { %s5055_s15 = scalar_select %p22_p1, %s4996_s8, %s24_s13  }
   0xb   : > { %p5057_p5 = por %p32_p2, %p31_p0  ;;  %p5061_p6 = por %p38_p4, %p37_p3 }
   0xc   : > { %p61_p7 = scmp.eq.s32.totalorder %s5039_s10, 3  ;;  %p67_p8 = scmp.eq.s32.totalorder %s3810_s11, 3 }
   0xd   : > { %p3842_p9 = scmp.lt.s32.totalorder %s5000_s9, 4  ;;  %s87_s20 = sand.u32 1, %s4996_s8  }
   0xe   : > { %p5067_p10 = por %p61_p7, %p31_p0  ;;  %p5071_p11 = por %p67_p8, %p37_p3 }
   0xf   : > { %s3827_s21 = sshll.u32 %s5000_s9, 16  ;;  %s3813_s22 = sshll.u32 %s87_s20, 12 }
  0x10   : > { %s8387_s18 = scalar_select %p5067_p10, 1, 0 }
  0x11   : > { %s8388_s19 = scalar_select %p5071_p11, 1, 0 }
  0x12   : > { %s5080_s25 = scalar_lea.hbm %s8361_s0, %s3827_s21  ;;  %s91_s26 = scalar_lea.vmem [#allocation2], %s3813_s22 }
  0x13   : > { %s99_s27 = sshll.u32 %s91_s26, 4  ;;  %p5084_p12 = pnand %p3842_p9, %p5057_p5  ;;  %s5088_s27 = int_to_ptr.vmem [resolvable:$true] %s99_s27 }
  0x14   : > { %s5090_s29 = scalar_lea.sflag [#allocation3], %s87_s20  ;;  %s4904_s30 = scalar_lea.hbm %s5080_s25, 65536 }
  0x15   : > { %p4905_p13 = scmp.ne.s32.totalorder %s5080_s25, %s4904_s30  ;;  %p4906_p0 = pneg %p5084_p12 }
  0x16   : > { %s4909_s4 = scalar_lea.hbm %s8361_s0, 262144  ;;  %p4910_p3 = scmp.lt.u32.totalorder %s5080_s25, %s8361_s0 }
  0x17   : > { %p4907_p1 = pnand %p4906_p0, %p4905_p13  ;;  %p4911_p4 = scmp.lt.u32.totalorder %s4909_s4, %s4904_s30 }
  0x18   : > { %p4913_p7 = scmp.lt.u32.totalorder %s4904_s30, %s5080_s25 }
  0x19   : > { %p4908_p2 = pneg %p4907_p1  ;;  %p4912_p5 = por %p4911_p4, %p4910_p3 }
  0x1b   : > { %p4914_p8 = por %p4913_p7, %p4912_p5 }
  0x1d   : > { %p4915_p9 = pnand %p4914_p8, %p4908_p2 }
  0x1f   : > { %4918 = shalt.err (!%p4915_p9)
}
  0x20   : > { %s4919_s13 = scalar_lea.vmem %s5088_s27, 65536  ;;  %s5002_s14 = smov [#allocation2]  }
  0x21   : > { %p4920_p13 = scmp.ne.s32.totalorder %s5088_s27, %s4919_s13  ;;  %s4924_s16 = sshll.u32 %s5002_s14, 4  ;;  %s4925_s16 = int_to_ptr.vmem [resolvable:$false] %s4924_s16 }
  0x22   : > { %s4926_s20 = scalar_lea.vmem %s4925_s16, 131072  ;;  %p4927_p10 = scmp.lt.s32.totalorder %s5088_s27, %s4925_s16 }
  0x23   : > { %p4922_p1 = pnand %p4920_p13, %p4906_p0  ;;  %p4928_p3 = scmp.lt.s32.totalorder %s4926_s20, %s4919_s13 }
  0x25   : > { %p4923_p11 = pneg %p4922_p1  ;;  %p4929_p4 = por %p4928_p3, %p4927_p10 }
  0x27   : > { %p4930_p5 = pnand %p4929_p4, %p4923_p11 }
  0x29   : > { %4933 = shalt.err (!%p4930_p5)
}
  0x2a   : > { %s5003_s21 = smov 1024   ;;  %s5004_s22 = smov 64  }
  0x2b   : > { %3837 = dma.hbm_to_vmem [thread:$0]  (!%p5084_p12), %s5080_s25, 65536, %s5088_s27, %s5090_s29, %s5003_s21, %s5003_s21, %s5004_s22  }
  0x2c   : > { %p3817_p0 = scmp.ge.s32.totalorder %s5000_s9, 1  ;;  %p107_p2 = scmp.lt.s32.totalorder %s5000_s9, 5 }
  0x2e   : > { %p108_p7 = pnand %p3817_p0, %p107_p2 }
  0x30   : > { %111 = sbr.rel (%p108_p7) target bundleno = 727 (0x2d7), region = 24 }
  0x37   : > { %s5121_s23 = sand.u32 1, %s4992_s7  }
  0x38   : > { %s3818_s24 = sshll.u32 %s5121_s23, 12  ;;  %s114_s26 = scalar_lea.sflag [#allocation3], %s5121_s23 }
  0x39   : > { %s5127_s30 = scalar_lea.vmem [#allocation2], %s3818_s24 }
  0x3a   : > { %4979 = dma.done.wait (%p5061_p6), %s114_s26, 65536  }
  0x3b   : > { %4981 = vsyncadd (%p5061_p6), %s114_s26, 4294901760  ;;  %v5134_v0 = vld [vmem:[%s5127_s30] sm:$0xff]  ;;  %v5137_v1 = vld [vmem:[%s5127_s30 + $0x8] sm:$0xff]  ;;  %s5391_s17 = scalar_lea.vmem [#allocation5], %s3818_s24  ;;  %s3829_s25 = sshll.u32 %s5039_s10, 16 }
  0x3c   : > { %v5140_v2 = vld [vmem:[%s5127_s30 + $0x10] sm:$0xff]  ;;  %v650_v3 = vmul.f32 0.5, %v5134_v0  ;;  %v651_v4 = vmul.f32 0.5, %v5137_v1  ;;  %v5146_v6 = vld [vmem:[%s5127_s30 + $0x18] sm:$0xff]  ;;  %v5149_v7 = vld [vmem:[%s5127_s30 + $0x20] sm:$0xff]  ;;  %s3737_s27 = sshll.u32 %s5391_s17, 4  ;;  %s8312_s2 = scalar_lea.hbm %s8362_s1, %s3829_s25  ;;  %s8314_s27 = int_to_ptr.vmem [resolvable:$true] %s3737_s27 }
  0x3d   : > { %v652_v5 = vmul.f32 0.5, %v5140_v2  ;;  %v5152_v8 = vld [vmem:[%s5127_s30 + $0x28] sm:$0xff]  ;;  %v653_v9 = vmul.f32 0.5, %v5146_v6  ;;  %v654_v10 = vmul.f32 0.5, %v5149_v7  ;;  %v5158_v12 = vld [vmem:[%s5127_s30 + $0x30] sm:$0xff]  ;;  %v5161_v13 = vld [vmem:[%s5127_s30 + $0x38] sm:$0xff] }
  0x3e   : > { %v655_v11 = vmul.f32 0.5, %v5152_v8  ;;  %v5164_v14 = vld [vmem:[%s5127_s30 + $0x40] sm:$0xff]  ;;  %3880 = vtanh.f32 %v650_v3  ;;  %v656_v15 = vmul.f32 0.5, %v5158_v12  ;;  %v657_v16 = vmul.f32 0.5, %v5161_v13  ;;  %v5170_v18 = vld [vmem:[%s5127_s30 + $0x48] sm:$0xff]  ;;  %v5173_v19 = vld [vmem:[%s5127_s30 + $0x50] sm:$0xff] }
  0x3f   : > { %v658_v17 = vmul.f32 0.5, %v5164_v14  ;;  %v5176_v20 = vld [vmem:[%s5127_s30 + $0x58] sm:$0xff]  ;;  %3882 = vtanh.f32 %v651_v4  ;;  %v659_v21 = vmul.f32 0.5, %v5170_v18  ;;  %v660_v22 = vmul.f32 0.5, %v5173_v19  ;;  %v5184_v24 = vld [vmem:[%s5127_s30 + $0x60] sm:$0xff]  ;;  %v5187_v25 = vld [vmem:[%s5127_s30 + $0x68] sm:$0xff] }
  0x40   : > { %v5181_v23 = vmul.f32 0.5, %v5176_v20  ;;  %v5190_v26 = vld [vmem:[%s5127_s30 + $0x70] sm:$0xff]  ;;  %3884 = vtanh.f32 %v652_v5  ;;  %v5193_v27 = vmul.f32 0.5, %v5184_v24  ;;  %v5196_v28 = vmul.f32 0.5, %v5187_v25  ;;  %v5202_v30 = vld [vmem:[%s5127_s30 + $0x78] sm:$0xff]  ;;  %v5205_v31 = vld [vmem:[%s5127_s30 + $0x80] sm:$0xff] }
  0x41   : > { %v5199_v29 = vmul.f32 0.5, %v5190_v26  ;;  %v5208_v32 = vld [vmem:[%s5127_s30 + $0x88] sm:$0xff]  ;;  %3886 = vtanh.f32 %v653_v9  ;;  %v5211_v33 = vmul.f32 0.5, %v5202_v30  ;;  %v5214_v34 = vmul.f32 0.5, %v5205_v31  ;;  %v5220_v36 = vld [vmem:[%s5127_s30 + $0x90] sm:$0xff]  ;;  %v5223_v37 = vld [vmem:[%s5127_s30 + $0x98] sm:$0xff] }
  0x42   : > { %v5217_v35 = vmul.f32 0.5, %v5208_v32  ;;  %v5226_v38 = vld [vmem:[%s5127_s30 + $0xa0] sm:$0xff]  ;;  %3888 = vtanh.f32 %v654_v10  ;;  %v5229_v39 = vmul.f32 0.5, %v5220_v36  ;;  %v5232_v40 = vmul.f32 0.5, %v5223_v37  ;;  %v5238_v42 = vld [vmem:[%s5127_s30 + $0xa8] sm:$0xff]  ;;  %v5241_v43 = vld [vmem:[%s5127_s30 + $0xb0] sm:$0xff] }
  0x43   : > { %v5235_v41 = vmul.f32 0.5, %v5226_v38  ;;  %v5244_v44 = vld [vmem:[%s5127_s30 + $0xb8] sm:$0xff]  ;;  %3890 = vtanh.f32 %v655_v11  ;;  %v5247_v45 = vmul.f32 0.5, %v5238_v42  ;;  %v5250_v46 = vmul.f32 0.5, %v5241_v43  ;;  %v5256_v48 = vld [vmem:[%s5127_s30 + $0xc0] sm:$0xff]  ;;  %v5259_v49 = vld [vmem:[%s5127_s30 + $0xc8] sm:$0xff] }
  0x44   : > { %8390 = vst [vmem:[#allocation8_spill] sm:$0xff] %v5244_v44  ;;  %v5253_v47 = vmul.f32 0.5, %v5244_v44  ;;  %8391 = vst [vmem:[#allocation9_spill] sm:$0xff] %v5256_v48  ;;  %v5262_v50 = vld [vmem:[%s5127_s30 + $0xd0] sm:$0xff]  ;;  %3892 = vtanh.f32 %v656_v15  ;;  %v5265_v51 = vmul.f32 0.5, %v5256_v48  ;;  %v5268_v52 = vmul.f32 0.5, %v5259_v49 }
  0x45   : > { %8392 = vst [vmem:[#allocation10_spill] sm:$0xff] %v5259_v49  ;;  %8393 = vst [vmem:[#allocation11_spill] sm:$0xff] %v5262_v50  ;;  %v5271_v53 = vmul.f32 0.5, %v5262_v50  ;;  %v5274_v54 = vld [vmem:[%s5127_s30 + $0xd8] sm:$0xff]  ;;  %v5277_v55 = vld [vmem:[%s5127_s30 + $0xe0] sm:$0xff]  ;;  %3894 = vtanh.f32 %v657_v16  ;;  %s3723_s10 = scalar_lea.sflag [#allocation4], %s5121_s23 }
  0x46   : > { %8394 = vst [vmem:[#allocation12_spill] sm:$0xff] %v5274_v54  ;;  %8395 = vst [vmem:[#allocation13_spill] sm:$0xff] %v5277_v55  ;;  %v5280_v56 = vld [vmem:[%s5127_s30 + $0xe8] sm:$0xff]  ;;  %v5283_v57 = vmul.f32 0.5, %v5274_v54  ;;  %v5286_v58 = vmul.f32 0.5, %v5277_v55  ;;  %v5292_v60 = vld [vmem:[%s5127_s30 + $0xf0] sm:$0xff]  ;;  %3896 = vtanh.f32 %v658_v17 }
  0x47   : > { %8396 = vst [vmem:[#allocation14_spill] sm:$0xff] %v5280_v56  ;;  %v5289_v59 = vmul.f32 0.5, %v5280_v56  ;;  %8397 = vst [vmem:[#allocation15_spill] sm:$0xff] %v5292_v60  ;;  %v5295_v61 = vld [vmem:[%s5127_s30 + $0xf8] sm:$0xff]  ;;  %v5298_v62 = vld [vmem:[%s5127_s30 + $0x100] sm:$0xff]  ;;  %v5301_v63 = vmul.f32 0.5, %v5292_v60  ;;  %3898 = vtanh.f32 %v659_v21 }
  0x48   : > { %8398 = vst [vmem:[#allocation16_spill] sm:$0xff] %v5295_v61  ;;  %8399 = vst [vmem:[#allocation17_spill] sm:$0xff] %v5298_v62  ;;  %v5304_v3 = vmul.f32 0.5, %v5295_v61  ;;  %v5307_v4 = vmul.f32 0.5, %v5298_v62  ;;  %v5310_v5 = vld [vmem:[%s5127_s30 + $0x108] sm:$0xff]  ;;  %v5313_v9 = vld [vmem:[%s5127_s30 + $0x110] sm:$0xff]  ;;  %v3881_v60 = vpop.eup %3880  ;;  %3900 = vtanh.f32 %v660_v22 }
  0x49   : > { %8400 = vst [vmem:[#allocation18_spill] sm:$0xff] %v5310_v5  ;;  %8401 = vst [vmem:[#allocation19_spill] sm:$0xff] %v5313_v9  ;;  %v5316_v10 = vld [vmem:[%s5127_s30 + $0x118] sm:$0xff]  ;;  %v5319_v11 = vmul.f32 0.5, %v5310_v5  ;;  %v5322_v15 = vmul.f32 0.5, %v5313_v9  ;;  %v5328_v17 = vld [vmem:[%s5127_s30 + $0x120] sm:$0xff]  ;;  %v3883_v54 = vpop.eup %3882  ;;  %3902 = vtanh.f32 %v5181_v23 }
  0x4a   : > { %8402 = vst [vmem:[#allocation20_spill] sm:$0xff] %v5316_v10  ;;  %v5325_v16 = vmul.f32 0.5, %v5316_v10  ;;  %8403 = vst [vmem:[#allocation21_spill] sm:$0xff] %v5328_v17  ;;  %v5331_v62 = vld [vmem:[%s5127_s30 + $0x128] sm:$0xff]  ;;  %v5334_v61 = vld [vmem:[%s5127_s30 + $0x130] sm:$0xff]  ;;  %v5337_v21 = vmul.f32 0.5, %v5328_v17  ;;  %v3885_v48 = vpop.eup %3884  ;;  %3904 = vtanh.f32 %v5193_v27 }
  0x4b   : > { %8404 = vst [vmem:[#allocation22_spill] sm:$0xff] %v5331_v62  ;;  %8405 = vst [vmem:[#allocation23_spill] sm:$0xff] %v5334_v61  ;;  %v5340_v9 = vmul.f32 0.5, %v5331_v62  ;;  %v5343_v10 = vmul.f32 0.5, %v5334_v61  ;;  %v5346_v5 = vld [vmem:[%s5127_s30 + $0x138] sm:$0xff]  ;;  %v5349_v56 = vld [vmem:[%s5127_s30 + $0x140] sm:$0xff]  ;;  %3906 = vtanh.f32 %v5196_v28 }
  0x4c   : > { %8408 = vst [vmem:[#allocation26_spill] sm:$0xff] %v5346_v5  ;;  %8409 = vst [vmem:[#allocation27_spill] sm:$0xff] %v5349_v56  ;;  %v5352_v55 = vld [vmem:[%s5127_s30 + $0x148] sm:$0xff]  ;;  %v1674_v50 = vmul.f32 0.5, %v3881_v60  ;;  %v5356_v22 = vmul.f32 0.5, %v5346_v5  ;;  %v5359_v17 = vmul.f32 0.5, %v5349_v56  ;;  %v3887_v5 = vpop.eup %3886  ;;  %3908 = vtanh.f32 %v5199_v29 }
  0x4d   : > { %8406 = vst [vmem:[#allocation24_spill] sm:$0xff] %v5340_v9  ;;  %8407 = vst [vmem:[#allocation25_spill] sm:$0xff] %v5343_v10  ;;  %v5362_v62 = vld [vmem:[%s5127_s30 + $0x150] sm:$0xff]  ;;  %v5365_v61 = vld [vmem:[%s5127_s30 + $0x158] sm:$0xff]  ;;  %v1675_v10 = vmul.f32 0.5, %v3883_v54  ;;  %v5372_v60 = vmul.f32 0.5, %v5352_v55  ;;  %v3889_v44 = vpop.eup %3888  ;;  %3910 = vtanh.f32 %v5211_v33 }
  0x4e   : > { %8410 = vst [vmem:[#allocation28_spill] sm:$0xff] %v5352_v55  ;;  %8411 = vst [vmem:[#allocation29_spill] sm:$0xff] %v5356_v22  ;;  %v5368_v49 = vld [vmem:[%s5127_s30 + $0x160] sm:$0xff]  ;;  %v5375_v23 = vmul.f32 0.5, %v5362_v62  ;;  %v2186_v22 = vadd.f32 0.5, %v1674_v50  ;;  %v1676_v56 = vmul.f32 0.5, %v3885_v48  ;;  %v3891_v55 = vpop.eup %3890  ;;  %3912 = vtanh.f32 %v5214_v34 }
  0x4f   : > { %8412 = vst [vmem:[#allocation30_spill] sm:$0xff] %v5359_v17  ;;  %8413 = vst [vmem:[#allocation31_spill] sm:$0xff] %v5362_v62  ;;  %v5379_v17 = vmul.f32 0.5, %v5365_v61  ;;  %v2187_v9 = vadd.f32 0.5, %v1675_v10  ;;  %v1677_v54 = vmul.f32 0.5, %v3887_v5  ;;  %v5383_v27 = vmul.f32 0.5, %v5368_v49  ;;  %v3893_v28 = vpop.eup %3892 }
  0x50   : > { %8414 = vst [vmem:[#allocation32_spill] sm:$0xff] %v5365_v61  ;;  %8415 = vst [vmem:[#allocation33_spill] sm:$0xff] %v5375_v23  ;;  %v2698_v62 = vmul.f32 %v2186_v22, %v5134_v0  ;;  %v2188_v23 = vadd.f32 0.5, %v1676_v56  ;;  %v1678_v50 = vmul.f32 0.5, %v3889_v44  ;;  %v3895_v5 = vpop.eup %3894  ;;  %v1680_v33 = vmul.f32 0.5, %v3893_v28  ;;  %s4934_s3 = scalar_lea.vmem %s8314_s27, 65536 }
  0x51   : > { %8416 = vst [vmem:[#allocation34_spill] sm:$0xff] %v5379_v17  ;;  %v2699_v48 = vmul.f32 %v2187_v9, %v5137_v1  ;;  %v2189_v61 = vadd.f32 0.5, %v1677_v54  ;;  %v1679_v17 = vmul.f32 0.5, %v3891_v55  ;;  %3914 = vtanh.f32 %v5217_v35  ;;  %v3897_v1 = vpop.eup %3896  ;;  %p4935_p6 = scmp.ne.s32.totalorder %s8314_s27, %s4934_s3  ;;  %p8444_p10 = scmp.ne.s32.totalorder %s8387_s18, 0 }
  0x52   : > { %3210 = vst [vmem:[%s5391_s17] sm:$0xff] %v2698_v62  ;;  %v2700_v0 = vmul.f32 %v2188_v23, %v5140_v2  ;;  %v2190_v29 = vadd.f32 0.5, %v1678_v50  ;;  %v1681_v55 = vmul.f32 0.5, %v3895_v5  ;;  %3916 = vtanh.f32 %v5229_v39  ;;  %v3899_v56 = vpop.eup %3898  ;;  %s5005_s4 = smov [#allocation5]  }
  0x53   : > { %3211 = vst [vmem:[%s5391_s17 + $0x8] sm:$0xff] %v2699_v48  ;;  %v2701_v44 = vmul.f32 %v2189_v61, %v5146_v6  ;;  %v2191_v34 = vadd.f32 0.5, %v1679_v17  ;;  %v2192_v9 = vadd.f32 0.5, %v1680_v33  ;;  %v1682_v2 = vmul.f32 0.5, %v3897_v1  ;;  %v3901_v10 = vpop.eup %3900  ;;  %p4936_p11 = pnand %p4935_p6, %p8444_p10  ;;  %s4938_s5 = sshll.u32 %s5005_s4, 4  ;;  %s4939_s5 = int_to_ptr.vmem [resolvable:$false] %s4938_s5 }
  0x54   : > { %3212 = vst [vmem:[%s5391_s17 + $0x10] sm:$0xff] %v2700_v0  ;;  %v2702_v62 = vmul.f32 %v2190_v29, %v5149_v7  ;;  %3918 = vtanh.f32 %v5232_v40  ;;  %v2193_v22 = vadd.f32 0.5, %v1681_v55  ;;  %v1683_v6 = vmul.f32 0.5, %v3899_v56  ;;  %v3903_v61 = vpop.eup %3902  ;;  %s4940_s11 = scalar_lea.vmem %s4939_s5, 131072  ;;  %p4941_p8 = scmp.lt.s32.totalorder %s8314_s27, %s4939_s5 }
  0x55   : > { %3213 = vst [vmem:[%s5391_s17 + $0x18] sm:$0xff] %v2701_v44  ;;  %v2703_v35 = vmul.f32 %v2191_v34, %v5152_v8  ;;  %3920 = vtanh.f32 %v5235_v41  ;;  %v2704_v39 = vmul.f32 %v2192_v9, %v5158_v12  ;;  %v2194_v17 = vadd.f32 0.5, %v1682_v2  ;;  %v3905_v23 = vpop.eup %3904  ;;  %p4937_p12 = pneg %p4936_p11  ;;  %p4942_p9 = scmp.lt.s32.totalorder %s4940_s11, %s4934_s3 }
  0x56   : > { %3214 = vst [vmem:[%s5391_s17 + $0x20] sm:$0xff] %v2702_v62  ;;  %v1684_v7 = vmul.f32 0.5, %v3901_v10  ;;  %3922 = vtanh.f32 %v5247_v45  ;;  %v2705_v40 = vmul.f32 %v2193_v22, %v5161_v13  ;;  %v2195_v54 = vadd.f32 0.5, %v1683_v6  ;;  %v3907_v50 = vpop.eup %3906 }
  0x57   : > { %3215 = vst [vmem:[%s5391_s17 + $0x28] sm:$0xff] %v2703_v35  ;;  %v1685_v8 = vmul.f32 0.5, %v3903_v61  ;;  %3924 = vtanh.f32 %v5250_v46  ;;  %3216 = vst [vmem:[%s5391_s17 + $0x30] sm:$0xff] %v2704_v39  ;;  %v2706_v41 = vmul.f32 %v2194_v17, %v5164_v14  ;;  %v1686_v12 = vmul.f32 0.5, %v3905_v23  ;;  %v3909_v48 = vpop.eup %3908  ;;  %p4943_p13 = por %p4942_p9, %p4941_p8 }
  0x58   : > { %v2196_v28 = vadd.f32 0.5, %v1684_v7  ;;  %3926 = vtanh.f32 %v5253_v47  ;;  %3217 = vst [vmem:[%s5391_s17 + $0x38] sm:$0xff] %v2705_v40  ;;  %v2707_v45 = vmul.f32 %v2195_v54, %v5170_v18  ;;  %v1687_v13 = vmul.f32 0.5, %v3907_v50  ;;  %v3911_v0 = vpop.eup %3910 }
  0x59   : > { %v2197_v5 = vadd.f32 0.5, %v1685_v8  ;;  %3928 = vtanh.f32 %v5265_v51  ;;  %3218 = vst [vmem:[%s5391_s17 + $0x40] sm:$0xff] %v2706_v41  ;;  %v2198_v29 = vadd.f32 0.5, %v1686_v12  ;;  %v1688_v14 = vmul.f32 0.5, %v3909_v48  ;;  %v3913_v33 = vpop.eup %3912  ;;  %v8417_v12 = vld [vmem:[#allocation24_spill] sm:$0xff]  ;;  %p4944_p1 = pnand %p4943_p13, %p4937_p12 }
  0x5a   : > { %v2708_v46 = vmul.f32 %v2196_v28, %v5173_v19  ;;  %3930 = vtanh.f32 %v5268_v52  ;;  %3219 = vst [vmem:[%s5391_s17 + $0x48] sm:$0xff] %v2707_v45  ;;  %v2199_v1 = vadd.f32 0.5, %v1687_v13  ;;  %v1689_v18 = vmul.f32 0.5, %v3911_v0  ;;  %v8419_v13 = vld [vmem:[#allocation25_spill] sm:$0xff] }
  0x5b   : > { %v2709_v47 = vmul.f32 %v2197_v5, %v5176_v20  ;;  %3932 = vtanh.f32 %v5271_v53  ;;  %v3915_v44 = vpop.eup %3914  ;;  %v2710_v51 = vmul.f32 %v2198_v29, %v5184_v24  ;;  %v2200_v34 = vadd.f32 0.5, %v1688_v14  ;;  %v8421_v14 = vld [vmem:[#allocation29_spill] sm:$0xff] }
  0x5c   : > { %3220 = vst [vmem:[%s5391_s17 + $0x50] sm:$0xff] %v2708_v46  ;;  %v1690_v19 = vmul.f32 0.5, %v3913_v33  ;;  %3934 = vtanh.f32 %v5283_v57  ;;  %v3917_v55 = vpop.eup %3916  ;;  %v2711_v52 = vmul.f32 %v2199_v1, %v5187_v25  ;;  %v2201_v56 = vadd.f32 0.5, %v1689_v18 }
  0x5d   : > { %3221 = vst [vmem:[%s5391_s17 + $0x58] sm:$0xff] %v2709_v47  ;;  %v1691_v20 = vmul.f32 0.5, %v3915_v44  ;;  %3936 = vtanh.f32 %v5286_v58  ;;  %3222 = vst [vmem:[%s5391_s17 + $0x60] sm:$0xff] %v2710_v51  ;;  %v2712_v53 = vmul.f32 %v2200_v34, %v5190_v26  ;;  %v1692_v24 = vmul.f32 0.5, %v3917_v55  ;;  %v8422_v47 = vld [vmem:[#allocation10_spill] sm:$0xff] }
  0x5e   : > { %v3919_v62 = vpop.eup %3918  ;;  %v2202_v9 = vadd.f32 0.5, %v1690_v19  ;;  %3938 = vtanh.f32 %v5289_v59  ;;  %3223 = vst [vmem:[%s5391_s17 + $0x68] sm:$0xff] %v2711_v52  ;;  %v2713_v57 = vmul.f32 %v2201_v56, %v5202_v30  ;;  %v8423_v51 = vld [vmem:[#allocation30_spill] sm:$0xff]  ;;  %v8424_v19 = vld [vmem:[#allocation11_spill] sm:$0xff] }
  0x5f   : > { %v3921_v2 = vpop.eup %3920  ;;  %v2203_v10 = vadd.f32 0.5, %v1691_v20  ;;  %v1693_v25 = vmul.f32 0.5, %v3919_v62  ;;  %3940 = vtanh.f32 %v5301_v63  ;;  %3224 = vst [vmem:[%s5391_s17 + $0x70] sm:$0xff] %v2712_v53  ;;  %v2204_v22 = vadd.f32 0.5, %v1692_v24  ;;  %v8425_v62 = vld [vmem:[#allocation12_spill] sm:$0xff] }
  0x60   : > { %v3923_v35 = vpop.eup %3922  ;;  %v2714_v58 = vmul.f32 %v2202_v9, %v5205_v31  ;;  %v1694_v26 = vmul.f32 0.5, %v3921_v2  ;;  %3942 = vtanh.f32 %v5304_v3  ;;  %3225 = vst [vmem:[%s5391_s17 + $0x78] sm:$0xff] %v2713_v57  ;;  %v8426_v2 = vld [vmem:[#allocation33_spill] sm:$0xff] }
  0x61   : > { %v3925_v6 = vpop.eup %3924  ;;  %v2715_v59 = vmul.f32 %v2203_v10, %v5208_v32  ;;  %v2205_v61 = vadd.f32 0.5, %v1693_v25  ;;  %v1695_v30 = vmul.f32 0.5, %v3923_v35  ;;  %3944 = vtanh.f32 %v5307_v4  ;;  %v5472_v57 = vld [vmem:[%s5127_s30 + $0x168] sm:$0xff] }
  0x62   : > { %v3927_v39 = vpop.eup %3926  ;;  %3226 = vst [vmem:[%s5391_s17 + $0x80] sm:$0xff] %v2714_v58  ;;  %v2716_v63 = vmul.f32 %v2204_v22, %v5220_v36  ;;  %v2206_v17 = vadd.f32 0.5, %v1694_v26  ;;  %v1696_v31 = vmul.f32 0.5, %v3925_v6  ;;  %3946 = vtanh.f32 %v5319_v11  ;;  %v8427_v25 = vld [vmem:[#allocation13_spill] sm:$0xff]  ;;  %v8428_v26 = vld [vmem:[#allocation34_spill] sm:$0xff] }
  0x63   : > { %v3929_v7 = vpop.eup %3928  ;;  %3227 = vst [vmem:[%s5391_s17 + $0x88] sm:$0xff] %v2715_v59  ;;  %v2717_v3 = vmul.f32 %v2205_v61, %v5223_v37  ;;  %v2207_v23 = vadd.f32 0.5, %v1695_v30  ;;  %v1697_v32 = vmul.f32 0.5, %v3927_v39  ;;  %3948 = vtanh.f32 %v5322_v15  ;;  %v8429_v59 = vld [vmem:[#allocation14_spill] sm:$0xff] }
  0x64   : > { %v3931_v40 = vpop.eup %3930  ;;  %3228 = vst [vmem:[%s5391_s17 + $0x90] sm:$0xff] %v2716_v63  ;;  %v2718_v4 = vmul.f32 %v2206_v17, %v5226_v38  ;;  %v2208_v54 = vadd.f32 0.5, %v1696_v31  ;;  %v1698_v36 = vmul.f32 0.5, %v3929_v7  ;;  %3950 = vtanh.f32 %v5325_v16  ;;  %v8418_v16 = vld [vmem:[#allocation8_spill] sm:$0xff]  ;;  %v8430_v17 = vld [vmem:[#allocation15_spill] sm:$0xff] }
  0x65   : > { %v3933_v8 = vpop.eup %3932  ;;  %3229 = vst [vmem:[%s5391_s17 + $0x98] sm:$0xff] %v2717_v3  ;;  %v2719_v11 = vmul.f32 %v2207_v23, %v5238_v42  ;;  %v2209_v50 = vadd.f32 0.5, %v1697_v32  ;;  %v1699_v37 = vmul.f32 0.5, %v3931_v40  ;;  %3952 = vtanh.f32 %v5337_v21  ;;  %v8420_v21 = vld [vmem:[#allocation9_spill] sm:$0xff]  ;;  %v8431_v40 = vld [vmem:[#allocation16_spill] sm:$0xff] }
  0x66   : > { %v3935_v41 = vpop.eup %3934  ;;  %3230 = vst [vmem:[%s5391_s17 + $0xa0] sm:$0xff] %v2718_v4  ;;  %v2720_v15 = vmul.f32 %v2208_v54, %v5241_v43  ;;  %v2210_v28 = vadd.f32 0.5, %v1698_v36  ;;  %v1700_v38 = vmul.f32 0.5, %v3933_v8  ;;  %3954 = vtanh.f32 %v8417_v12  ;;  %v8433_v12 = vld [vmem:[#allocation18_spill] sm:$0xff] }
  0x67   : > { %v3937_v48 = vpop.eup %3936  ;;  %3231 = vst [vmem:[%s5391_s17 + $0xa8] sm:$0xff] %v2719_v11  ;;  %v2721_v45 = vmul.f32 %v2209_v50, %v8418_v16  ;;  %v2211_v5 = vadd.f32 0.5, %v1699_v37  ;;  %v1701_v42 = vmul.f32 0.5, %v3935_v41  ;;  %3956 = vtanh.f32 %v8419_v13  ;;  %v8432_v50 = vld [vmem:[#allocation17_spill] sm:$0xff] }
  0x68   : > { %v3939_v0 = vpop.eup %3938  ;;  %3232 = vst [vmem:[%s5391_s17 + $0xb0] sm:$0xff] %v2720_v15  ;;  %v2722_v46 = vmul.f32 %v2210_v28, %v8420_v21  ;;  %v2212_v29 = vadd.f32 0.5, %v1700_v38  ;;  %v1702_v43 = vmul.f32 0.5, %v3937_v48  ;;  %3958 = vtanh.f32 %v8421_v14  ;;  %v5495_v28 = vld [vmem:[%s5127_s30 + $0x180] sm:$0xff] }
  0x69   : > { %v3941_v33 = vpop.eup %3940  ;;  %3233 = vst [vmem:[%s5391_s17 + $0xb8] sm:$0xff] %v2721_v45  ;;  %v2723_v1 = vmul.f32 %v2211_v5, %v8422_v47  ;;  %v2213_v18 = vadd.f32 0.5, %v1701_v42  ;;  %v1703_v44 = vmul.f32 0.5, %v3939_v0  ;;  %3960 = vtanh.f32 %v8423_v51  ;;  %v8434_v42 = vld [vmem:[#allocation19_spill] sm:$0xff]  ;;  %v8436_v51 = vld [vmem:[#allocation21_spill] sm:$0xff] }
  0x6a   : > { %v3943_v34 = vpop.eup %3942  ;;  %3234 = vst [vmem:[%s5391_s17 + $0xc0] sm:$0xff] %v2722_v46  ;;  %v2724_v55 = vmul.f32 %v2212_v29, %v8424_v19  ;;  %v2214_v52 = vadd.f32 0.5, %v1702_v43  ;;  %v1704_v56 = vmul.f32 0.5, %v3941_v33  ;;  %3962 = vtanh.f32 %v5372_v60  ;;  %v5478_v60 = vld [vmem:[%s5127_s30 + $0x170] sm:$0xff]  ;;  %v8435_v43 = vld [vmem:[#allocation20_spill] sm:$0xff] }
  0x6b   : > { %v3945_v20 = vpop.eup %3944  ;;  %3235 = vst [vmem:[%s5391_s17 + $0xc8] sm:$0xff] %v2723_v1  ;;  %v2725_v53 = vmul.f32 %v2213_v18, %v8425_v62  ;;  %v2215_v9 = vadd.f32 0.5, %v1703_v44  ;;  %v1705_v24 = vmul.f32 0.5, %v3943_v34  ;;  %3964 = vtanh.f32 %v8426_v2  ;;  %v5506_v18 = vld [vmem:[%s5127_s30 + $0x188] sm:$0xff]  ;;  %v8438_v2 = vld [vmem:[#allocation23_spill] sm:$0xff] }
  0x6c   : > { %v3947_v10 = vpop.eup %3946  ;;  %3236 = vst [vmem:[%s5391_s17 + $0xd0] sm:$0xff] %v2724_v55  ;;  %v2726_v35 = vmul.f32 %v2214_v52, %v8427_v25  ;;  %v2216_v58 = vadd.f32 0.5, %v1704_v56  ;;  %v1706_v22 = vmul.f32 0.5, %v3945_v20  ;;  %3966 = vtanh.f32 %v8428_v26  ;;  %v5511_v52 = vld [vmem:[%s5127_s30 + $0x190] sm:$0xff] }
  0x6d   : > { %v3949_v6 = vpop.eup %3948  ;;  %3237 = vst [vmem:[%s5391_s17 + $0xd8] sm:$0xff] %v2725_v53  ;;  %v2727_v61 = vmul.f32 %v2215_v9, %v8429_v59  ;;  %v2217_v30 = vadd.f32 0.5, %v1705_v24  ;;  %v1707_v39 = vmul.f32 0.5, %v3947_v10  ;;  %3968 = vtanh.f32 %v5383_v27  ;;  %v5490_v27 = vld [vmem:[%s5127_s30 + $0x178] sm:$0xff]  ;;  %v8437_v20 = vld [vmem:[#allocation22_spill] sm:$0xff] }
  0x6e   : > { %v3951_v63 = vpop.eup %3950  ;;  %3238 = vst [vmem:[%s5391_s17 + $0xe0] sm:$0xff] %v2726_v35  ;;  %v2728_v31 = vmul.f32 %v2216_v58, %v8430_v17  ;;  %v2218_v7 = vadd.f32 0.5, %v1706_v22  ;;  %v1708_v3 = vmul.f32 0.5, %v3949_v6  ;;  %v695_v23 = vmul.f32 0.5, %v5472_v57  ;;  %v5519_v22 = vld [vmem:[%s5127_s30 + $0x198] sm:$0xff]  ;;  %v8439_v6 = vld [vmem:[#allocation26_spill] sm:$0xff] }
  0x6f   : > { %v3953_v32 = vpop.eup %3952  ;;  %3239 = vst [vmem:[%s5391_s17 + $0xe8] sm:$0xff] %v2727_v61  ;;  %v2729_v4 = vmul.f32 %v2217_v30, %v8431_v40  ;;  %v2219_v54 = vadd.f32 0.5, %v1707_v39  ;;  %v1709_v36 = vmul.f32 0.5, %v3951_v63  ;;  %v696_v8 = vmul.f32 0.5, %v5478_v60  ;;  %v5525_v63 = vld [vmem:[%s5127_s30 + $0x1a0] sm:$0xff]  ;;  %v5528_v17 = vld [vmem:[%s5127_s30 + $0x1a8] sm:$0xff] }
  0x70   : > { %v3955_v11 = vpop.eup %3954  ;;  %3240 = vst [vmem:[%s5391_s17 + $0xf0] sm:$0xff] %v2728_v31  ;;  %v2730_v37 = vmul.f32 %v2218_v7, %v8432_v50  ;;  %v2220_v41 = vadd.f32 0.5, %v1708_v3  ;;  %v1710_v15 = vmul.f32 0.5, %v3953_v32  ;;  %3970 = vtanh.f32 %v695_v23  ;;  %v8440_v31 = vld [vmem:[#allocation27_spill] sm:$0xff]  ;;  %v5533_v32 = vld [vmem:[%s5127_s30 + $0x1b0] sm:$0xff]  ;;  %v8441_v40 = vld [vmem:[#allocation28_spill] sm:$0xff] }
  0x71   : > { %v3957_v38 = vpop.eup %3956  ;;  %3241 = vst [vmem:[%s5391_s17 + $0xf8] sm:$0xff] %v2729_v4  ;;  %v2731_v48 = vmul.f32 %v2219_v54, %v8433_v12  ;;  %v2221_v16 = vadd.f32 0.5, %v1709_v36  ;;  %v1711_v45 = vmul.f32 0.5, %v3955_v11  ;;  %3972 = vtanh.f32 %v696_v8  ;;  %v5539_v8 = vld [vmem:[%s5127_s30 + $0x1b8] sm:$0xff]  ;;  %v5546_v12 = vld [vmem:[%s5127_s30 + $0x1c0] sm:$0xff] }
  0x72   : > { %v3959_v5 = vpop.eup %3958  ;;  %3242 = vst [vmem:[%s5391_s17 + $0x100] sm:$0xff] %v2730_v37  ;;  %v2732_v13 = vmul.f32 %v2220_v41, %v8434_v42  ;;  %v2222_v0 = vadd.f32 0.5, %v1710_v15  ;;  %v1712_v21 = vmul.f32 0.5, %v3957_v38  ;;  %v697_v46 = vmul.f32 0.5, %v5490_v27  ;;  %v8442_v50 = vld [vmem:[#allocation31_spill] sm:$0xff] }
  0x73   : > { %v3961_v29 = vpop.eup %3960  ;;  %3243 = vst [vmem:[%s5391_s17 + $0x108] sm:$0xff] %v2731_v48  ;;  %v2733_v14 = vmul.f32 %v2221_v16, %v8435_v43  ;;  %v2223_v33 = vadd.f32 0.5, %v1711_v45  ;;  %v1713_v47 = vmul.f32 0.5, %v3959_v5  ;;  %v698_v1 = vmul.f32 0.5, %v5495_v28  ;;  %v5549_v48 = vld [vmem:[%s5127_s30 + $0x1c8] sm:$0xff]  ;;  %v8443_v45 = vld [vmem:[#allocation32_spill] sm:$0xff] }
  0x74   : > { %v3963_v44 = vpop.eup %3962  ;;  %3244 = vst [vmem:[%s5391_s17 + $0x110] sm:$0xff] %v2732_v13  ;;  %v2734_v34 = vmul.f32 %v2222_v0, %v8436_v51  ;;  %v2224_v19 = vadd.f32 0.5, %v1712_v21  ;;  %v1714_v55 = vmul.f32 0.5, %v3961_v29  ;;  %3974 = vtanh.f32 %v697_v46  ;;  %v5555_v0 = vld [vmem:[%s5127_s30 + $0x1d0] sm:$0xff]  ;;  %v5558_v21 = vld [vmem:[%s5127_s30 + $0x1d8] sm:$0xff] }
  0x75   : > { %v3965_v56 = vpop.eup %3964  ;;  %3245 = vst [vmem:[%s5391_s17 + $0x118] sm:$0xff] %v2733_v14  ;;  %v2735_v62 = vmul.f32 %v2223_v33, %v8437_v20  ;;  %v2225_v53 = vadd.f32 0.5, %v1713_v47  ;;  %v1715_v9 = vmul.f32 0.5, %v3963_v44  ;;  %3976 = vtanh.f32 %v698_v1  ;;  %v5564_v14 = vld [vmem:[%s5127_s30 + $0x1e0] sm:$0xff]  ;;  %v5570_v44 = vld [vmem:[%s5127_s30 + $0x1e8] sm:$0xff] }
  0x76   : > { %v3967_v24 = vpop.eup %3966  ;;  %3246 = vst [vmem:[%s5391_s17 + $0x120] sm:$0xff] %v2734_v34  ;;  %v2736_v10 = vmul.f32 %v2224_v19, %v8438_v2  ;;  %v2226_v25 = vadd.f32 0.5, %v1714_v55  ;;  %v1716_v35 = vmul.f32 0.5, %v3965_v56  ;;  %v699_v58 = vmul.f32 0.5, %v5506_v18  ;;  %v5576_v55 = vld [vmem:[%s5127_s30 + $0x1f0] sm:$0xff]  ;;  %v5579_v56 = vld [vmem:[%s5127_s30 + $0x1f8] sm:$0xff] }
  0x77   : > { %v3969_v26 = vpop.eup %3968  ;;  %3247 = vst [vmem:[%s5391_s17 + $0x128] sm:$0xff] %v2735_v62  ;;  %v2737_v59 = vmul.f32 %v2225_v53, %v8439_v6  ;;  %v2227_v61 = vadd.f32 0.5, %v1715_v9  ;;  %v1717_v30 = vmul.f32 0.5, %v3967_v24  ;;  %v700_v39 = vmul.f32 0.5, %v5511_v52  ;;  %v5584_v24 = vld [vmem:[%s5127_s30 + $0x200] sm:$0xff]  ;;  %v5587_v2 = vld [vmem:[%s5127_s30 + $0x208] sm:$0xff] }
  0x78   : > { %3248 = vst [vmem:[%s5391_s17 + $0x130] sm:$0xff] %v2736_v10  ;;  %v2738_v7 = vmul.f32 %v2226_v25, %v8440_v31  ;;  %v2228_v3 = vadd.f32 0.5, %v1716_v35  ;;  %v1718_v23 = vmul.f32 0.5, %v3969_v26  ;;  %3978 = vtanh.f32 %v699_v58  ;;  %v5592_v58 = vld [vmem:[%s5127_s30 + $0x210] sm:$0xff]  ;;  %v5604_v31 = vld [vmem:[%s5127_s30 + $0x220] sm:$0xff] }
  0x79   : > { %3249 = vst [vmem:[%s5391_s17 + $0x138] sm:$0xff] %v2737_v59  ;;  %v2739_v4 = vmul.f32 %v2227_v61, %v8441_v40  ;;  %v2229_v54 = vadd.f32 0.5, %v1717_v30  ;;  %3980 = vtanh.f32 %v700_v39  ;;  %v701_v36 = vmul.f32 0.5, %v5519_v22  ;;  %v5598_v59 = vld [vmem:[%s5127_s30 + $0x218] sm:$0xff] }
  0x7a   : > { %v3971_v11 = vpop.eup %3970  ;;  %3250 = vst [vmem:[%s5391_s17 + $0x140] sm:$0xff] %v2738_v7  ;;  %v2740_v37 = vmul.f32 %v2228_v3, %v8442_v50  ;;  %v2230_v41 = vadd.f32 0.5, %v1718_v23  ;;  %v702_v15 = vmul.f32 0.5, %v5525_v63  ;;  %v703_v38 = vmul.f32 0.5, %v5528_v17  ;;  %v5607_v7 = vld [vmem:[%s5127_s30 + $0x228] sm:$0xff] }
  0x7b   : > { %v3973_v16 = vpop.eup %3972  ;;  %3251 = vst [vmem:[%s5391_s17 + $0x148] sm:$0xff] %v2739_v4  ;;  %v2741_v5 = vmul.f32 %v2229_v54, %v8443_v45  ;;  %v1719_v42 = vmul.f32 0.5, %v3971_v11  ;;  %3982 = vtanh.f32 %v701_v36  ;;  %v704_v13 = vmul.f32 0.5, %v5533_v32  ;;  %v5612_v54 = vld [vmem:[%s5127_s30 + $0x230] sm:$0xff] }
  0x7c   : > { %3252 = vst [vmem:[%s5391_s17 + $0x150] sm:$0xff] %v2740_v37  ;;  %v2742_v46 = vmul.f32 %v2230_v41, %v5368_v49  ;;  %v1720_v29 = vmul.f32 0.5, %v3973_v16  ;;  %3984 = vtanh.f32 %v702_v15  ;;  %v705_v43 = vmul.f32 0.5, %v5539_v8  ;;  %v5617_v37 = vld [vmem:[%s5127_s30 + $0x238] sm:$0xff] }
  0x7d   : > { %3253 = vst [vmem:[%s5391_s17 + $0x158] sm:$0xff] %v2741_v5  ;;  %v2231_v33 = vadd.f32 0.5, %v1719_v42  ;;  %3986 = vtanh.f32 %v703_v38  ;;  %v706_v47 = vmul.f32 0.5, %v5546_v12  ;;  %v707_v1 = vmul.f32 0.5, %v5549_v48  ;;  %v5625_v42 = vld [vmem:[%s5127_s30 + $0x240] sm:$0xff] }
  0x7e   : > { %v3975_v49 = vpop.eup %3974  ;;  %3254 = vst [vmem:[%s5391_s17 + $0x160] sm:$0xff] %v2742_v46  ;;  %v2232_v51 = vadd.f32 0.5, %v1720_v29  ;;  %3988 = vtanh.f32 %v704_v13  ;;  %v708_v34 = vmul.f32 0.5, %v5555_v0  ;;  %v709_v19 = vmul.f32 0.5, %v5558_v21 }
  0x7f   : > { %v3977_v20 = vpop.eup %3976  ;;  %v2743_v62 = vmul.f32 %v2231_v33, %v5472_v57  ;;  %v1721_v53 = vmul.f32 0.5, %v3975_v49  ;;  %3990 = vtanh.f32 %v705_v43  ;;  %v710_v9 = vmul.f32 0.5, %v5564_v14 }
  0x80   : > { %v2744_v10 = vmul.f32 %v2232_v51, %v5478_v60  ;;  %v1722_v25 = vmul.f32 0.5, %v3977_v20  ;;  %3992 = vtanh.f32 %v706_v47  ;;  %v711_v35 = vmul.f32 0.5, %v5570_v44 }
  0x81   : > { %3255 = vst [vmem:[%s5391_s17 + $0x168] sm:$0xff] %v2743_v62  ;;  %v2233_v57 = vadd.f32 0.5, %v1721_v53  ;;  %3994 = vtanh.f32 %v707_v1  ;;  %v712_v26 = vmul.f32 0.5, %v5576_v55  ;;  %v713_v6 = vmul.f32 0.5, %v5579_v56 }
  0x82   : > { %v3979_v61 = vpop.eup %3978  ;;  %3256 = vst [vmem:[%s5391_s17 + $0x170] sm:$0xff] %v2744_v10  ;;  %v2234_v60 = vadd.f32 0.5, %v1722_v25  ;;  %3996 = vtanh.f32 %v708_v34  ;;  %v714_v30 = vmul.f32 0.5, %v5584_v24  ;;  %v715_v39 = vmul.f32 0.5, %v5587_v2 }
  0x83   : > { %v3981_v3 = vpop.eup %3980  ;;  %v2745_v23 = vmul.f32 %v2233_v57, %v5490_v27  ;;  %v1723_v40 = vmul.f32 0.5, %v3979_v61  ;;  %3998 = vtanh.f32 %v709_v19  ;;  %v716_v4 = vmul.f32 0.5, %v5592_v58 }
  0x84   : > { %v2746_v36 = vmul.f32 %v2234_v60, %v5495_v28  ;;  %v1724_v11 = vmul.f32 0.5, %v3981_v3  ;;  %4000 = vtanh.f32 %v710_v9  ;;  %v717_v50 = vmul.f32 0.5, %v5598_v59 }
  0x85   : > { %v3983_v41 = vpop.eup %3982  ;;  %3257 = vst [vmem:[%s5391_s17 + $0x178] sm:$0xff] %v2745_v23  ;;  %v2235_v15 = vadd.f32 0.5, %v1723_v40  ;;  %4002 = vtanh.f32 %v711_v35  ;;  %v718_v27 = vmul.f32 0.5, %v5604_v31  ;;  %v719_v38 = vmul.f32 0.5, %v5607_v7  ;;  %v5642_v40 = vld [vmem:[%s5127_s30 + $0x248] sm:$0xff] }
  0x86   : > { %v3985_v16 = vpop.eup %3984  ;;  %3258 = vst [vmem:[%s5391_s17 + $0x180] sm:$0xff] %v2746_v36  ;;  %v2236_v45 = vadd.f32 0.5, %v1724_v11  ;;  %v1725_v28 = vmul.f32 0.5, %v3983_v41  ;;  %4004 = vtanh.f32 %v712_v26  ;;  %v720_v5 = vmul.f32 0.5, %v5612_v54 }
  0x87   : > { %v3987_v13 = vpop.eup %3986  ;;  %v2747_v46 = vmul.f32 %v2235_v15, %v5506_v18  ;;  %v1726_v29 = vmul.f32 0.5, %v3985_v16  ;;  %4006 = vtanh.f32 %v713_v6  ;;  %v721_v43 = vmul.f32 0.5, %v5617_v37 }
  0x88   : > { %v3989_v33 = vpop.eup %3988  ;;  %v2748_v47 = vmul.f32 %v2236_v45, %v5511_v52  ;;  %v2237_v1 = vadd.f32 0.5, %v1725_v28  ;;  %v1727_v49 = vmul.f32 0.5, %v3987_v13  ;;  %4008 = vtanh.f32 %v714_v30 }
  0x89   : > { %v3991_v51 = vpop.eup %3990  ;;  %3259 = vst [vmem:[%s5391_s17 + $0x188] sm:$0xff] %v2747_v46  ;;  %v2238_v34 = vadd.f32 0.5, %v1726_v29  ;;  %v1728_v19 = vmul.f32 0.5, %v3989_v33  ;;  %4010 = vtanh.f32 %v715_v39  ;;  %v722_v20 = vmul.f32 0.5, %v5625_v42 }
  0x8a   : > { %v3993_v18 = vpop.eup %3992  ;;  %3260 = vst [vmem:[%s5391_s17 + $0x190] sm:$0xff] %v2748_v47  ;;  %v2749_v62 = vmul.f32 %v2237_v1, %v5519_v22  ;;  %v2239_v53 = vadd.f32 0.5, %v1727_v49  ;;  %v1729_v9 = vmul.f32 0.5, %v3991_v51  ;;  %4012 = vtanh.f32 %v716_v4  ;;  %v5663_v49 = vld [vmem:[%s5127_s30 + $0x260] sm:$0xff] }
  0x8b   : > { %v3995_v52 = vpop.eup %3994  ;;  %v2750_v10 = vmul.f32 %v2238_v34, %v5525_v63  ;;  %v2240_v25 = vadd.f32 0.5, %v1728_v19  ;;  %v1730_v35 = vmul.f32 0.5, %v3993_v18  ;;  %4014 = vtanh.f32 %v717_v50  ;;  %v5647_v50 = vld [vmem:[%s5127_s30 + $0x250] sm:$0xff] }
  0x8c   : > { %v3997_v57 = vpop.eup %3996  ;;  %3261 = vst [vmem:[%s5391_s17 + $0x198] sm:$0xff] %v2749_v62  ;;  %v2751_v26 = vmul.f32 %v2239_v53, %v5528_v17  ;;  %v2241_v6 = vadd.f32 0.5, %v1729_v9  ;;  %v1731_v61 = vmul.f32 0.5, %v3995_v52  ;;  %4016 = vtanh.f32 %v718_v27 }
  0x8d   : > { %v3999_v22 = vpop.eup %3998  ;;  %3262 = vst [vmem:[%s5391_s17 + $0x1a0] sm:$0xff] %v2750_v10  ;;  %v2752_v60 = vmul.f32 %v2240_v25, %v5533_v32  ;;  %v2242_v30 = vadd.f32 0.5, %v1730_v35  ;;  %v1732_v63 = vmul.f32 0.5, %v3997_v57  ;;  %4018 = vtanh.f32 %v719_v38  ;;  %v5674_v35 = vld [vmem:[%s5127_s30 + $0x268] sm:$0xff] }
  0x8e   : > { %v4001_v39 = vpop.eup %4000  ;;  %3263 = vst [vmem:[%s5391_s17 + $0x1a8] sm:$0xff] %v2751_v26  ;;  %v2753_v3 = vmul.f32 %v2241_v6, %v5539_v8  ;;  %v2243_v23 = vadd.f32 0.5, %v1731_v61  ;;  %v1733_v17 = vmul.f32 0.5, %v3999_v22  ;;  %4020 = vtanh.f32 %v720_v5  ;;  %v5679_v61 = vld [vmem:[%s5127_s30 + $0x270] sm:$0xff] }
  0x8f   : > { %v4003_v4 = vpop.eup %4002  ;;  %3264 = vst [vmem:[%s5391_s17 + $0x1b0] sm:$0xff] %v2752_v60  ;;  %v2754_v36 = vmul.f32 %v2242_v30, %v5546_v12  ;;  %v2244_v32 = vadd.f32 0.5, %v1732_v63  ;;  %v1734_v11 = vmul.f32 0.5, %v4001_v39  ;;  %4022 = vtanh.f32 %v721_v43  ;;  %v5658_v43 = vld [vmem:[%s5127_s30 + $0x258] sm:$0xff] }
  0x90   : > { %v4005_v41 = vpop.eup %4004  ;;  %3265 = vst [vmem:[%s5391_s17 + $0x1b8] sm:$0xff] %v2753_v3  ;;  %v2755_v8 = vmul.f32 %v2243_v23, %v5549_v48  ;;  %v2245_v15 = vadd.f32 0.5, %v1733_v17  ;;  %v1735_v27 = vmul.f32 0.5, %v4003_v4  ;;  %4024 = vtanh.f32 %v722_v20  ;;  %v5687_v17 = vld [vmem:[%s5127_s30 + $0x278] sm:$0xff] }
  0x91   : > { %v4007_v38 = vpop.eup %4006  ;;  %3266 = vst [vmem:[%s5391_s17 + $0x1c0] sm:$0xff] %v2754_v36  ;;  %v2756_v16 = vmul.f32 %v2244_v32, %v5555_v0  ;;  %v2246_v12 = vadd.f32 0.5, %v1734_v11  ;;  %v1736_v45 = vmul.f32 0.5, %v4005_v41  ;;  %v723_v28 = vmul.f32 0.5, %v5642_v40  ;;  %v5693_v41 = vld [vmem:[%s5127_s30 + $0x280] sm:$0xff] }
  0x92   : > { %v4009_v5 = vpop.eup %4008  ;;  %3267 = vst [vmem:[%s5391_s17 + $0x1c8] sm:$0xff] %v2755_v8  ;;  %v2757_v13 = vmul.f32 %v2245_v15, %v5558_v21  ;;  %v2247_v48 = vadd.f32 0.5, %v1735_v27  ;;  %v1737_v46 = vmul.f32 0.5, %v4007_v38  ;;  %v724_v29 = vmul.f32 0.5, %v5647_v50  ;;  %v5701_v38 = vld [vmem:[%s5127_s30 + $0x290] sm:$0xff] }
  0x93   : > { %v4011_v33 = vpop.eup %4010  ;;  %3268 = vst [vmem:[%s5391_s17 + $0x1d0] sm:$0xff] %v2756_v16  ;;  %v2758_v0 = vmul.f32 %v2246_v12, %v5564_v14  ;;  %v2248_v47 = vadd.f32 0.5, %v1736_v45  ;;  %v1738_v1 = vmul.f32 0.5, %v4009_v5  ;;  %4026 = vtanh.f32 %v723_v28  ;;  %v5707_v45 = vld [vmem:[%s5127_s30 + $0x298] sm:$0xff] }
  0x94   : > { %v4013_v51 = vpop.eup %4012  ;;  %3269 = vst [vmem:[%s5391_s17 + $0x1d8] sm:$0xff] %v2757_v13  ;;  %v2759_v21 = vmul.f32 %v2247_v48, %v5570_v44  ;;  %v2249_v34 = vadd.f32 0.5, %v1737_v46  ;;  %v1739_v19 = vmul.f32 0.5, %v4011_v33  ;;  %4028 = vtanh.f32 %v724_v29  ;;  %v5717_v46 = vld [vmem:[%s5127_s30 + $0x2a8] sm:$0xff] }
  0x95   : > { %v4015_v20 = vpop.eup %4014  ;;  %3270 = vst [vmem:[%s5391_s17 + $0x1e0] sm:$0xff] %v2758_v0  ;;  %v2760_v18 = vmul.f32 %v2248_v47, %v5576_v55  ;;  %v2250_v14 = vadd.f32 0.5, %v1738_v1  ;;  %v1740_v62 = vmul.f32 0.5, %v4013_v51  ;;  %v725_v53 = vmul.f32 0.5, %v5658_v43  ;;  %v5723_v47 = vld [vmem:[%s5127_s30 + $0x2b0] sm:$0xff]  ;;  %v5726_v1 = vld [vmem:[%s5127_s30 + $0x2b8] sm:$0xff] }
  0x96   : > { %v4017_v9 = vpop.eup %4016  ;;  %3271 = vst [vmem:[%s5391_s17 + $0x1e8] sm:$0xff] %v2759_v21  ;;  %v2761_v52 = vmul.f32 %v2249_v34, %v5579_v56  ;;  %v2251_v44 = vadd.f32 0.5, %v1739_v19  ;;  %v1741_v10 = vmul.f32 0.5, %v4015_v20  ;;  %v726_v25 = vmul.f32 0.5, %v5663_v49 }
  0x97   : > { %v4019_v57 = vpop.eup %4018  ;;  %3272 = vst [vmem:[%s5391_s17 + $0x1f0] sm:$0xff] %v2760_v18  ;;  %v2762_v55 = vmul.f32 %v2250_v14, %v5584_v24  ;;  %v2252_v26 = vadd.f32 0.5, %v1740_v62  ;;  %v1742_v6 = vmul.f32 0.5, %v4017_v9  ;;  %4030 = vtanh.f32 %v725_v53  ;;  %v5738_v14 = vld [vmem:[%s5127_s30 + $0x2c8] sm:$0xff] }
  0x98   : > { %v4021_v22 = vpop.eup %4020  ;;  %3273 = vst [vmem:[%s5391_s17 + $0x1f8] sm:$0xff] %v2761_v52  ;;  %v2763_v56 = vmul.f32 %v2251_v44, %v5587_v2  ;;  %v2253_v60 = vadd.f32 0.5, %v1741_v10  ;;  %v1743_v30 = vmul.f32 0.5, %v4019_v57  ;;  %4032 = vtanh.f32 %v726_v25  ;;  %v5744_v52 = vld [vmem:[%s5127_s30 + $0x2d0] sm:$0xff]  ;;  %v5747_v44 = vld [vmem:[%s5127_s30 + $0x2d8] sm:$0xff] }
  0x99   : > { %v4023_v63 = vpop.eup %4022  ;;  %3274 = vst [vmem:[%s5391_s17 + $0x200] sm:$0xff] %v2762_v55  ;;  %v2764_v24 = vmul.f32 %v2252_v26, %v5592_v58  ;;  %v2254_v39 = vadd.f32 0.5, %v1742_v6  ;;  %v1744_v3 = vmul.f32 0.5, %v4021_v22  ;;  %v727_v23 = vmul.f32 0.5, %v5674_v35  ;;  %v5696_v58 = vld [vmem:[%s5127_s30 + $0x288] sm:$0xff]  ;;  %v5752_v26 = vld [vmem:[%s5127_s30 + $0x2e0] sm:$0xff] }
  0x9a   : > { %v4025_v4 = vpop.eup %4024  ;;  %3275 = vst [vmem:[%s5391_s17 + $0x208] sm:$0xff] %v2763_v56  ;;  %v2765_v2 = vmul.f32 %v2253_v60, %v5598_v59  ;;  %v2255_v36 = vadd.f32 0.5, %v1743_v30  ;;  %v1745_v32 = vmul.f32 0.5, %v4023_v63  ;;  %v728_v11 = vmul.f32 0.5, %v5679_v61  ;;  %v5755_v6 = vld [vmem:[%s5127_s30 + $0x2e8] sm:$0xff]  ;;  %v5760_v30 = vld [vmem:[%s5127_s30 + $0x2f0] sm:$0xff] }
  0x9b   : > { %3276 = vst [vmem:[%s5391_s17 + $0x210] sm:$0xff] %v2764_v24  ;;  %v2766_v8 = vmul.f32 %v2254_v39, %v5604_v31  ;;  %v2256_v15 = vadd.f32 0.5, %v1744_v3  ;;  %v1746_v27 = vmul.f32 0.5, %v4025_v4  ;;  %4034 = vtanh.f32 %v727_v23  ;;  %v5766_v39 = vld [vmem:[%s5127_s30 + $0x2f8] sm:$0xff] }
  0x9c   : > { %3277 = vst [vmem:[%s5391_s17 + $0x218] sm:$0xff] %v2765_v2  ;;  %v2767_v59 = vmul.f32 %v2255_v36, %v5607_v7  ;;  %v2257_v16 = vadd.f32 0.5, %v1745_v32  ;;  %4036 = vtanh.f32 %v728_v11  ;;  %v729_v12 = vmul.f32 0.5, %v5687_v17  ;;  %v5714_v7 = vld [vmem:[%s5127_s30 + $0x2a0] sm:$0xff]  ;;  %v5775_v36 = vld [vmem:[%s5127_s30 + $0x308] sm:$0xff] }
  0x9d   : > { %v4027_v31 = vpop.eup %4026  ;;  %3278 = vst [vmem:[%s5391_s17 + $0x220] sm:$0xff] %v2766_v8  ;;  %v2768_v28 = vmul.f32 %v2256_v15, %v5612_v54  ;;  %v2258_v5 = vadd.f32 0.5, %v1746_v27  ;;  %v730_v13 = vmul.f32 0.5, %v5693_v41  ;;  %v731_v48 = vmul.f32 0.5, %v5696_v58  ;;  %v5772_v2 = vld [vmem:[%s5127_s30 + $0x300] sm:$0xff]  ;;  %v5780_v27 = vld [vmem:[%s5127_s30 + $0x310] sm:$0xff] }
  0x9e   : > { %v4029_v29 = vpop.eup %4028  ;;  %3279 = vst [vmem:[%s5391_s17 + $0x228] sm:$0xff] %v2767_v59  ;;  %v2769_v33 = vmul.f32 %v2257_v16, %v5617_v37  ;;  %v1747_v0 = vmul.f32 0.5, %v4027_v31  ;;  %4038 = vtanh.f32 %v729_v12  ;;  %v732_v54 = vmul.f32 0.5, %v5701_v38  ;;  %v5732_v37 = vld [vmem:[%s5127_s30 + $0x2c0] sm:$0xff]  ;;  %v5785_v31 = vld [vmem:[%s5127_s30 + $0x318] sm:$0xff] }
  0x9f   : > { %3280 = vst [vmem:[%s5391_s17 + $0x230] sm:$0xff] %v2768_v28  ;;  %v2770_v51 = vmul.f32 %v2258_v5, %v5625_v42  ;;  %v1748_v21 = vmul.f32 0.5, %v4029_v29  ;;  %4040 = vtanh.f32 %v730_v13  ;;  %v733_v34 = vmul.f32 0.5, %v5707_v45 }
  0xa0   : > { %3281 = vst [vmem:[%s5391_s17 + $0x238] sm:$0xff] %v2769_v33  ;;  %v2259_v19 = vadd.f32 0.5, %v1747_v0  ;;  %4042 = vtanh.f32 %v731_v48  ;;  %v734_v20 = vmul.f32 0.5, %v5714_v7  ;;  %v735_v18 = vmul.f32 0.5, %v5717_v46  ;;  %v5793_v0 = vld [vmem:[%s5127_s30 + $0x320] sm:$0xff] }
  0xa1   : > { %v4031_v42 = vpop.eup %4030  ;;  %3282 = vst [vmem:[%s5391_s17 + $0x240] sm:$0xff] %v2770_v51  ;;  %v2260_v62 = vadd.f32 0.5, %v1748_v21  ;;  %4044 = vtanh.f32 %v732_v54  ;;  %v736_v53 = vmul.f32 0.5, %v5723_v47  ;;  %v737_v9 = vmul.f32 0.5, %v5726_v1 }
  0xa2   : > { %v4033_v10 = vpop.eup %4032  ;;  %v2771_v25 = vmul.f32 %v2259_v19, %v5642_v40  ;;  %v1749_v57 = vmul.f32 0.5, %v4031_v42  ;;  %4046 = vtanh.f32 %v733_v34  ;;  %v738_v55 = vmul.f32 0.5, %v5732_v37 }
  0xa3   : > { %v2772_v22 = vmul.f32 %v2260_v62, %v5647_v50  ;;  %v1750_v56 = vmul.f32 0.5, %v4033_v10  ;;  %4048 = vtanh.f32 %v734_v20  ;;  %v739_v60 = vmul.f32 0.5, %v5738_v14 }
  0xa4   : > { %3283 = vst [vmem:[%s5391_s17 + $0x248] sm:$0xff] %v2771_v25  ;;  %v2261_v40 = vadd.f32 0.5, %v1749_v57  ;;  %4050 = vtanh.f32 %v735_v18  ;;  %v740_v63 = vmul.f32 0.5, %v5744_v52  ;;  %v741_v24 = vmul.f32 0.5, %v5747_v44 }
  0xa5   : > { %v4035_v3 = vpop.eup %4034  ;;  %3284 = vst [vmem:[%s5391_s17 + $0x250] sm:$0xff] %v2772_v22  ;;  %v2262_v50 = vadd.f32 0.5, %v1750_v56  ;;  %4052 = vtanh.f32 %v736_v53  ;;  %v742_v23 = vmul.f32 0.5, %v5752_v26  ;;  %v743_v4 = vmul.f32 0.5, %v5755_v6 }
  0xa6   : > { %v4037_v32 = vpop.eup %4036  ;;  %v2773_v11 = vmul.f32 %v2261_v40, %v5658_v43  ;;  %v1751_v8 = vmul.f32 0.5, %v4035_v3  ;;  %4054 = vtanh.f32 %v737_v9  ;;  %v744_v15 = vmul.f32 0.5, %v5760_v30 }
  0xa7   : > { %v2774_v59 = vmul.f32 %v2262_v50, %v5663_v49  ;;  %v1752_v16 = vmul.f32 0.5, %v4037_v32  ;;  %4056 = vtanh.f32 %v738_v55  ;;  %v745_v12 = vmul.f32 0.5, %v5766_v39 }
  0xa8   : > { %v4039_v28 = vpop.eup %4038  ;;  %3285 = vst [vmem:[%s5391_s17 + $0x258] sm:$0xff] %v2773_v11  ;;  %v2263_v5 = vadd.f32 0.5, %v1751_v8  ;;  %4058 = vtanh.f32 %v739_v60  ;;  %v746_v43 = vmul.f32 0.5, %v5772_v2  ;;  %v747_v13 = vmul.f32 0.5, %v5775_v36  ;;  %v5810_v8 = vld [vmem:[%s5127_s30 + $0x328] sm:$0xff] }
  0xa9   : > { %v4041_v48 = vpop.eup %4040  ;;  %3286 = vst [vmem:[%s5391_s17 + $0x260] sm:$0xff] %v2774_v59  ;;  %v2264_v29 = vadd.f32 0.5, %v1752_v16  ;;  %v1753_v49 = vmul.f32 0.5, %v4039_v28  ;;  %4060 = vtanh.f32 %v740_v63  ;;  %v748_v33 = vmul.f32 0.5, %v5780_v27 }
  0xaa   : > { %v4043_v54 = vpop.eup %4042  ;;  %v2775_v51 = vmul.f32 %v2263_v5, %v5674_v35  ;;  %v1754_v21 = vmul.f32 0.5, %v4041_v48  ;;  %4062 = vtanh.f32 %v741_v24  ;;  %v749_v34 = vmul.f32 0.5, %v5785_v31 }
  0xab   : > { %v4045_v19 = vpop.eup %4044  ;;  %v2776_v20 = vmul.f32 %v2264_v29, %v5679_v61  ;;  %v2265_v18 = vadd.f32 0.5, %v1753_v49  ;;  %v1755_v42 = vmul.f32 0.5, %v4043_v54  ;;  %4064 = vtanh.f32 %v742_v23 }
  0xac   : > { %v4047_v62 = vpop.eup %4046  ;;  %3287 = vst [vmem:[%s5391_s17 + $0x268] sm:$0xff] %v2775_v51  ;;  %v2266_v53 = vadd.f32 0.5, %v1754_v21  ;;  %v1756_v9 = vmul.f32 0.5, %v4045_v19  ;;  %4066 = vtanh.f32 %v743_v4  ;;  %v750_v10 = vmul.f32 0.5, %v5793_v0 }
  0xad   : > { %v4049_v35 = vpop.eup %4048  ;;  %3288 = vst [vmem:[%s5391_s17 + $0x270] sm:$0xff] %v2776_v20  ;;  %v2777_v25 = vmul.f32 %v2265_v18, %v5687_v17  ;;  %v2267_v57 = vadd.f32 0.5, %v1755_v42  ;;  %v1757_v55 = vmul.f32 0.5, %v4047_v62  ;;  %4068 = vtanh.f32 %v744_v15  ;;  %v5831_v42 = vld [vmem:[%s5127_s30 + $0x340] sm:$0xff] }
  0xae   : > { %v4051_v61 = vpop.eup %4050  ;;  %v2778_v22 = vmul.f32 %v2266_v53, %v5693_v41  ;;  %v2268_v56 = vadd.f32 0.5, %v1756_v9  ;;  %v1758_v60 = vmul.f32 0.5, %v4049_v35  ;;  %4070 = vtanh.f32 %v745_v12  ;;  %v5815_v12 = vld [vmem:[%s5127_s30 + $0x330] sm:$0xff] }
  0xaf   : > { %v4053_v40 = vpop.eup %4052  ;;  %3289 = vst [vmem:[%s5391_s17 + $0x278] sm:$0xff] %v2777_v25  ;;  %v2779_v63 = vmul.f32 %v2267_v57, %v5696_v58  ;;  %v2269_v24 = vadd.f32 0.5, %v1757_v55  ;;  %v1759_v3 = vmul.f32 0.5, %v4051_v61  ;;  %4072 = vtanh.f32 %v746_v43 }
  0xb0   : > { %v4055_v17 = vpop.eup %4054  ;;  %3290 = vst [vmem:[%s5391_s17 + $0x280] sm:$0xff] %v2778_v22  ;;  %v2780_v50 = vmul.f32 %v2268_v56, %v5701_v38  ;;  %v2270_v23 = vadd.f32 0.5, %v1758_v60  ;;  %v1760_v41 = vmul.f32 0.5, %v4053_v40  ;;  %4074 = vtanh.f32 %v747_v13  ;;  %v5842_v60 = vld [vmem:[%s5127_s30 + $0x348] sm:$0xff] }
  0xb1   : > { %v4057_v4 = vpop.eup %4056  ;;  %3291 = vst [vmem:[%s5391_s17 + $0x288] sm:$0xff] %v2779_v63  ;;  %v2781_v32 = vmul.f32 %v2269_v24, %v5707_v45  ;;  %v2271_v11 = vadd.f32 0.5, %v1759_v3  ;;  %v1761_v58 = vmul.f32 0.5, %v4055_v17  ;;  %4076 = vtanh.f32 %v748_v33  ;;  %v5847_v3 = vld [vmem:[%s5127_s30 + $0x350] sm:$0xff] }
  0xb2   : > { %v4059_v15 = vpop.eup %4058  ;;  %3292 = vst [vmem:[%s5391_s17 + $0x290] sm:$0xff] %v2780_v50  ;;  %v2782_v59 = vmul.f32 %v2270_v23, %v5714_v7  ;;  %v2272_v38 = vadd.f32 0.5, %v1760_v41  ;;  %v1762_v16 = vmul.f32 0.5, %v4057_v4  ;;  %4078 = vtanh.f32 %v749_v34  ;;  %v5826_v34 = vld [vmem:[%s5127_s30 + $0x338] sm:$0xff] }
  0xb3   : > { %v4061_v28 = vpop.eup %4060  ;;  %3293 = vst [vmem:[%s5391_s17 + $0x298] sm:$0xff] %v2781_v32  ;;  %v2783_v45 = vmul.f32 %v2271_v11, %v5717_v46  ;;  %v2273_v5 = vadd.f32 0.5, %v1761_v58  ;;  %v1763_v43 = vmul.f32 0.5, %v4059_v15  ;;  %4080 = vtanh.f32 %v750_v10  ;;  %v5855_v58 = vld [vmem:[%s5127_s30 + $0x358] sm:$0xff] }
  0xb4   : > { %v4063_v13 = vpop.eup %4062  ;;  %3294 = vst [vmem:[%s5391_s17 + $0x2a0] sm:$0xff] %v2782_v59  ;;  %v2784_v48 = vmul.f32 %v2272_v38, %v5723_v47  ;;  %v2274_v7 = vadd.f32 0.5, %v1762_v16  ;;  %v1764_v29 = vmul.f32 0.5, %v4061_v28  ;;  %v751_v49 = vmul.f32 0.5, %v5810_v8  ;;  %v5861_v28 = vld [vmem:[%s5127_s30 + $0x360] sm:$0xff] }
  0xb5   : > { %v4065_v33 = vpop.eup %4064  ;;  %3295 = vst [vmem:[%s5391_s17 + $0x2a8] sm:$0xff] %v2783_v45  ;;  %v2785_v54 = vmul.f32 %v2273_v5, %v5726_v1  ;;  %v2275_v46 = vadd.f32 0.5, %v1763_v43  ;;  %v1765_v51 = vmul.f32 0.5, %v4063_v13  ;;  %v752_v21 = vmul.f32 0.5, %v5815_v12  ;;  %v5869_v13 = vld [vmem:[%s5127_s30 + $0x370] sm:$0xff] }
  0xb6   : > { %v4067_v19 = vpop.eup %4066  ;;  %3296 = vst [vmem:[%s5391_s17 + $0x2b0] sm:$0xff] %v2784_v48  ;;  %v2786_v47 = vmul.f32 %v2274_v7, %v5732_v37  ;;  %v2276_v20 = vadd.f32 0.5, %v1764_v29  ;;  %v1766_v18 = vmul.f32 0.5, %v4065_v33  ;;  %4082 = vtanh.f32 %v751_v49  ;;  %v5875_v29 = vld [vmem:[%s5127_s30 + $0x378] sm:$0xff] }
  0xb7   : > { %v4069_v62 = vpop.eup %4068  ;;  %3297 = vst [vmem:[%s5391_s17 + $0x2b8] sm:$0xff] %v2785_v54  ;;  %v2787_v1 = vmul.f32 %v2275_v46, %v5738_v14  ;;  %v2277_v53 = vadd.f32 0.5, %v1765_v51  ;;  %v1767_v9 = vmul.f32 0.5, %v4067_v19  ;;  %4084 = vtanh.f32 %v752_v21  ;;  %v5885_v51 = vld [vmem:[%s5127_s30 + $0x388] sm:$0xff] }
  0xb8   : > { %v4071_v10 = vpop.eup %4070  ;;  %3298 = vst [vmem:[%s5391_s17 + $0x2c0] sm:$0xff] %v2786_v47  ;;  %v2788_v35 = vmul.f32 %v2276_v20, %v5744_v52  ;;  %v2278_v37 = vadd.f32 0.5, %v1766_v18  ;;  %v1768_v25 = vmul.f32 0.5, %v4069_v62  ;;  %v753_v57 = vmul.f32 0.5, %v5826_v34  ;;  %v5891_v20 = vld [vmem:[%s5127_s30 + $0x390] sm:$0xff]  ;;  %v5894_v18 = vld [vmem:[%s5127_s30 + $0x398] sm:$0xff] }
  0xb9   : > { %v4073_v55 = vpop.eup %4072  ;;  %3299 = vst [vmem:[%s5391_s17 + $0x2c8] sm:$0xff] %v2787_v1  ;;  %v2789_v61 = vmul.f32 %v2277_v53, %v5747_v44  ;;  %v2279_v14 = vadd.f32 0.5, %v1767_v9  ;;  %v1769_v22 = vmul.f32 0.5, %v4071_v10  ;;  %v754_v56 = vmul.f32 0.5, %v5831_v42 }
  0xba   : > { %v4075_v40 = vpop.eup %4074  ;;  %3300 = vst [vmem:[%s5391_s17 + $0x2d0] sm:$0xff] %v2788_v35  ;;  %v2790_v52 = vmul.f32 %v2278_v37, %v5752_v26  ;;  %v2280_v63 = vadd.f32 0.5, %v1768_v25  ;;  %v1770_v24 = vmul.f32 0.5, %v4073_v55  ;;  %4086 = vtanh.f32 %v753_v57  ;;  %v5906_v37 = vld [vmem:[%s5127_s30 + $0x3a8] sm:$0xff] }
  0xbb   : > { %v4077_v17 = vpop.eup %4076  ;;  %3301 = vst [vmem:[%s5391_s17 + $0x2d8] sm:$0xff] %v2789_v61  ;;  %v2791_v44 = vmul.f32 %v2279_v14, %v5755_v6  ;;  %v2281_v50 = vadd.f32 0.5, %v1769_v22  ;;  %v1771_v23 = vmul.f32 0.5, %v4075_v40  ;;  %4088 = vtanh.f32 %v754_v56  ;;  %v5912_v61 = vld [vmem:[%s5127_s30 + $0x3b0] sm:$0xff]  ;;  %v5915_v14 = vld [vmem:[%s5127_s30 + $0x3b8] sm:$0xff] }
  0xbc   : > { %v4079_v41 = vpop.eup %4078  ;;  %3302 = vst [vmem:[%s5391_s17 + $0x2e0] sm:$0xff] %v2790_v52  ;;  %v2792_v26 = vmul.f32 %v2280_v63, %v5760_v30  ;;  %v2282_v4 = vadd.f32 0.5, %v1770_v24  ;;  %v1772_v32 = vmul.f32 0.5, %v4077_v17  ;;  %v755_v11 = vmul.f32 0.5, %v5842_v60  ;;  %v5864_v30 = vld [vmem:[%s5127_s30 + $0x368] sm:$0xff]  ;;  %v5920_v63 = vld [vmem:[%s5127_s30 + $0x3c0] sm:$0xff] }
  0xbd   : > { %v4081_v15 = vpop.eup %4080  ;;  %3303 = vst [vmem:[%s5391_s17 + $0x2e8] sm:$0xff] %v2791_v44  ;;  %v2793_v6 = vmul.f32 %v2281_v50, %v5766_v39  ;;  %v2283_v59 = vadd.f32 0.5, %v1771_v23  ;;  %v1773_v38 = vmul.f32 0.5, %v4079_v41  ;;  %v756_v16 = vmul.f32 0.5, %v5847_v3  ;;  %v5923_v24 = vld [vmem:[%s5127_s30 + $0x3c8] sm:$0xff]  ;;  %v5928_v23 = vld [vmem:[%s5127_s30 + $0x3d0] sm:$0xff] }
  0xbe   : > { %3304 = vst [vmem:[%s5391_s17 + $0x2f0] sm:$0xff] %v2792_v26  ;;  %v2794_v45 = vmul.f32 %v2282_v4, %v5772_v2  ;;  %v2284_v5 = vadd.f32 0.5, %v1772_v32  ;;  %v1774_v43 = vmul.f32 0.5, %v4081_v15  ;;  %4090 = vtanh.f32 %v755_v11  ;;  %v5934_v4 = vld [vmem:[%s5127_s30 + $0x3d8] sm:$0xff] }
  0xbf   : > { %3305 = vst [vmem:[%s5391_s17 + $0x2f8] sm:$0xff] %v2793_v6  ;;  %v2795_v39 = vmul.f32 %v2283_v59, %v5775_v36  ;;  %v2285_v48 = vadd.f32 0.5, %v1773_v38  ;;  %4092 = vtanh.f32 %v756_v16  ;;  %v757_v7 = vmul.f32 0.5, %v5855_v58  ;;  %v5882_v36 = vld [vmem:[%s5127_s30 + $0x380] sm:$0xff]  ;;  %v5943_v59 = vld [vmem:[%s5127_s30 + $0x3e8] sm:$0xff] }
  0xc0   : > { %v4083_v2 = vpop.eup %4082  ;;  %3306 = vst [vmem:[%s5391_s17 + $0x300] sm:$0xff] %v2794_v45  ;;  %v2796_v49 = vmul.f32 %v2284_v5, %v5780_v27  ;;  %v2286_v33 = vadd.f32 0.5, %v1774_v43  ;;  %v758_v54 = vmul.f32 0.5, %v5861_v28  ;;  %v759_v46 = vmul.f32 0.5, %v5864_v30  ;;  %v5940_v6 = vld [vmem:[%s5127_s30 + $0x3e0] sm:$0xff]  ;;  %v5948_v43 = vld [vmem:[%s5127_s30 + $0x3f0] sm:$0xff] }
  0xc1   : > { %v4085_v21 = vpop.eup %4084  ;;  %3307 = vst [vmem:[%s5391_s17 + $0x308] sm:$0xff] %v2795_v39  ;;  %v2797_v19 = vmul.f32 %v2285_v48, %v5785_v31  ;;  %v1775_v47 = vmul.f32 0.5, %v4083_v2  ;;  %4094 = vtanh.f32 %v757_v7  ;;  %v760_v27 = vmul.f32 0.5, %v5869_v13  ;;  %v5900_v31 = vld [vmem:[%s5127_s30 + $0x3a0] sm:$0xff]  ;;  %v5953_v2 = vld [vmem:[%s5127_s30 + $0x3f8] sm:$0xff] }
  0xc2   : > { %3308 = vst [vmem:[%s5391_s17 + $0x310] sm:$0xff] %v2796_v49  ;;  %v2798_v62 = vmul.f32 %v2286_v33, %v5793_v0  ;;  %v1776_v1 = vmul.f32 0.5, %v4085_v21  ;;  %4096 = vtanh.f32 %v758_v54  ;;  %v761_v53 = vmul.f32 0.5, %v5875_v29 }
  0xc3   : > { %3309 = vst [vmem:[%s5391_s17 + $0x318] sm:$0xff] %v2797_v19  ;;  %v2287_v9 = vadd.f32 0.5, %v1775_v47  ;;  %4098 = vtanh.f32 %v759_v46  ;;  %v762_v10 = vmul.f32 0.5, %v5882_v36  ;;  %v763_v35 = vmul.f32 0.5, %v5885_v51  ;;  %v5961_v47 = vld [vmem:[%s5127_s30 + $0x400] sm:$0xff] }
  0xc4   : > { %v4087_v0 = vpop.eup %4086  ;;  %3310 = vst [vmem:[%s5391_s17 + $0x320] sm:$0xff] %v2798_v62  ;;  %v2288_v25 = vadd.f32 0.5, %v1776_v1  ;;  %4100 = vtanh.f32 %v760_v27  ;;  %v764_v57 = vmul.f32 0.5, %v5891_v20  ;;  %v765_v55 = vmul.f32 0.5, %v5894_v18 }
  0xc5   : > { %v4089_v22 = vpop.eup %4088  ;;  %v2799_v56 = vmul.f32 %v2287_v9, %v5810_v8  ;;  %v1777_v40 = vmul.f32 0.5, %v4087_v0  ;;  %4102 = vtanh.f32 %v761_v53  ;;  %v766_v52 = vmul.f32 0.5, %v5900_v31 }
  0xc6   : > { %v2800_v17 = vmul.f32 %v2288_v25, %v5815_v12  ;;  %v1778_v44 = vmul.f32 0.5, %v4089_v22  ;;  %4104 = vtanh.f32 %v762_v10  ;;  %v767_v50 = vmul.f32 0.5, %v5906_v37 }
  0xc7   : > { %3311 = vst [vmem:[%s5391_s17 + $0x328] sm:$0xff] %v2799_v56  ;;  %v2289_v8 = vadd.f32 0.5, %v1777_v40  ;;  %4106 = vtanh.f32 %v763_v35  ;;  %v768_v41 = vmul.f32 0.5, %v5912_v61  ;;  %v769_v26 = vmul.f32 0.5, %v5915_v14 }
  0xc8   : > { %v4091_v32 = vpop.eup %4090  ;;  %3312 = vst [vmem:[%s5391_s17 + $0x330] sm:$0xff] %v2800_v17  ;;  %v2290_v12 = vadd.f32 0.5, %v1778_v44  ;;  %4108 = vtanh.f32 %v764_v57  ;;  %v770_v11 = vmul.f32 0.5, %v5920_v63  ;;  %v771_v15 = vmul.f32 0.5, %v5923_v24 }
  0xc9   : > { %v4093_v38 = vpop.eup %4092  ;;  %v2801_v16 = vmul.f32 %v2289_v8, %v5826_v34  ;;  %v1779_v45 = vmul.f32 0.5, %v4091_v32  ;;  %4110 = vtanh.f32 %v765_v55  ;;  %v772_v5 = vmul.f32 0.5, %v5928_v23 }
  0xca   : > { %v2802_v39 = vmul.f32 %v2290_v12, %v5831_v42  ;;  %v1780_v48 = vmul.f32 0.5, %v4093_v38  ;;  %4112 = vtanh.f32 %v766_v52  ;;  %v773_v7 = vmul.f32 0.5, %v5934_v4 }
  0xcb   : > { %v4095_v49 = vpop.eup %4094  ;;  %3313 = vst [vmem:[%s5391_s17 + $0x338] sm:$0xff] %v2801_v16  ;;  %v2291_v33 = vadd.f32 0.5, %v1779_v45  ;;  %4114 = vtanh.f32 %v767_v50  ;;  %v774_v34 = vmul.f32 0.5, %v5940_v6  ;;  %v775_v54 = vmul.f32 0.5, %v5943_v59  ;;  %v5978_v45 = vld [vmem:[%s5127_s30 + $0x408] sm:$0xff] }
  0xcc   : > { %v4097_v46 = vpop.eup %4096  ;;  %3314 = vst [vmem:[%s5391_s17 + $0x340] sm:$0xff] %v2802_v39  ;;  %v2292_v21 = vadd.f32 0.5, %v1780_v48  ;;  %v1781_v42 = vmul.f32 0.5, %v4095_v49  ;;  %4116 = vtanh.f32 %v768_v41  ;;  %v776_v19 = vmul.f32 0.5, %v5948_v43 }
  0xcd   : > { %v4099_v27 = vpop.eup %4098  ;;  %v2803_v62 = vmul.f32 %v2291_v33, %v5842_v60  ;;  %v1782_v1 = vmul.f32 0.5, %v4097_v46  ;;  %4118 = vtanh.f32 %v769_v26  ;;  %v777_v53 = vmul.f32 0.5, %v5953_v2 }
  0xce   : > { %v4101_v9 = vpop.eup %4100  ;;  %v2804_v10 = vmul.f32 %v2292_v21, %v5847_v3  ;;  %v2293_v35 = vadd.f32 0.5, %v1781_v42  ;;  %v1783_v0 = vmul.f32 0.5, %v4099_v27  ;;  %4120 = vtanh.f32 %v770_v11 }
  0xcf   : > { %v4103_v25 = vpop.eup %4102  ;;  %3315 = vst [vmem:[%s5391_s17 + $0x348] sm:$0xff] %v2803_v62  ;;  %v2294_v57 = vadd.f32 0.5, %v1782_v1  ;;  %v1784_v55 = vmul.f32 0.5, %v4101_v9  ;;  %4122 = vtanh.f32 %v771_v15  ;;  %v778_v22 = vmul.f32 0.5, %v5961_v47 }
  0xd0   : > { %v4105_v60 = vpop.eup %4104  ;;  %3316 = vst [vmem:[%s5391_s17 + $0x350] sm:$0xff] %v2804_v10  ;;  %v2805_v56 = vmul.f32 %v2293_v35, %v5855_v58  ;;  %v2295_v40 = vadd.f32 0.5, %v1783_v0  ;;  %v1785_v52 = vmul.f32 0.5, %v4103_v25  ;;  %4124 = vtanh.f32 %v772_v5  ;;  %v5999_v0 = vld [vmem:[%s5127_s30 + $0x420] sm:$0xff] }
  0xd1   : > { %v4107_v3 = vpop.eup %4106  ;;  %v2806_v17 = vmul.f32 %v2294_v57, %v5861_v28  ;;  %v2296_v44 = vadd.f32 0.5, %v1784_v55  ;;  %v1786_v50 = vmul.f32 0.5, %v4105_v60  ;;  %4126 = vtanh.f32 %v773_v7  ;;  %v5983_v7 = vld [vmem:[%s5127_s30 + $0x410] sm:$0xff] }
  0xd2   : > { %v4109_v8 = vpop.eup %4108  ;;  %3317 = vst [vmem:[%s5391_s17 + $0x358] sm:$0xff] %v2805_v56  ;;  %v2807_v41 = vmul.f32 %v2295_v40, %v5864_v30  ;;  %v2297_v26 = vadd.f32 0.5, %v1785_v52  ;;  %v1787_v32 = vmul.f32 0.5, %v4107_v3  ;;  %4128 = vtanh.f32 %v774_v34 }
  0xd3   : > { %v4111_v58 = vpop.eup %4110  ;;  %3318 = vst [vmem:[%s5391_s17 + $0x360] sm:$0xff] %v2806_v17  ;;  %v2808_v12 = vmul.f32 %v2296_v44, %v5869_v13  ;;  %v2298_v11 = vadd.f32 0.5, %v1786_v50  ;;  %v1788_v28 = vmul.f32 0.5, %v4109_v8  ;;  %4130 = vtanh.f32 %v775_v54  ;;  %v6010_v50 = vld [vmem:[%s5127_s30 + $0x428] sm:$0xff] }
  0xd4   : > { %v4113_v15 = vpop.eup %4112  ;;  %3319 = vst [vmem:[%s5391_s17 + $0x368] sm:$0xff] %v2807_v41  ;;  %v2809_v38 = vmul.f32 %v2297_v26, %v5875_v29  ;;  %v2299_v16 = vadd.f32 0.5, %v1787_v32  ;;  %v1789_v30 = vmul.f32 0.5, %v4111_v58  ;;  %4132 = vtanh.f32 %v776_v19  ;;  %v6015_v32 = vld [vmem:[%s5127_s30 + $0x430] sm:$0xff] }
  0xd5   : > { %v4115_v5 = vpop.eup %4114  ;;  %3320 = vst [vmem:[%s5391_s17 + $0x370] sm:$0xff] %v2808_v12  ;;  %v2810_v39 = vmul.f32 %v2298_v11, %v5882_v36  ;;  %v2300_v13 = vadd.f32 0.5, %v1788_v28  ;;  %v1790_v48 = vmul.f32 0.5, %v4113_v15  ;;  %4134 = vtanh.f32 %v777_v53  ;;  %v5994_v53 = vld [vmem:[%s5127_s30 + $0x418] sm:$0xff] }
  0xd6   : > { %v4117_v49 = vpop.eup %4116  ;;  %3321 = vst [vmem:[%s5391_s17 + $0x378] sm:$0xff] %v2809_v38  ;;  %v2811_v29 = vmul.f32 %v2299_v16, %v5885_v51  ;;  %v2301_v33 = vadd.f32 0.5, %v1789_v30  ;;  %v1791_v34 = vmul.f32 0.5, %v4115_v5  ;;  %4136 = vtanh.f32 %v778_v22  ;;  %v6023_v30 = vld [vmem:[%s5127_s30 + $0x438] sm:$0xff] }
  0xd7   : > { %v4119_v54 = vpop.eup %4118  ;;  %3322 = vst [vmem:[%s5391_s17 + $0x380] sm:$0xff] %v2810_v39  ;;  %v2812_v46 = vmul.f32 %v2300_v13, %v5891_v20  ;;  %v2302_v36 = vadd.f32 0.5, %v1790_v48  ;;  %v1792_v21 = vmul.f32 0.5, %v4117_v49  ;;  %v779_v42 = vmul.f32 0.5, %v5978_v45  ;;  %v6029_v49 = vld [vmem:[%s5127_s30 + $0x440] sm:$0xff] }
  0xd8   : > { %v4121_v19 = vpop.eup %4120  ;;  %3323 = vst [vmem:[%s5391_s17 + $0x388] sm:$0xff] %v2811_v29  ;;  %v2813_v27 = vmul.f32 %v2301_v33, %v5894_v18  ;;  %v2303_v51 = vadd.f32 0.5, %v1791_v34  ;;  %v1793_v62 = vmul.f32 0.5, %v4119_v54  ;;  %v780_v1 = vmul.f32 0.5, %v5983_v7  ;;  %v6037_v54 = vld [vmem:[%s5127_s30 + $0x450] sm:$0xff] }
  0xd9   : > { %v4123_v9 = vpop.eup %4122  ;;  %3324 = vst [vmem:[%s5391_s17 + $0x390] sm:$0xff] %v2812_v46  ;;  %v2814_v20 = vmul.f32 %v2302_v36, %v5900_v31  ;;  %v2304_v10 = vadd.f32 0.5, %v1792_v21  ;;  %v1794_v35 = vmul.f32 0.5, %v4121_v19  ;;  %4138 = vtanh.f32 %v779_v42  ;;  %v6043_v21 = vld [vmem:[%s5127_s30 + $0x458] sm:$0xff] }
  0xda   : > { %v4125_v25 = vpop.eup %4124  ;;  %3325 = vst [vmem:[%s5391_s17 + $0x398] sm:$0xff] %v2813_v27  ;;  %v2815_v18 = vmul.f32 %v2303_v51, %v5906_v37  ;;  %v2305_v57 = vadd.f32 0.5, %v1793_v62  ;;  %v1795_v55 = vmul.f32 0.5, %v4123_v9  ;;  %4140 = vtanh.f32 %v780_v1  ;;  %v6053_v62 = vld [vmem:[%s5127_s30 + $0x468] sm:$0xff] }
  0xdb   : > { %v4127_v22 = vpop.eup %4126  ;;  %3326 = vst [vmem:[%s5391_s17 + $0x3a0] sm:$0xff] %v2814_v20  ;;  %v2816_v60 = vmul.f32 %v2304_v10, %v5912_v61  ;;  %v2306_v31 = vadd.f32 0.5, %v1794_v35  ;;  %v1796_v56 = vmul.f32 0.5, %v4125_v25  ;;  %v781_v40 = vmul.f32 0.5, %v5994_v53  ;;  %v6059_v10 = vld [vmem:[%s5127_s30 + $0x470] sm:$0xff]  ;;  %v6062_v35 = vld [vmem:[%s5127_s30 + $0x478] sm:$0xff] }
  0xdc   : > { %v4129_v52 = vpop.eup %4128  ;;  %3327 = vst [vmem:[%s5391_s17 + $0x3a8] sm:$0xff] %v2815_v18  ;;  %v2817_v3 = vmul.f32 %v2305_v57, %v5915_v14  ;;  %v2307_v37 = vadd.f32 0.5, %v1795_v55  ;;  %v1797_v17 = vmul.f32 0.5, %v4127_v22  ;;  %v782_v44 = vmul.f32 0.5, %v5999_v0 }
  0xdd   : > { %v4131_v8 = vpop.eup %4130  ;;  %3328 = vst [vmem:[%s5391_s17 + $0x3b0] sm:$0xff] %v2816_v60  ;;  %v2818_v61 = vmul.f32 %v2306_v31, %v5920_v63  ;;  %v2308_v41 = vadd.f32 0.5, %v1796_v56  ;;  %v1798_v26 = vmul.f32 0.5, %v4129_v52  ;;  %4142 = vtanh.f32 %v781_v40  ;;  %v6074_v31 = vld [vmem:[%s5127_s30 + $0x488] sm:$0xff] }
  0xde   : > { %v4133_v58 = vpop.eup %4132  ;;  %3329 = vst [vmem:[%s5391_s17 + $0x3b8] sm:$0xff] %v2817_v3  ;;  %v2819_v14 = vmul.f32 %v2307_v37, %v5923_v24  ;;  %v2309_v12 = vadd.f32 0.5, %v1797_v17  ;;  %v1799_v11 = vmul.f32 0.5, %v4131_v8  ;;  %4144 = vtanh.f32 %v782_v44  ;;  %v6080_v3 = vld [vmem:[%s5127_s30 + $0x490] sm:$0xff]  ;;  %v6083_v37 = vld [vmem:[%s5127_s30 + $0x498] sm:$0xff] }
  0xdf   : > { %v4135_v28 = vpop.eup %4134  ;;  %3330 = vst [vmem:[%s5391_s17 + $0x3c0] sm:$0xff] %v2818_v61  ;;  %v2820_v63 = vmul.f32 %v2308_v41, %v5928_v23  ;;  %v2310_v15 = vadd.f32 0.5, %v1798_v26  ;;  %v1800_v38 = vmul.f32 0.5, %v4133_v58  ;;  %v783_v16 = vmul.f32 0.5, %v6010_v50  ;;  %v6032_v23 = vld [vmem:[%s5127_s30 + $0x448] sm:$0xff]  ;;  %v6088_v41 = vld [vmem:[%s5127_s30 + $0x4a0] sm:$0xff] }
  0xe0   : > { %v4137_v5 = vpop.eup %4136  ;;  %3331 = vst [vmem:[%s5391_s17 + $0x3c8] sm:$0xff] %v2819_v14  ;;  %v2821_v24 = vmul.f32 %v2309_v12, %v5934_v4  ;;  %v2311_v39 = vadd.f32 0.5, %v1799_v11  ;;  %v1801_v13 = vmul.f32 0.5, %v4135_v28  ;;  %v784_v48 = vmul.f32 0.5, %v6015_v32  ;;  %v6091_v26 = vld [vmem:[%s5127_s30 + $0x4a8] sm:$0xff]  ;;  %v6096_v11 = vld [vmem:[%s5127_s30 + $0x4b0] sm:$0xff] }
  0xe1   : > { %3332 = vst [vmem:[%s5391_s17 + $0x3d0] sm:$0xff] %v2820_v63  ;;  %v2822_v29 = vmul.f32 %v2310_v15, %v5940_v6  ;;  %v2312_v33 = vadd.f32 0.5, %v1800_v38  ;;  %v1802_v34 = vmul.f32 0.5, %v4137_v5  ;;  %4146 = vtanh.f32 %v783_v16  ;;  %v6102_v15 = vld [vmem:[%s5127_s30 + $0x4b8] sm:$0xff] }
  0xe2   : > { %3333 = vst [vmem:[%s5391_s17 + $0x3d8] sm:$0xff] %v2821_v24  ;;  %v2823_v4 = vmul.f32 %v2311_v39, %v5943_v59  ;;  %v2313_v46 = vadd.f32 0.5, %v1801_v13  ;;  %4148 = vtanh.f32 %v784_v48  ;;  %v785_v36 = vmul.f32 0.5, %v6023_v30  ;;  %v6050_v59 = vld [vmem:[%s5127_s30 + $0x460] sm:$0xff]  ;;  %v6111_v39 = vld [vmem:[%s5127_s30 + $0x4c8] sm:$0xff] }
  0xe3   : > { %v4139_v6 = vpop.eup %4138  ;;  %3334 = vst [vmem:[%s5391_s17 + $0x3e0] sm:$0xff] %v2822_v29  ;;  %v2824_v42 = vmul.f32 %v2312_v33, %v5948_v43  ;;  %v2314_v19 = vadd.f32 0.5, %v1802_v34  ;;  %v786_v27 = vmul.f32 0.5, %v6029_v49  ;;  %v787_v51 = vmul.f32 0.5, %v6032_v23  ;;  %v6108_v24 = vld [vmem:[%s5127_s30 + $0x4c0] sm:$0xff]  ;;  %v6116_v34 = vld [vmem:[%s5127_s30 + $0x4d0] sm:$0xff] }
  0xe4   : > { %v4141_v1 = vpop.eup %4140  ;;  %3335 = vst [vmem:[%s5391_s17 + $0x3e8] sm:$0xff] %v2823_v4  ;;  %v2825_v9 = vmul.f32 %v2313_v46, %v5953_v2  ;;  %v1803_v20 = vmul.f32 0.5, %v4139_v6  ;;  %4150 = vtanh.f32 %v785_v36  ;;  %v788_v43 = vmul.f32 0.5, %v6037_v54  ;;  %v6068_v2 = vld [vmem:[%s5127_s30 + $0x480] sm:$0xff]  ;;  %v6121_v6 = vld [vmem:[%s5127_s30 + $0x4d8] sm:$0xff] }
  0xe5   : > { %3336 = vst [vmem:[%s5391_s17 + $0x3f0] sm:$0xff] %v2824_v42  ;;  %v2826_v25 = vmul.f32 %v2314_v19, %v5961_v47  ;;  %v1804_v18 = vmul.f32 0.5, %v4141_v1  ;;  %4152 = vtanh.f32 %v786_v27  ;;  %v789_v57 = vmul.f32 0.5, %v6043_v21 }
  0xe6   : > { %3337 = vst [vmem:[%s5391_s17 + $0x3f8] sm:$0xff] %v2825_v9  ;;  %v2315_v55 = vadd.f32 0.5, %v1803_v20  ;;  %4154 = vtanh.f32 %v787_v51  ;;  %v790_v22 = vmul.f32 0.5, %v6050_v59  ;;  %v791_v60 = vmul.f32 0.5, %v6053_v62  ;;  %v6129_v20 = vld [vmem:[%s5127_s30 + $0x4e0] sm:$0xff] }
  0xe7   : > { %v4143_v47 = vpop.eup %4142  ;;  %3338 = vst [vmem:[%s5391_s17 + $0x400] sm:$0xff] %v2826_v25  ;;  %v2316_v56 = vadd.f32 0.5, %v1804_v18  ;;  %4156 = vtanh.f32 %v788_v43  ;;  %v792_v40 = vmul.f32 0.5, %v6059_v10  ;;  %v793_v52 = vmul.f32 0.5, %v6062_v35 }
  0xe8   : > { %v4145_v17 = vpop.eup %4144  ;;  %v2827_v44 = vmul.f32 %v2315_v55, %v5978_v45  ;;  %v1805_v8 = vmul.f32 0.5, %v4143_v47  ;;  %4158 = vtanh.f32 %v789_v57  ;;  %v794_v61 = vmul.f32 0.5, %v6068_v2 }
  0xe9   : > { %v2828_v58 = vmul.f32 %v2316_v56, %v5983_v7  ;;  %v1806_v14 = vmul.f32 0.5, %v4145_v17  ;;  %4160 = vtanh.f32 %v790_v22  ;;  %v795_v12 = vmul.f32 0.5, %v6074_v31 }
  0xea   : > { %3339 = vst [vmem:[%s5391_s17 + $0x408] sm:$0xff] %v2827_v44  ;;  %v2317_v45 = vadd.f32 0.5, %v1805_v8  ;;  %4162 = vtanh.f32 %v791_v60  ;;  %v796_v28 = vmul.f32 0.5, %v6080_v3  ;;  %v797_v63 = vmul.f32 0.5, %v6083_v37 }
  0xeb   : > { %v4147_v38 = vpop.eup %4146  ;;  %3340 = vst [vmem:[%s5391_s17 + $0x410] sm:$0xff] %v2828_v58  ;;  %v2318_v7 = vadd.f32 0.5, %v1806_v14  ;;  %4164 = vtanh.f32 %v792_v40  ;;  %v798_v16 = vmul.f32 0.5, %v6088_v41  ;;  %v799_v5 = vmul.f32 0.5, %v6091_v26 }
  0xec   : > { %v4149_v13 = vpop.eup %4148  ;;  %v2829_v48 = vmul.f32 %v2317_v45, %v5994_v53  ;;  %v1807_v29 = vmul.f32 0.5, %v4147_v38  ;;  %4166 = vtanh.f32 %v793_v52  ;;  %v800_v33 = vmul.f32 0.5, %v6096_v11 }
  0xed   : > { %v2830_v4 = vmul.f32 %v2318_v7, %v5999_v0  ;;  %v1808_v46 = vmul.f32 0.5, %v4149_v13  ;;  %4168 = vtanh.f32 %v794_v61  ;;  %v801_v36 = vmul.f32 0.5, %v6102_v15 }
  0xee   : > { %v4151_v42 = vpop.eup %4150  ;;  %3341 = vst [vmem:[%s5391_s17 + $0x418] sm:$0xff] %v2829_v48  ;;  %v2319_v19 = vadd.f32 0.5, %v1807_v29  ;;  %4170 = vtanh.f32 %v795_v12  ;;  %v802_v53 = vmul.f32 0.5, %v6108_v24  ;;  %v803_v27 = vmul.f32 0.5, %v6111_v39  ;;  %v6146_v29 = vld [vmem:[%s5127_s30 + $0x4e8] sm:$0xff] }
  0xef   : > { %v4153_v51 = vpop.eup %4152  ;;  %3342 = vst [vmem:[%s5391_s17 + $0x420] sm:$0xff] %v2830_v4  ;;  %v2320_v1 = vadd.f32 0.5, %v1808_v46  ;;  %v1809_v0 = vmul.f32 0.5, %v4151_v42  ;;  %4172 = vtanh.f32 %v796_v28  ;;  %v804_v9 = vmul.f32 0.5, %v6116_v34 }
  0xf0   : > { %v4155_v43 = vpop.eup %4154  ;;  %v2831_v25 = vmul.f32 %v2319_v19, %v6010_v50  ;;  %v1810_v18 = vmul.f32 0.5, %v4153_v51  ;;  %4174 = vtanh.f32 %v797_v63  ;;  %v805_v57 = vmul.f32 0.5, %v6121_v6 }
  0xf1   : > { %v4157_v55 = vpop.eup %4156  ;;  %v2832_v22 = vmul.f32 %v2320_v1, %v6015_v32  ;;  %v2321_v60 = vadd.f32 0.5, %v1809_v0  ;;  %v1811_v47 = vmul.f32 0.5, %v4155_v43  ;;  %4176 = vtanh.f32 %v798_v16 }
  0xf2   : > { %v4159_v56 = vpop.eup %4158  ;;  %3343 = vst [vmem:[%s5391_s17 + $0x428] sm:$0xff] %v2831_v25  ;;  %v2322_v40 = vadd.f32 0.5, %v1810_v18  ;;  %v1812_v52 = vmul.f32 0.5, %v4157_v55  ;;  %4178 = vtanh.f32 %v799_v5  ;;  %v806_v17 = vmul.f32 0.5, %v6129_v20 }
  0xf3   : > { %v4161_v50 = vpop.eup %4160  ;;  %3344 = vst [vmem:[%s5391_s17 + $0x430] sm:$0xff] %v2832_v22  ;;  %v2833_v44 = vmul.f32 %v2321_v60, %v6023_v30  ;;  %v2323_v8 = vadd.f32 0.5, %v1811_v47  ;;  %v1813_v61 = vmul.f32 0.5, %v4159_v56  ;;  %4180 = vtanh.f32 %v800_v33  ;;  %v6167_v47 = vld [vmem:[%s5127_s30 + $0x500] sm:$0xff] }
  0xf4   : > { %v4163_v32 = vpop.eup %4162  ;;  %v2834_v58 = vmul.f32 %v2322_v40, %v6029_v49  ;;  %v2324_v14 = vadd.f32 0.5, %v1812_v52  ;;  %v1814_v12 = vmul.f32 0.5, %v4161_v50  ;;  %4182 = vtanh.f32 %v801_v36  ;;  %v6151_v36 = vld [vmem:[%s5127_s30 + $0x4f0] sm:$0xff] }
  0xf5   : > { %v4165_v45 = vpop.eup %4164  ;;  %3345 = vst [vmem:[%s5391_s17 + $0x438] sm:$0xff] %v2833_v44  ;;  %v2835_v28 = vmul.f32 %v2323_v8, %v6032_v23  ;;  %v2325_v63 = vadd.f32 0.5, %v1813_v61  ;;  %v1815_v38 = vmul.f32 0.5, %v4163_v32  ;;  %4184 = vtanh.f32 %v802_v53 }
  0xf6   : > { %v4167_v30 = vpop.eup %4166  ;;  %3346 = vst [vmem:[%s5391_s17 + $0x440] sm:$0xff] %v2834_v58  ;;  %v2836_v7 = vmul.f32 %v2324_v14, %v6037_v54  ;;  %v2326_v16 = vadd.f32 0.5, %v1814_v12  ;;  %v1816_v49 = vmul.f32 0.5, %v4165_v45  ;;  %4186 = vtanh.f32 %v803_v27  ;;  %v6178_v12 = vld [vmem:[%s5127_s30 + $0x508] sm:$0xff] }
  0xf7   : > { %v4169_v5 = vpop.eup %4168  ;;  %3347 = vst [vmem:[%s5391_s17 + $0x448] sm:$0xff] %v2835_v28  ;;  %v2837_v13 = vmul.f32 %v2325_v63, %v6043_v21  ;;  %v2327_v48 = vadd.f32 0.5, %v1815_v38  ;;  %v1817_v23 = vmul.f32 0.5, %v4167_v30  ;;  %4188 = vtanh.f32 %v804_v9  ;;  %v6183_v38 = vld [vmem:[%s5127_s30 + $0x510] sm:$0xff] }
  0xf8   : > { %v4171_v33 = vpop.eup %4170  ;;  %3348 = vst [vmem:[%s5391_s17 + $0x450] sm:$0xff] %v2836_v7  ;;  %v2838_v4 = vmul.f32 %v2326_v16, %v6050_v59  ;;  %v2328_v54 = vadd.f32 0.5, %v1816_v49  ;;  %v1818_v46 = vmul.f32 0.5, %v4169_v5  ;;  %4190 = vtanh.f32 %v805_v57  ;;  %v6162_v57 = vld [vmem:[%s5127_s30 + $0x4f8] sm:$0xff] }
  0xf9   : > { %v4173_v42 = vpop.eup %4172  ;;  %3349 = vst [vmem:[%s5391_s17 + $0x458] sm:$0xff] %v2837_v13  ;;  %v2839_v21 = vmul.f32 %v2327_v48, %v6053_v62  ;;  %v2329_v19 = vadd.f32 0.5, %v1817_v23  ;;  %v1819_v53 = vmul.f32 0.5, %v4171_v33  ;;  %4192 = vtanh.f32 %v806_v17  ;;  %v6191_v23 = vld [vmem:[%s5127_s30 + $0x518] sm:$0xff] }
  0xfa   : > { %v4175_v27 = vpop.eup %4174  ;;  %3350 = vst [vmem:[%s5391_s17 + $0x460] sm:$0xff] %v2838_v4  ;;  %v2840_v51 = vmul.f32 %v2328_v54, %v6059_v10  ;;  %v2330_v59 = vadd.f32 0.5, %v1818_v46  ;;  %v1820_v1 = vmul.f32 0.5, %v4173_v42  ;;  %v807_v0 = vmul.f32 0.5, %v6146_v29  ;;  %v6197_v42 = vld [vmem:[%s5127_s30 + $0x520] sm:$0xff] }
  0xfb   : > { %v4177_v9 = vpop.eup %4176  ;;  %3351 = vst [vmem:[%s5391_s17 + $0x468] sm:$0xff] %v2839_v21  ;;  %v2841_v43 = vmul.f32 %v2329_v19, %v6062_v35  ;;  %v2331_v62 = vadd.f32 0.5, %v1819_v53  ;;  %v1821_v25 = vmul.f32 0.5, %v4175_v27  ;;  %v808_v18 = vmul.f32 0.5, %v6151_v36  ;;  %v6205_v27 = vld [vmem:[%s5127_s30 + $0x530] sm:$0xff] }
  0xfc   : > { %v4179_v55 = vpop.eup %4178  ;;  %3352 = vst [vmem:[%s5391_s17 + $0x470] sm:$0xff] %v2840_v51  ;;  %v2842_v10 = vmul.f32 %v2330_v59, %v6068_v2  ;;  %v2332_v22 = vadd.f32 0.5, %v1820_v1  ;;  %v1822_v60 = vmul.f32 0.5, %v4177_v9  ;;  %4194 = vtanh.f32 %v807_v0  ;;  %v6211_v1 = vld [vmem:[%s5127_s30 + $0x538] sm:$0xff] }
  0xfd   : > { %v4181_v56 = vpop.eup %4180  ;;  %3353 = vst [vmem:[%s5391_s17 + $0x478] sm:$0xff] %v2841_v43  ;;  %v2843_v35 = vmul.f32 %v2331_v62, %v6074_v31  ;;  %v2333_v40 = vadd.f32 0.5, %v1821_v25  ;;  %v1823_v52 = vmul.f32 0.5, %v4179_v55  ;;  %4196 = vtanh.f32 %v808_v18  ;;  %v6221_v25 = vld [vmem:[%s5127_s30 + $0x548] sm:$0xff] }
  0xfe   : > { %v4183_v17 = vpop.eup %4182  ;;  %3354 = vst [vmem:[%s5391_s17 + $0x480] sm:$0xff] %v2842_v10  ;;  %v2844_v50 = vmul.f32 %v2332_v22, %v6080_v3  ;;  %v2334_v2 = vadd.f32 0.5, %v1822_v60  ;;  %v1824_v44 = vmul.f32 0.5, %v4181_v56  ;;  %v809_v8 = vmul.f32 0.5, %v6162_v57  ;;  %v6227_v22 = vld [vmem:[%s5127_s30 + $0x550] sm:$0xff]  ;;  %v6230_v60 = vld [vmem:[%s5127_s30 + $0x558] sm:$0xff] }
  0xff   : > { %v4185_v61 = vpop.eup %4184  ;;  %3355 = vst [vmem:[%s5391_s17 + $0x488] sm:$0xff] %v2843_v35  ;;  %v2845_v32 = vmul.f32 %v2333_v40, %v6083_v37  ;;  %v2335_v31 = vadd.f32 0.5, %v1823_v52  ;;  %v1825_v58 = vmul.f32 0.5, %v4183_v17  ;;  %v810_v14 = vmul.f32 0.5, %v6167_v47 }
 0x100   : > { %v4187_v45 = vpop.eup %4186  ;;  %3356 = vst [vmem:[%s5391_s17 + $0x490] sm:$0xff] %v2844_v50  ;;  %v2846_v3 = vmul.f32 %v2334_v2, %v6088_v41  ;;  %v2336_v28 = vadd.f32 0.5, %v1824_v44  ;;  %v1826_v63 = vmul.f32 0.5, %v4185_v61  ;;  %4198 = vtanh.f32 %v809_v8  ;;  %v6242_v2 = vld [vmem:[%s5127_s30 + $0x568] sm:$0xff] }
 0x101   : > { %v4189_v30 = vpop.eup %4188  ;;  %3357 = vst [vmem:[%s5391_s17 + $0x498] sm:$0xff] %v2845_v32  ;;  %v2847_v37 = vmul.f32 %v2335_v31, %v6091_v26  ;;  %v2337_v7 = vadd.f32 0.5, %v1825_v58  ;;  %v1827_v16 = vmul.f32 0.5, %v4187_v45  ;;  %4200 = vtanh.f32 %v810_v14  ;;  %v6248_v32 = vld [vmem:[%s5127_s30 + $0x570] sm:$0xff]  ;;  %v6251_v31 = vld [vmem:[%s5127_s30 + $0x578] sm:$0xff] }
 0x102   : > { %v4191_v49 = vpop.eup %4190  ;;  %3358 = vst [vmem:[%s5391_s17 + $0x4a0] sm:$0xff] %v2846_v3  ;;  %v2848_v41 = vmul.f32 %v2336_v28, %v6096_v11  ;;  %v2338_v5 = vadd.f32 0.5, %v1826_v63  ;;  %v1828_v13 = vmul.f32 0.5, %v4189_v30  ;;  %v811_v48 = vmul.f32 0.5, %v6178_v12  ;;  %v6200_v11 = vld [vmem:[%s5127_s30 + $0x528] sm:$0xff]  ;;  %v6256_v28 = vld [vmem:[%s5127_s30 + $0x580] sm:$0xff] }
 0x103   : > { %v4193_v33 = vpop.eup %4192  ;;  %3359 = vst [vmem:[%s5391_s17 + $0x4a8] sm:$0xff] %v2847_v37  ;;  %v2849_v26 = vmul.f32 %v2337_v7, %v6102_v15  ;;  %v2339_v4 = vadd.f32 0.5, %v1827_v16  ;;  %v1829_v54 = vmul.f32 0.5, %v4191_v49  ;;  %v812_v46 = vmul.f32 0.5, %v6183_v38  ;;  %v6259_v63 = vld [vmem:[%s5127_s30 + $0x588] sm:$0xff]  ;;  %v6264_v16 = vld [vmem:[%s5127_s30 + $0x590] sm:$0xff] }
 0x104   : > { %3360 = vst [vmem:[%s5391_s17 + $0x4b0] sm:$0xff] %v2848_v41  ;;  %v2850_v21 = vmul.f32 %v2338_v5, %v6108_v24  ;;  %v2340_v19 = vadd.f32 0.5, %v1828_v13  ;;  %v1830_v53 = vmul.f32 0.5, %v4193_v33  ;;  %4202 = vtanh.f32 %v811_v48  ;;  %v6270_v5 = vld [vmem:[%s5127_s30 + $0x598] sm:$0xff] }
 0x105   : > { %3361 = vst [vmem:[%s5391_s17 + $0x4b8] sm:$0xff] %v2849_v26  ;;  %v2851_v15 = vmul.f32 %v2339_v4, %v6111_v39  ;;  %v2341_v51 = vadd.f32 0.5, %v1829_v54  ;;  %4204 = vtanh.f32 %v812_v46  ;;  %v813_v59 = vmul.f32 0.5, %v6191_v23  ;;  %v6218_v39 = vld [vmem:[%s5127_s30 + $0x540] sm:$0xff]  ;;  %v6279_v4 = vld [vmem:[%s5127_s30 + $0x5a8] sm:$0xff] }
 0x106   : > { %v4195_v24 = vpop.eup %4194  ;;  %3362 = vst [vmem:[%s5391_s17 + $0x4c0] sm:$0xff] %v2850_v21  ;;  %v2852_v0 = vmul.f32 %v2340_v19, %v6116_v34  ;;  %v2342_v9 = vadd.f32 0.5, %v1830_v53  ;;  %v814_v43 = vmul.f32 0.5, %v6197_v42  ;;  %v815_v62 = vmul.f32 0.5, %v6200_v11  ;;  %v6276_v26 = vld [vmem:[%s5127_s30 + $0x5a0] sm:$0xff]  ;;  %v6284_v53 = vld [vmem:[%s5127_s30 + $0x5b0] sm:$0xff] }
 0x107   : > { %v4197_v18 = vpop.eup %4196  ;;  %3363 = vst [vmem:[%s5391_s17 + $0x4c8] sm:$0xff] %v2851_v15  ;;  %v2853_v55 = vmul.f32 %v2341_v51, %v6121_v6  ;;  %v1831_v10 = vmul.f32 0.5, %v4195_v24  ;;  %4206 = vtanh.f32 %v813_v59  ;;  %v816_v34 = vmul.f32 0.5, %v6205_v27  ;;  %v6236_v6 = vld [vmem:[%s5127_s30 + $0x560] sm:$0xff]  ;;  %v6289_v24 = vld [vmem:[%s5127_s30 + $0x5b8] sm:$0xff] }
 0x108   : > { %3364 = vst [vmem:[%s5391_s17 + $0x4d0] sm:$0xff] %v2852_v0  ;;  %v2854_v56 = vmul.f32 %v2342_v9, %v6129_v20  ;;  %v1832_v35 = vmul.f32 0.5, %v4197_v18  ;;  %4208 = vtanh.f32 %v814_v43  ;;  %v817_v40 = vmul.f32 0.5, %v6211_v1 }
 0x109   : > { %3365 = vst [vmem:[%s5391_s17 + $0x4d8] sm:$0xff] %v2853_v55  ;;  %v2343_v52 = vadd.f32 0.5, %v1831_v10  ;;  %4210 = vtanh.f32 %v815_v62  ;;  %v818_v17 = vmul.f32 0.5, %v6218_v39  ;;  %v819_v50 = vmul.f32 0.5, %v6221_v25  ;;  %v6297_v10 = vld [vmem:[%s5127_s30 + $0x5c0] sm:$0xff] }
 0x10a   : > { %v4199_v20 = vpop.eup %4198  ;;  %3366 = vst [vmem:[%s5391_s17 + $0x4e0] sm:$0xff] %v2854_v56  ;;  %v2344_v44 = vadd.f32 0.5, %v1832_v35  ;;  %4212 = vtanh.f32 %v816_v34  ;;  %v820_v8 = vmul.f32 0.5, %v6227_v22  ;;  %v821_v61 = vmul.f32 0.5, %v6230_v60 }
 0x10b   : > { %v4201_v58 = vpop.eup %4200  ;;  %v2855_v14 = vmul.f32 %v2343_v52, %v6146_v29  ;;  %v1833_v45 = vmul.f32 0.5, %v4199_v20  ;;  %4214 = vtanh.f32 %v817_v40  ;;  %v822_v3 = vmul.f32 0.5, %v6236_v6 }
 0x10c   : > { %v2856_v30 = vmul.f32 %v2344_v44, %v6151_v36  ;;  %v1834_v37 = vmul.f32 0.5, %v4201_v58  ;;  %4216 = vtanh.f32 %v818_v17  ;;  %v823_v7 = vmul.f32 0.5, %v6242_v2 }
 0x10d   : > { %3367 = vst [vmem:[%s5391_s17 + $0x4e8] sm:$0xff] %v2855_v14  ;;  %v2345_v29 = vadd.f32 0.5, %v1833_v45  ;;  %4218 = vtanh.f32 %v819_v50  ;;  %v824_v49 = vmul.f32 0.5, %v6248_v32  ;;  %v825_v41 = vmul.f32 0.5, %v6251_v31 }
 0x10e   : > { %v4203_v13 = vpop.eup %4202  ;;  %3368 = vst [vmem:[%s5391_s17 + $0x4f0] sm:$0xff] %v2856_v30  ;;  %v2346_v36 = vadd.f32 0.5, %v1834_v37  ;;  %4220 = vtanh.f32 %v820_v8  ;;  %v826_v48 = vmul.f32 0.5, %v6256_v28  ;;  %v827_v33 = vmul.f32 0.5, %v6259_v63 }
 0x10f   : > { %v4205_v54 = vpop.eup %4204  ;;  %v2857_v46 = vmul.f32 %v2345_v29, %v6162_v57  ;;  %v1835_v21 = vmul.f32 0.5, %v4203_v13  ;;  %4222 = vtanh.f32 %v821_v61  ;;  %v828_v19 = vmul.f32 0.5, %v6264_v16 }
 0x110   : > { %v2858_v15 = vmul.f32 %v2346_v36, %v6167_v47  ;;  %v1836_v51 = vmul.f32 0.5, %v4205_v54  ;;  %4224 = vtanh.f32 %v822_v3  ;;  %v829_v59 = vmul.f32 0.5, %v6270_v5 }
 0x111   : > { %v4207_v0 = vpop.eup %4206  ;;  %3369 = vst [vmem:[%s5391_s17 + $0x4f8] sm:$0xff] %v2857_v46  ;;  %v2347_v9 = vadd.f32 0.5, %v1835_v21  ;;  %4226 = vtanh.f32 %v823_v7  ;;  %v830_v57 = vmul.f32 0.5, %v6276_v26  ;;  %v831_v43 = vmul.f32 0.5, %v6279_v4  ;;  %v6314_v21 = vld [vmem:[%s5127_s30 + $0x5c8] sm:$0xff] }
 0x112   : > { %v4209_v62 = vpop.eup %4208  ;;  %3370 = vst [vmem:[%s5391_s17 + $0x500] sm:$0xff] %v2858_v15  ;;  %v2348_v18 = vadd.f32 0.5, %v1836_v51  ;;  %v1837_v47 = vmul.f32 0.5, %v4207_v0  ;;  %4228 = vtanh.f32 %v824_v49  ;;  %v832_v55 = vmul.f32 0.5, %v6284_v53 }
 0x113   : > { %v4211_v34 = vpop.eup %4210  ;;  %v2859_v56 = vmul.f32 %v2347_v9, %v6178_v12  ;;  %v1838_v35 = vmul.f32 0.5, %v4209_v62  ;;  %4230 = vtanh.f32 %v825_v41  ;;  %v833_v40 = vmul.f32 0.5, %v6289_v24 }
 0x114   : > { %v4213_v52 = vpop.eup %4212  ;;  %v2860_v17 = vmul.f32 %v2348_v18, %v6183_v38  ;;  %v2349_v50 = vadd.f32 0.5, %v1837_v47  ;;  %v1839_v20 = vmul.f32 0.5, %v4211_v34  ;;  %4232 = vtanh.f32 %v826_v48 }
 0x115   : > { %v4215_v44 = vpop.eup %4214  ;;  %3371 = vst [vmem:[%s5391_s17 + $0x508] sm:$0xff] %v2859_v56  ;;  %v2350_v8 = vadd.f32 0.5, %v1838_v35  ;;  %v1840_v61 = vmul.f32 0.5, %v4213_v52  ;;  %4234 = vtanh.f32 %v827_v33  ;;  %v834_v58 = vmul.f32 0.5, %v6297_v10 }
 0x116   : > { %v4217_v12 = vpop.eup %4216  ;;  %3372 = vst [vmem:[%s5391_s17 + $0x510] sm:$0xff] %v2860_v17  ;;  %v2861_v14 = vmul.f32 %v2349_v50, %v6191_v23  ;;  %v2351_v45 = vadd.f32 0.5, %v1839_v20  ;;  %v1841_v3 = vmul.f32 0.5, %v4215_v44  ;;  %4236 = vtanh.f32 %v828_v19  ;;  %v6335_v20 = vld [vmem:[%s5127_s30 + $0x5e0] sm:$0xff] }
 0x117   : > { %v4219_v38 = vpop.eup %4218  ;;  %v2862_v30 = vmul.f32 %v2350_v8, %v6197_v42  ;;  %v2352_v37 = vadd.f32 0.5, %v1840_v61  ;;  %v1842_v7 = vmul.f32 0.5, %v4217_v12  ;;  %4238 = vtanh.f32 %v829_v59  ;;  %v6319_v59 = vld [vmem:[%s5127_s30 + $0x5d0] sm:$0xff] }
 0x118   : > { %v4221_v29 = vpop.eup %4220  ;;  %3373 = vst [vmem:[%s5391_s17 + $0x518] sm:$0xff] %v2861_v14  ;;  %v2863_v49 = vmul.f32 %v2351_v45, %v6200_v11  ;;  %v2353_v41 = vadd.f32 0.5, %v1841_v3  ;;  %v1843_v13 = vmul.f32 0.5, %v4219_v38  ;;  %4240 = vtanh.f32 %v830_v57 }
 0x119   : > { %v4223_v23 = vpop.eup %4222  ;;  %3374 = vst [vmem:[%s5391_s17 + $0x520] sm:$0xff] %v2862_v30  ;;  %v2864_v36 = vmul.f32 %v2352_v37, %v6205_v27  ;;  %v2354_v48 = vadd.f32 0.5, %v1842_v7  ;;  %v1844_v42 = vmul.f32 0.5, %v4221_v29  ;;  %4242 = vtanh.f32 %v831_v43  ;;  %v6346_v7 = vld [vmem:[%s5127_s30 + $0x5e8] sm:$0xff] }
 0x11a   : > { %v4225_v33 = vpop.eup %4224  ;;  %3375 = vst [vmem:[%s5391_s17 + $0x528] sm:$0xff] %v2863_v49  ;;  %v2865_v54 = vmul.f32 %v2353_v41, %v6211_v1  ;;  %v2355_v46 = vadd.f32 0.5, %v1843_v13  ;;  %v1845_v11 = vmul.f32 0.5, %v4223_v23  ;;  %4244 = vtanh.f32 %v832_v55  ;;  %v6351_v13 = vld [vmem:[%s5127_s30 + $0x5f0] sm:$0xff] }
 0x11b   : > { %v4227_v19 = vpop.eup %4226  ;;  %3376 = vst [vmem:[%s5391_s17 + $0x530] sm:$0xff] %v2864_v36  ;;  %v2866_v15 = vmul.f32 %v2354_v48, %v6218_v39  ;;  %v2356_v27 = vadd.f32 0.5, %v1844_v42  ;;  %v1846_v51 = vmul.f32 0.5, %v4225_v33  ;;  %4246 = vtanh.f32 %v833_v40  ;;  %v6330_v40 = vld [vmem:[%s5127_s30 + $0x5d8] sm:$0xff] }
 0x11c   : > { %v4229_v0 = vpop.eup %4228  ;;  %3377 = vst [vmem:[%s5391_s17 + $0x538] sm:$0xff] %v2865_v54  ;;  %v2867_v1 = vmul.f32 %v2355_v46, %v6221_v25  ;;  %v2357_v9 = vadd.f32 0.5, %v1845_v11  ;;  %v1847_v57 = vmul.f32 0.5, %v4227_v19  ;;  %4248 = vtanh.f32 %v834_v58  ;;  %v6359_v11 = vld [vmem:[%s5127_s30 + $0x5f8] sm:$0xff] }
 0x11d   : > { %v4231_v43 = vpop.eup %4230  ;;  %3378 = vst [vmem:[%s5391_s17 + $0x540] sm:$0xff] %v2866_v15  ;;  %v2868_v62 = vmul.f32 %v2356_v27, %v6227_v22  ;;  %v2358_v39 = vadd.f32 0.5, %v1846_v51  ;;  %v1848_v18 = vmul.f32 0.5, %v4229_v0  ;;  %v835_v47 = vmul.f32 0.5, %v6314_v21  ;;  %v6365_v0 = vld [vmem:[%s5127_s30 + $0x600] sm:$0xff] }
 0x11e   : > { %v4233_v55 = vpop.eup %4232  ;;  %3379 = vst [vmem:[%s5391_s17 + $0x548] sm:$0xff] %v2867_v1  ;;  %v2869_v34 = vmul.f32 %v2357_v9, %v6230_v60  ;;  %v2359_v25 = vadd.f32 0.5, %v1847_v57  ;;  %v1849_v56 = vmul.f32 0.5, %v4231_v43  ;;  %v836_v35 = vmul.f32 0.5, %v6319_v59  ;;  %v6373_v43 = vld [vmem:[%s5127_s30 + $0x610] sm:$0xff] }
 0x11f   : > { %v4235_v52 = vpop.eup %4234  ;;  %3380 = vst [vmem:[%s5391_s17 + $0x550] sm:$0xff] %v2868_v62  ;;  %v2870_v22 = vmul.f32 %v2358_v39, %v6236_v6  ;;  %v2360_v17 = vadd.f32 0.5, %v1848_v18  ;;  %v1850_v50 = vmul.f32 0.5, %v4233_v55  ;;  %4250 = vtanh.f32 %v835_v47  ;;  %v6379_v18 = vld [vmem:[%s5127_s30 + $0x618] sm:$0xff] }
 0x120   : > { %v4237_v44 = vpop.eup %4236  ;;  %3381 = vst [vmem:[%s5391_s17 + $0x558] sm:$0xff] %v2869_v34  ;;  %v2871_v60 = vmul.f32 %v2359_v25, %v6242_v2  ;;  %v2361_v8 = vadd.f32 0.5, %v1849_v56  ;;  %v1851_v61 = vmul.f32 0.5, %v4235_v52  ;;  %4252 = vtanh.f32 %v836_v35  ;;  %v6389_v56 = vld [vmem:[%s5127_s30 + $0x628] sm:$0xff] }
 0x121   : > { %v4239_v58 = vpop.eup %4238  ;;  %3382 = vst [vmem:[%s5391_s17 + $0x560] sm:$0xff] %v2870_v22  ;;  %v2872_v12 = vmul.f32 %v2360_v17, %v6248_v32  ;;  %v2362_v6 = vadd.f32 0.5, %v1850_v50  ;;  %v1852_v14 = vmul.f32 0.5, %v4237_v44  ;;  %v837_v45 = vmul.f32 0.5, %v6330_v40  ;;  %v6395_v17 = vld [vmem:[%s5127_s30 + $0x630] sm:$0xff]  ;;  %v6398_v50 = vld [vmem:[%s5127_s30 + $0x638] sm:$0xff] }
 0x122   : > { %v4241_v3 = vpop.eup %4240  ;;  %3383 = vst [vmem:[%s5391_s17 + $0x568] sm:$0xff] %v2871_v60  ;;  %v2873_v38 = vmul.f32 %v2361_v8, %v6251_v31  ;;  %v2363_v2 = vadd.f32 0.5, %v1851_v61  ;;  %v1853_v30 = vmul.f32 0.5, %v4239_v58  ;;  %v838_v37 = vmul.f32 0.5, %v6335_v20 }
 0x123   : > { %v4243_v29 = vpop.eup %4242  ;;  %3384 = vst [vmem:[%s5391_s17 + $0x570] sm:$0xff] %v2872_v12  ;;  %v2874_v32 = vmul.f32 %v2362_v6, %v6256_v28  ;;  %v2364_v49 = vadd.f32 0.5, %v1852_v14  ;;  %v1854_v41 = vmul.f32 0.5, %v4241_v3  ;;  %4254 = vtanh.f32 %v837_v45  ;;  %v6410_v6 = vld [vmem:[%s5127_s30 + $0x648] sm:$0xff] }
 0x124   : > { %v4245_v23 = vpop.eup %4244  ;;  %3385 = vst [vmem:[%s5391_s17 + $0x578] sm:$0xff] %v2873_v38  ;;  %v2875_v31 = vmul.f32 %v2363_v2, %v6259_v63  ;;  %v2365_v36 = vadd.f32 0.5, %v1853_v30  ;;  %v1855_v48 = vmul.f32 0.5, %v4243_v29  ;;  %4256 = vtanh.f32 %v838_v37  ;;  %v6416_v38 = vld [vmem:[%s5127_s30 + $0x650] sm:$0xff]  ;;  %v6419_v2 = vld [vmem:[%s5127_s30 + $0x658] sm:$0xff] }
 0x125   : > { %v4247_v42 = vpop.eup %4246  ;;  %3386 = vst [vmem:[%s5391_s17 + $0x580] sm:$0xff] %v2874_v32  ;;  %v2876_v28 = vmul.f32 %v2364_v49, %v6264_v16  ;;  %v2366_v33 = vadd.f32 0.5, %v1854_v41  ;;  %v1856_v54 = vmul.f32 0.5, %v4245_v23  ;;  %v839_v46 = vmul.f32 0.5, %v6346_v7  ;;  %v6368_v16 = vld [vmem:[%s5127_s30 + $0x608] sm:$0xff]  ;;  %v6424_v49 = vld [vmem:[%s5127_s30 + $0x660] sm:$0xff] }
 0x126   : > { %v4249_v19 = vpop.eup %4248  ;;  %3387 = vst [vmem:[%s5391_s17 + $0x588] sm:$0xff] %v2875_v31  ;;  %v2877_v63 = vmul.f32 %v2365_v36, %v6270_v5  ;;  %v2367_v15 = vadd.f32 0.5, %v1855_v48  ;;  %v1857_v27 = vmul.f32 0.5, %v4247_v42  ;;  %v840_v51 = vmul.f32 0.5, %v6351_v13  ;;  %v6427_v41 = vld [vmem:[%s5127_s30 + $0x668] sm:$0xff]  ;;  %v6432_v48 = vld [vmem:[%s5127_s30 + $0x670] sm:$0xff] }
 0x127   : > { %3388 = vst [vmem:[%s5391_s17 + $0x590] sm:$0xff] %v2876_v28  ;;  %v2878_v1 = vmul.f32 %v2366_v33, %v6276_v26  ;;  %v2368_v9 = vadd.f32 0.5, %v1856_v54  ;;  %v1858_v57 = vmul.f32 0.5, %v4249_v19  ;;  %4258 = vtanh.f32 %v839_v46  ;;  %v6438_v33 = vld [vmem:[%s5127_s30 + $0x678] sm:$0xff] }
 0x128   : > { %3389 = vst [vmem:[%s5391_s17 + $0x598] sm:$0xff] %v2877_v63  ;;  %v2879_v5 = vmul.f32 %v2367_v15, %v6279_v4  ;;  %v2369_v62 = vadd.f32 0.5, %v1857_v27  ;;  %4260 = vtanh.f32 %v840_v51  ;;  %v841_v39 = vmul.f32 0.5, %v6359_v11  ;;  %v6386_v4 = vld [vmem:[%s5127_s30 + $0x620] sm:$0xff]  ;;  %v6447_v15 = vld [vmem:[%s5127_s30 + $0x688] sm:$0xff] }
 0x129   : > { %v4251_v26 = vpop.eup %4250  ;;  %3390 = vst [vmem:[%s5391_s17 + $0x5a0] sm:$0xff] %v2878_v1  ;;  %v2880_v47 = vmul.f32 %v2368_v9, %v6284_v53  ;;  %v2370_v55 = vadd.f32 0.5, %v1858_v57  ;;  %v842_v34 = vmul.f32 0.5, %v6365_v0  ;;  %v843_v25 = vmul.f32 0.5, %v6368_v16  ;;  %v6444_v63 = vld [vmem:[%s5127_s30 + $0x680] sm:$0xff]  ;;  %v6452_v57 = vld [vmem:[%s5127_s30 + $0x690] sm:$0xff] }
 0x12a   : > { %v4253_v35 = vpop.eup %4252  ;;  %3391 = vst [vmem:[%s5391_s17 + $0x5a8] sm:$0xff] %v2879_v5  ;;  %v2881_v52 = vmul.f32 %v2369_v62, %v6289_v24  ;;  %v1859_v22 = vmul.f32 0.5, %v4251_v26  ;;  %4262 = vtanh.f32 %v841_v39  ;;  %v844_v53 = vmul.f32 0.5, %v6373_v43  ;;  %v6404_v24 = vld [vmem:[%s5127_s30 + $0x640] sm:$0xff]  ;;  %v6457_v26 = vld [vmem:[%s5127_s30 + $0x698] sm:$0xff] }
 0x12b   : > { %3392 = vst [vmem:[%s5391_s17 + $0x5b0] sm:$0xff] %v2880_v47  ;;  %v2882_v44 = vmul.f32 %v2370_v55, %v6297_v10  ;;  %v1860_v60 = vmul.f32 0.5, %v4253_v35  ;;  %4264 = vtanh.f32 %v842_v34  ;;  %v845_v8 = vmul.f32 0.5, %v6379_v18 }
 0x12c   : > { %3393 = vst [vmem:[%s5391_s17 + $0x5b8] sm:$0xff] %v2881_v52  ;;  %v2371_v61 = vadd.f32 0.5, %v1859_v22  ;;  %4266 = vtanh.f32 %v843_v25  ;;  %v846_v58 = vmul.f32 0.5, %v6386_v4  ;;  %v847_v12 = vmul.f32 0.5, %v6389_v56  ;;  %v6465_v22 = vld [vmem:[%s5127_s30 + $0x6a0] sm:$0xff] }
 0x12d   : > { %v4255_v10 = vpop.eup %4254  ;;  %3394 = vst [vmem:[%s5391_s17 + $0x5c0] sm:$0xff] %v2882_v44  ;;  %v2372_v14 = vadd.f32 0.5, %v1860_v60  ;;  %4268 = vtanh.f32 %v844_v53  ;;  %v848_v45 = vmul.f32 0.5, %v6395_v17  ;;  %v849_v3 = vmul.f32 0.5, %v6398_v50 }
 0x12e   : > { %v4257_v30 = vpop.eup %4256  ;;  %v2883_v37 = vmul.f32 %v2371_v61, %v6314_v21  ;;  %v1861_v29 = vmul.f32 0.5, %v4255_v10  ;;  %4270 = vtanh.f32 %v845_v8  ;;  %v850_v32 = vmul.f32 0.5, %v6404_v24 }
 0x12f   : > { %v2884_v23 = vmul.f32 %v2372_v14, %v6319_v59  ;;  %v1862_v31 = vmul.f32 0.5, %v4257_v30  ;;  %4272 = vtanh.f32 %v846_v58  ;;  %v851_v36 = vmul.f32 0.5, %v6410_v6 }
 0x130   : > { %3395 = vst [vmem:[%s5391_s17 + $0x5c8] sm:$0xff] %v2883_v37  ;;  %v2373_v21 = vadd.f32 0.5, %v1861_v29  ;;  %4274 = vtanh.f32 %v847_v12  ;;  %v852_v42 = vmul.f32 0.5, %v6416_v38  ;;  %v853_v28 = vmul.f32 0.5, %v6419_v2 }
 0x131   : > { %v4259_v54 = vpop.eup %4258  ;;  %3396 = vst [vmem:[%s5391_s17 + $0x5d0] sm:$0xff] %v2884_v23  ;;  %v2374_v59 = vadd.f32 0.5, %v1862_v31  ;;  %4276 = vtanh.f32 %v848_v45  ;;  %v854_v46 = vmul.f32 0.5, %v6424_v49  ;;  %v855_v19 = vmul.f32 0.5, %v6427_v41 }
 0x132   : > { %v4261_v27 = vpop.eup %4260  ;;  %v2885_v51 = vmul.f32 %v2373_v21, %v6330_v40  ;;  %v1863_v1 = vmul.f32 0.5, %v4259_v54  ;;  %4278 = vtanh.f32 %v849_v3  ;;  %v856_v9 = vmul.f32 0.5, %v6432_v48 }
 0x133   : > { %v2886_v5 = vmul.f32 %v2374_v59, %v6335_v20  ;;  %v1864_v62 = vmul.f32 0.5, %v4261_v27  ;;  %4280 = vtanh.f32 %v850_v32  ;;  %v857_v39 = vmul.f32 0.5, %v6438_v33 }
 0x134   : > { %v4263_v47 = vpop.eup %4262  ;;  %3397 = vst [vmem:[%s5391_s17 + $0x5d8] sm:$0xff] %v2885_v51  ;;  %v2375_v55 = vadd.f32 0.5, %v1863_v1  ;;  %4282 = vtanh.f32 %v851_v36  ;;  %v858_v40 = vmul.f32 0.5, %v6444_v63  ;;  %v859_v34 = vmul.f32 0.5, %v6447_v15  ;;  %v6482_v1 = vld [vmem:[%s5127_s30 + $0x6a8] sm:$0xff] }
 0x135   : > { %v4265_v25 = vpop.eup %4264  ;;  %3398 = vst [vmem:[%s5391_s17 + $0x5e0] sm:$0xff] %v2886_v5  ;;  %v2376_v35 = vadd.f32 0.5, %v1864_v62  ;;  %v1865_v20 = vmul.f32 0.5, %v4263_v47  ;;  %4284 = vtanh.f32 %v852_v42  ;;  %v860_v52 = vmul.f32 0.5, %v6452_v57 }
 0x136   : > { %v4267_v53 = vpop.eup %4266  ;;  %v2887_v44 = vmul.f32 %v2375_v55, %v6346_v7  ;;  %v1866_v60 = vmul.f32 0.5, %v4265_v25  ;;  %4286 = vtanh.f32 %v853_v28  ;;  %v861_v8 = vmul.f32 0.5, %v6457_v26 }
 0x137   : > { %v4269_v61 = vpop.eup %4268  ;;  %v2888_v58 = vmul.f32 %v2376_v35, %v6351_v13  ;;  %v2377_v12 = vadd.f32 0.5, %v1865_v20  ;;  %v1867_v10 = vmul.f32 0.5, %v4267_v53  ;;  %4288 = vtanh.f32 %v854_v46 }
 0x138   : > { %v4271_v14 = vpop.eup %4270  ;;  %3399 = vst [vmem:[%s5391_s17 + $0x5e8] sm:$0xff] %v2887_v44  ;;  %v2378_v45 = vadd.f32 0.5, %v1866_v60  ;;  %v1868_v3 = vmul.f32 0.5, %v4269_v61  ;;  %4290 = vtanh.f32 %v855_v19  ;;  %v862_v30 = vmul.f32 0.5, %v6465_v22 }
 0x139   : > { %v4273_v7 = vpop.eup %4272  ;;  %3400 = vst [vmem:[%s5391_s17 + $0x5f0] sm:$0xff] %v2888_v58  ;;  %v2889_v37 = vmul.f32 %v2377_v12, %v6359_v11  ;;  %v2379_v29 = vadd.f32 0.5, %v1867_v10  ;;  %v1869_v32 = vmul.f32 0.5, %v4271_v14  ;;  %4292 = vtanh.f32 %v856_v9  ;;  %v6503_v10 = vld [vmem:[%s5127_s30 + $0x6c0] sm:$0xff] }
 0x13a   : > { %v4275_v13 = vpop.eup %4274  ;;  %v2890_v23 = vmul.f32 %v2378_v45, %v6365_v0  ;;  %v2380_v31 = vadd.f32 0.5, %v1868_v3  ;;  %v1870_v36 = vmul.f32 0.5, %v4273_v7  ;;  %4294 = vtanh.f32 %v857_v39  ;;  %v6487_v39 = vld [vmem:[%s5127_s30 + $0x6b0] sm:$0xff] }
 0x13b   : > { %v4277_v21 = vpop.eup %4276  ;;  %3401 = vst [vmem:[%s5391_s17 + $0x5f8] sm:$0xff] %v2889_v37  ;;  %v2891_v42 = vmul.f32 %v2379_v29, %v6368_v16  ;;  %v2381_v28 = vadd.f32 0.5, %v1869_v32  ;;  %v1871_v54 = vmul.f32 0.5, %v4275_v13  ;;  %4296 = vtanh.f32 %v858_v40 }
 0x13c   : > { %v4279_v11 = vpop.eup %4278  ;;  %3402 = vst [vmem:[%s5391_s17 + $0x600] sm:$0xff] %v2890_v23  ;;  %v2892_v59 = vmul.f32 %v2380_v31, %v6373_v43  ;;  %v2382_v46 = vadd.f32 0.5, %v1870_v36  ;;  %v1872_v0 = vmul.f32 0.5, %v4277_v21  ;;  %4298 = vtanh.f32 %v859_v34  ;;  %v6514_v36 = vld [vmem:[%s5127_s30 + $0x6c8] sm:$0xff] }
 0x13d   : > { %v4281_v19 = vpop.eup %4280  ;;  %3403 = vst [vmem:[%s5391_s17 + $0x608] sm:$0xff] %v2891_v42  ;;  %v2893_v27 = vmul.f32 %v2381_v28, %v6379_v18  ;;  %v2383_v51 = vadd.f32 0.5, %v1871_v54  ;;  %v1873_v16 = vmul.f32 0.5, %v4279_v11  ;;  %4300 = vtanh.f32 %v860_v52  ;;  %v6519_v54 = vld [vmem:[%s5127_s30 + $0x6d0] sm:$0xff] }
 0x13e   : > { %v4283_v9 = vpop.eup %4282  ;;  %3404 = vst [vmem:[%s5391_s17 + $0x610] sm:$0xff] %v2892_v59  ;;  %v2894_v5 = vmul.f32 %v2382_v46, %v6386_v4  ;;  %v2384_v43 = vadd.f32 0.5, %v1872_v0  ;;  %v1874_v62 = vmul.f32 0.5, %v4281_v19  ;;  %4302 = vtanh.f32 %v861_v8  ;;  %v6498_v8 = vld [vmem:[%s5127_s30 + $0x6b8] sm:$0xff] }
 0x13f   : > { %v4285_v47 = vpop.eup %4284  ;;  %3405 = vst [vmem:[%s5391_s17 + $0x618] sm:$0xff] %v2893_v27  ;;  %v2895_v18 = vmul.f32 %v2383_v51, %v6389_v56  ;;  %v2385_v55 = vadd.f32 0.5, %v1873_v16  ;;  %v1875_v40 = vmul.f32 0.5, %v4283_v9  ;;  %4304 = vtanh.f32 %v862_v30  ;;  %v6527_v16 = vld [vmem:[%s5127_s30 + $0x6d8] sm:$0xff] }
 0x140   : > { %v4287_v34 = vpop.eup %4286  ;;  %3406 = vst [vmem:[%s5391_s17 + $0x620] sm:$0xff] %v2894_v5  ;;  %v2896_v25 = vmul.f32 %v2384_v43, %v6395_v17  ;;  %v2386_v4 = vadd.f32 0.5, %v1874_v62  ;;  %v1876_v35 = vmul.f32 0.5, %v4285_v47  ;;  %v863_v20 = vmul.f32 0.5, %v6482_v1  ;;  %v6533_v47 = vld [vmem:[%s5127_s30 + $0x6e0] sm:$0xff] }
 0x141   : > { %v4289_v52 = vpop.eup %4288  ;;  %3407 = vst [vmem:[%s5391_s17 + $0x628] sm:$0xff] %v2895_v18  ;;  %v2897_v53 = vmul.f32 %v2385_v55, %v6398_v50  ;;  %v2387_v56 = vadd.f32 0.5, %v1875_v40  ;;  %v1877_v44 = vmul.f32 0.5, %v4287_v34  ;;  %v864_v60 = vmul.f32 0.5, %v6487_v39  ;;  %v6541_v34 = vld [vmem:[%s5127_s30 + $0x6f0] sm:$0xff] }
 0x142   : > { %v4291_v61 = vpop.eup %4290  ;;  %3408 = vst [vmem:[%s5391_s17 + $0x630] sm:$0xff] %v2896_v25  ;;  %v2898_v17 = vmul.f32 %v2386_v4, %v6404_v24  ;;  %v2388_v58 = vadd.f32 0.5, %v1876_v35  ;;  %v1878_v12 = vmul.f32 0.5, %v4289_v52  ;;  %4306 = vtanh.f32 %v863_v20  ;;  %v6547_v35 = vld [vmem:[%s5127_s30 + $0x6f8] sm:$0xff] }
 0x143   : > { %v4293_v14 = vpop.eup %4292  ;;  %3409 = vst [vmem:[%s5391_s17 + $0x638] sm:$0xff] %v2897_v53  ;;  %v2899_v50 = vmul.f32 %v2387_v56, %v6410_v6  ;;  %v2389_v45 = vadd.f32 0.5, %v1877_v44  ;;  %v1879_v3 = vmul.f32 0.5, %v4291_v61  ;;  %4308 = vtanh.f32 %v864_v60  ;;  %v6557_v44 = vld [vmem:[%s5127_s30 + $0x708] sm:$0xff] }
 0x144   : > { %v4295_v30 = vpop.eup %4294  ;;  %3410 = vst [vmem:[%s5391_s17 + $0x640] sm:$0xff] %v2898_v17  ;;  %v2900_v7 = vmul.f32 %v2388_v58, %v6416_v38  ;;  %v2390_v24 = vadd.f32 0.5, %v1878_v12  ;;  %v1880_v37 = vmul.f32 0.5, %v4293_v14  ;;  %v865_v29 = vmul.f32 0.5, %v6498_v8  ;;  %v6563_v58 = vld [vmem:[%s5127_s30 + $0x710] sm:$0xff]  ;;  %v6566_v12 = vld [vmem:[%s5127_s30 + $0x718] sm:$0xff] }
 0x145   : > { %v4297_v32 = vpop.eup %4296  ;;  %3411 = vst [vmem:[%s5391_s17 + $0x648] sm:$0xff] %v2899_v50  ;;  %v2901_v13 = vmul.f32 %v2389_v45, %v6419_v2  ;;  %v2391_v6 = vadd.f32 0.5, %v1879_v3  ;;  %v1881_v23 = vmul.f32 0.5, %v4295_v30  ;;  %v866_v31 = vmul.f32 0.5, %v6503_v10 }
 0x146   : > { %v4299_v21 = vpop.eup %4298  ;;  %3412 = vst [vmem:[%s5391_s17 + $0x650] sm:$0xff] %v2900_v7  ;;  %v2902_v38 = vmul.f32 %v2390_v24, %v6424_v49  ;;  %v2392_v42 = vadd.f32 0.5, %v1880_v37  ;;  %v1882_v28 = vmul.f32 0.5, %v4297_v32  ;;  %4310 = vtanh.f32 %v865_v29  ;;  %v6578_v24 = vld [vmem:[%s5127_s30 + $0x728] sm:$0xff] }
 0x147   : > { %v4301_v11 = vpop.eup %4300  ;;  %3413 = vst [vmem:[%s5391_s17 + $0x658] sm:$0xff] %v2901_v13  ;;  %v2903_v2 = vmul.f32 %v2391_v6, %v6427_v41  ;;  %v2393_v59 = vadd.f32 0.5, %v1881_v23  ;;  %v1883_v46 = vmul.f32 0.5, %v4299_v21  ;;  %4312 = vtanh.f32 %v866_v31  ;;  %v6584_v13 = vld [vmem:[%s5127_s30 + $0x730] sm:$0xff]  ;;  %v6587_v6 = vld [vmem:[%s5127_s30 + $0x738] sm:$0xff] }
 0x148   : > { %v4303_v0 = vpop.eup %4302  ;;  %3414 = vst [vmem:[%s5391_s17 + $0x660] sm:$0xff] %v2902_v38  ;;  %v2904_v49 = vmul.f32 %v2392_v42, %v6432_v48  ;;  %v2394_v19 = vadd.f32 0.5, %v1882_v28  ;;  %v1884_v27 = vmul.f32 0.5, %v4301_v11  ;;  %v867_v51 = vmul.f32 0.5, %v6514_v36  ;;  %v6536_v48 = vld [vmem:[%s5127_s30 + $0x6e8] sm:$0xff]  ;;  %v6592_v42 = vld [vmem:[%s5127_s30 + $0x740] sm:$0xff] }
 0x149   : > { %v4305_v9 = vpop.eup %4304  ;;  %3415 = vst [vmem:[%s5391_s17 + $0x668] sm:$0xff] %v2903_v2  ;;  %v2905_v41 = vmul.f32 %v2393_v59, %v6438_v33  ;;  %v2395_v5 = vadd.f32 0.5, %v1883_v46  ;;  %v1885_v43 = vmul.f32 0.5, %v4303_v0  ;;  %v868_v62 = vmul.f32 0.5, %v6519_v54  ;;  %v6595_v28 = vld [vmem:[%s5127_s30 + $0x748] sm:$0xff]  ;;  %v6600_v46 = vld [vmem:[%s5127_s30 + $0x750] sm:$0xff] }
 0x14a   : > { %3416 = vst [vmem:[%s5391_s17 + $0x670] sm:$0xff] %v2904_v49  ;;  %v2906_v18 = vmul.f32 %v2394_v19, %v6444_v63  ;;  %v2396_v55 = vadd.f32 0.5, %v1884_v27  ;;  %v1886_v40 = vmul.f32 0.5, %v4305_v9  ;;  %4314 = vtanh.f32 %v867_v51  ;;  %v6606_v19 = vld [vmem:[%s5127_s30 + $0x758] sm:$0xff] }
 0x14b   : > { %3417 = vst [vmem:[%s5391_s17 + $0x678] sm:$0xff] %v2905_v41  ;;  %v2907_v33 = vmul.f32 %v2395_v5, %v6447_v15  ;;  %v2397_v25 = vadd.f32 0.5, %v1885_v43  ;;  %4316 = vtanh.f32 %v868_v62  ;;  %v869_v4 = vmul.f32 0.5, %v6527_v16  ;;  %v6554_v15 = vld [vmem:[%s5127_s30 + $0x700] sm:$0xff]  ;;  %v6615_v5 = vld [vmem:[%s5127_s30 + $0x768] sm:$0xff] }
 0x14c   : > { %v4307_v63 = vpop.eup %4306  ;;  %3418 = vst [vmem:[%s5391_s17 + $0x680] sm:$0xff] %v2906_v18  ;;  %v2908_v20 = vmul.f32 %v2396_v55, %v6452_v57  ;;  %v2398_v52 = vadd.f32 0.5, %v1886_v40  ;;  %v870_v53 = vmul.f32 0.5, %v6533_v47  ;;  %v871_v56 = vmul.f32 0.5, %v6536_v48  ;;  %v6612_v41 = vld [vmem:[%s5127_s30 + $0x760] sm:$0xff]  ;;  %v6620_v40 = vld [vmem:[%s5127_s30 + $0x770] sm:$0xff] }
 0x14d   : > { %v4309_v60 = vpop.eup %4308  ;;  %3419 = vst [vmem:[%s5391_s17 + $0x688] sm:$0xff] %v2907_v33  ;;  %v2909_v61 = vmul.f32 %v2397_v25, %v6457_v26  ;;  %v1887_v17 = vmul.f32 0.5, %v4307_v63  ;;  %4318 = vtanh.f32 %v869_v4  ;;  %v872_v57 = vmul.f32 0.5, %v6541_v34  ;;  %v6572_v26 = vld [vmem:[%s5127_s30 + $0x720] sm:$0xff]  ;;  %v6625_v63 = vld [vmem:[%s5127_s30 + $0x778] sm:$0xff] }
 0x14e   : > { %3420 = vst [vmem:[%s5391_s17 + $0x690] sm:$0xff] %v2908_v20  ;;  %v2910_v14 = vmul.f32 %v2398_v52, %v6465_v22  ;;  %v1888_v50 = vmul.f32 0.5, %v4309_v60  ;;  %4320 = vtanh.f32 %v870_v53  ;;  %v873_v45 = vmul.f32 0.5, %v6547_v35 }
 0x14f   : > { %3421 = vst [vmem:[%s5391_s17 + $0x698] sm:$0xff] %v2909_v61  ;;  %v2399_v3 = vadd.f32 0.5, %v1887_v17  ;;  %4322 = vtanh.f32 %v871_v56  ;;  %v874_v30 = vmul.f32 0.5, %v6554_v15  ;;  %v875_v7 = vmul.f32 0.5, %v6557_v44  ;;  %v6633_v17 = vld [vmem:[%s5127_s30 + $0x780] sm:$0xff] }
 0x150   : > { %v4311_v22 = vpop.eup %4310  ;;  %3422 = vst [vmem:[%s5391_s17 + $0x6a0] sm:$0xff] %v2910_v14  ;;  %v2400_v37 = vadd.f32 0.5, %v1888_v50  ;;  %4324 = vtanh.f32 %v872_v57  ;;  %v876_v29 = vmul.f32 0.5, %v6563_v58  ;;  %v877_v32 = vmul.f32 0.5, %v6566_v12 }
 0x151   : > { %v4313_v23 = vpop.eup %4312  ;;  %v2911_v31 = vmul.f32 %v2399_v3, %v6482_v1  ;;  %v1889_v21 = vmul.f32 0.5, %v4311_v22  ;;  %4326 = vtanh.f32 %v873_v45  ;;  %v878_v38 = vmul.f32 0.5, %v6572_v26 }
 0x152   : > { %v2912_v11 = vmul.f32 %v2400_v37, %v6487_v39  ;;  %v1890_v2 = vmul.f32 0.5, %v4313_v23  ;;  %4328 = vtanh.f32 %v874_v30  ;;  %v879_v59 = vmul.f32 0.5, %v6578_v24 }
 0x153   : > { %3423 = vst [vmem:[%s5391_s17 + $0x6a8] sm:$0xff] %v2911_v31  ;;  %v2401_v1 = vadd.f32 0.5, %v1889_v21  ;;  %4330 = vtanh.f32 %v875_v7  ;;  %v880_v0 = vmul.f32 0.5, %v6584_v13  ;;  %v881_v49 = vmul.f32 0.5, %v6587_v6 }
 0x154   : > { %v4315_v27 = vpop.eup %4314  ;;  %3424 = vst [vmem:[%s5391_s17 + $0x6b0] sm:$0xff] %v2912_v11  ;;  %v2402_v39 = vadd.f32 0.5, %v1890_v2  ;;  %4332 = vtanh.f32 %v876_v29  ;;  %v882_v51 = vmul.f32 0.5, %v6592_v42  ;;  %v883_v9 = vmul.f32 0.5, %v6595_v28 }
 0x155   : > { %v4317_v43 = vpop.eup %4316  ;;  %v2913_v62 = vmul.f32 %v2401_v1, %v6498_v8  ;;  %v1891_v18 = vmul.f32 0.5, %v4315_v27  ;;  %4334 = vtanh.f32 %v877_v32  ;;  %v884_v55 = vmul.f32 0.5, %v6600_v46 }
 0x156   : > { %v2914_v33 = vmul.f32 %v2402_v39, %v6503_v10  ;;  %v1892_v25 = vmul.f32 0.5, %v4317_v43  ;;  %4336 = vtanh.f32 %v878_v38  ;;  %v885_v4 = vmul.f32 0.5, %v6606_v19 }
 0x157   : > { %v4319_v20 = vpop.eup %4318  ;;  %3425 = vst [vmem:[%s5391_s17 + $0x6b8] sm:$0xff] %v2913_v62  ;;  %v2403_v52 = vadd.f32 0.5, %v1891_v18  ;;  %4338 = vtanh.f32 %v879_v59  ;;  %v886_v8 = vmul.f32 0.5, %v6612_v41  ;;  %v887_v53 = vmul.f32 0.5, %v6615_v5  ;;  %v6650_v18 = vld [vmem:[%s5127_s30 + $0x788] sm:$0xff] }
 0x158   : > { %v4321_v56 = vpop.eup %4320  ;;  %3426 = vst [vmem:[%s5391_s17 + $0x6c0] sm:$0xff] %v2914_v33  ;;  %v2404_v60 = vadd.f32 0.5, %v1892_v25  ;;  %v1893_v10 = vmul.f32 0.5, %v4319_v20  ;;  %4340 = vtanh.f32 %v880_v0  ;;  %v888_v61 = vmul.f32 0.5, %v6620_v40 }
 0x159   : > { %v4323_v57 = vpop.eup %4322  ;;  %v2915_v14 = vmul.f32 %v2403_v52, %v6514_v36  ;;  %v1894_v50 = vmul.f32 0.5, %v4321_v56  ;;  %4342 = vtanh.f32 %v881_v49  ;;  %v889_v45 = vmul.f32 0.5, %v6625_v63 }
 0x15a   : > { %v4325_v3 = vpop.eup %4324  ;;  %v2916_v30 = vmul.f32 %v2404_v60, %v6519_v54  ;;  %v2405_v7 = vadd.f32 0.5, %v1893_v10  ;;  %v1895_v22 = vmul.f32 0.5, %v4323_v57  ;;  %4344 = vtanh.f32 %v882_v51 }
 0x15b   : > { %v4327_v37 = vpop.eup %4326  ;;  %3427 = vst [vmem:[%s5391_s17 + $0x6c8] sm:$0xff] %v2915_v14  ;;  %v2406_v29 = vadd.f32 0.5, %v1894_v50  ;;  %v1896_v32 = vmul.f32 0.5, %v4325_v3  ;;  %4346 = vtanh.f32 %v883_v9  ;;  %v890_v23 = vmul.f32 0.5, %v6633_v17 }
 0x15c   : > { %v4329_v36 = vpop.eup %4328  ;;  %3428 = vst [vmem:[%s5391_s17 + $0x6d0] sm:$0xff] %v2916_v30  ;;  %v2917_v31 = vmul.f32 %v2405_v7, %v6527_v16  ;;  %v2407_v21 = vadd.f32 0.5, %v1895_v22  ;;  %v1897_v38 = vmul.f32 0.5, %v4327_v37  ;;  %4348 = vtanh.f32 %v884_v55  ;;  %v6671_v22 = vld [vmem:[%s5127_s30 + $0x7a0] sm:$0xff] }
 0x15d   : > { %v4331_v54 = vpop.eup %4330  ;;  %v2918_v11 = vmul.f32 %v2406_v29, %v6533_v47  ;;  %v2408_v2 = vadd.f32 0.5, %v1896_v32  ;;  %v1898_v59 = vmul.f32 0.5, %v4329_v36  ;;  %4350 = vtanh.f32 %v885_v4  ;;  %v6655_v4 = vld [vmem:[%s5127_s30 + $0x790] sm:$0xff] }
 0x15e   : > { %v4333_v1 = vpop.eup %4332  ;;  %3429 = vst [vmem:[%s5391_s17 + $0x6d8] sm:$0xff] %v2917_v31  ;;  %v2919_v0 = vmul.f32 %v2407_v21, %v6536_v48  ;;  %v2409_v49 = vadd.f32 0.5, %v1897_v38  ;;  %v1899_v27 = vmul.f32 0.5, %v4331_v54  ;;  %4352 = vtanh.f32 %v886_v8 }
 0x15f   : > { %v4335_v16 = vpop.eup %4334  ;;  %3430 = vst [vmem:[%s5391_s17 + $0x6e0] sm:$0xff] %v2918_v11  ;;  %v2920_v39 = vmul.f32 %v2408_v2, %v6541_v34  ;;  %v2410_v51 = vadd.f32 0.5, %v1898_v59  ;;  %v1900_v47 = vmul.f32 0.5, %v4333_v1  ;;  %4354 = vtanh.f32 %v887_v53  ;;  %v6682_v59 = vld [vmem:[%s5127_s30 + $0x7a8] sm:$0xff] }
 0x160   : > { %v4337_v9 = vpop.eup %4336  ;;  %3431 = vst [vmem:[%s5391_s17 + $0x6e8] sm:$0xff] %v2919_v0  ;;  %v2921_v43 = vmul.f32 %v2409_v49, %v6547_v35  ;;  %v2411_v62 = vadd.f32 0.5, %v1899_v27  ;;  %v1901_v48 = vmul.f32 0.5, %v4335_v16  ;;  %4356 = vtanh.f32 %v888_v61  ;;  %v6687_v27 = vld [vmem:[%s5127_s30 + $0x7b0] sm:$0xff] }
 0x161   : > { %v4339_v55 = vpop.eup %4338  ;;  %3432 = vst [vmem:[%s5391_s17 + $0x6f0] sm:$0xff] %v2920_v39  ;;  %v2922_v33 = vmul.f32 %v2410_v51, %v6554_v15  ;;  %v2412_v34 = vadd.f32 0.5, %v1900_v47  ;;  %v1902_v25 = vmul.f32 0.5, %v4337_v9  ;;  %4358 = vtanh.f32 %v889_v45  ;;  %v6666_v45 = vld [vmem:[%s5127_s30 + $0x798] sm:$0xff] }
 0x162   : > { %v4341_v20 = vpop.eup %4340  ;;  %3433 = vst [vmem:[%s5391_s17 + $0x6f8] sm:$0xff] %v2921_v43  ;;  %v2923_v35 = vmul.f32 %v2411_v62, %v6557_v44  ;;  %v2413_v52 = vadd.f32 0.5, %v1901_v48  ;;  %v1903_v8 = vmul.f32 0.5, %v4339_v55  ;;  %4360 = vtanh.f32 %v890_v23  ;;  %v6695_v48 = vld [vmem:[%s5127_s30 + $0x7b8] sm:$0xff] }
 0x163   : > { %v4343_v53 = vpop.eup %4342  ;;  %3434 = vst [vmem:[%s5391_s17 + $0x700] sm:$0xff] %v2922_v33  ;;  %v2924_v56 = vmul.f32 %v2412_v34, %v6563_v58  ;;  %v2414_v15 = vadd.f32 0.5, %v1902_v25  ;;  %v1904_v60 = vmul.f32 0.5, %v4341_v20  ;;  %v891_v10 = vmul.f32 0.5, %v6650_v18  ;;  %v6701_v20 = vld [vmem:[%s5127_s30 + $0x7c0] sm:$0xff] }
 0x164   : > { %v4345_v61 = vpop.eup %4344  ;;  %3435 = vst [vmem:[%s5391_s17 + $0x708] sm:$0xff] %v2923_v35  ;;  %v2925_v57 = vmul.f32 %v2413_v52, %v6566_v12  ;;  %v2415_v44 = vadd.f32 0.5, %v1903_v8  ;;  %v1905_v14 = vmul.f32 0.5, %v4343_v53  ;;  %v892_v50 = vmul.f32 0.5, %v6655_v4  ;;  %v6709_v53 = vld [vmem:[%s5127_s30 + $0x7d0] sm:$0xff] }
 0x165   : > { %v4347_v3 = vpop.eup %4346  ;;  %3436 = vst [vmem:[%s5391_s17 + $0x710] sm:$0xff] %v2924_v56  ;;  %v2926_v58 = vmul.f32 %v2414_v15, %v6572_v26  ;;  %v2416_v30 = vadd.f32 0.5, %v1904_v60  ;;  %v1906_v7 = vmul.f32 0.5, %v4345_v61  ;;  %4362 = vtanh.f32 %v891_v10  ;;  %v6715_v60 = vld [vmem:[%s5127_s30 + $0x7d8] sm:$0xff] }
 0x166   : > { %v4349_v37 = vpop.eup %4348  ;;  %3437 = vst [vmem:[%s5391_s17 + $0x718] sm:$0xff] %v2925_v57  ;;  %v2927_v12 = vmul.f32 %v2415_v44, %v6578_v24  ;;  %v2417_v29 = vadd.f32 0.5, %v1905_v14  ;;  %v1907_v32 = vmul.f32 0.5, %v4347_v3  ;;  %4364 = vtanh.f32 %v892_v50  ;;  %v6725_v14 = vld [vmem:[%s5127_s30 + $0x7e8] sm:$0xff] }
 0x167   : > { %v4351_v23 = vpop.eup %4350  ;;  %3438 = vst [vmem:[%s5391_s17 + $0x720] sm:$0xff] %v2926_v58  ;;  %v2928_v36 = vmul.f32 %v2416_v30, %v6584_v13  ;;  %v2418_v26 = vadd.f32 0.5, %v1906_v7  ;;  %v1908_v31 = vmul.f32 0.5, %v4349_v37  ;;  %v893_v21 = vmul.f32 0.5, %v6666_v45  ;;  %v6731_v30 = vld [vmem:[%s5127_s30 + $0x7f0] sm:$0xff]  ;;  %v6734_v7 = vld [vmem:[%s5127_s30 + $0x7f8] sm:$0xff] }
 0x168   : > { %v4353_v38 = vpop.eup %4352  ;;  %3439 = vst [vmem:[%s5391_s17 + $0x728] sm:$0xff] %v2927_v12  ;;  %v2929_v54 = vmul.f32 %v2417_v29, %v6587_v6  ;;  %v2419_v24 = vadd.f32 0.5, %v1907_v32  ;;  %v1909_v11 = vmul.f32 0.5, %v4351_v23  ;;  %v894_v2 = vmul.f32 0.5, %v6671_v22 }
 0x169   : > { %v4355_v1 = vpop.eup %4354  ;;  %3440 = vst [vmem:[%s5391_s17 + $0x730] sm:$0xff] %v2928_v36  ;;  %v2930_v13 = vmul.f32 %v2418_v26, %v6592_v42  ;;  %v2420_v0 = vadd.f32 0.5, %v1908_v31  ;;  %v1910_v49 = vmul.f32 0.5, %v4353_v38  ;;  %4366 = vtanh.f32 %v893_v21  ;;  %v6746_v26 = vld [vmem:[%s5127_s30 + $0x808] sm:$0xff] }
 0x16a   : > { %v4357_v16 = vpop.eup %4356  ;;  %3441 = vst [vmem:[%s5391_s17 + $0x738] sm:$0xff] %v2929_v54  ;;  %v2931_v6 = vmul.f32 %v2419_v24, %v6595_v28  ;;  %v2421_v39 = vadd.f32 0.5, %v1909_v11  ;;  %v1911_v51 = vmul.f32 0.5, %v4355_v1  ;;  %4368 = vtanh.f32 %v894_v2  ;;  %v6752_v54 = vld [vmem:[%s5127_s30 + $0x810] sm:$0xff]  ;;  %v6755_v24 = vld [vmem:[%s5127_s30 + $0x818] sm:$0xff] }
 0x16b   : > { %v4359_v47 = vpop.eup %4358  ;;  %3442 = vst [vmem:[%s5391_s17 + $0x740] sm:$0xff] %v2930_v13  ;;  %v2932_v42 = vmul.f32 %v2420_v0, %v6600_v46  ;;  %v2422_v9 = vadd.f32 0.5, %v1910_v49  ;;  %v1912_v43 = vmul.f32 0.5, %v4357_v16  ;;  %v895_v62 = vmul.f32 0.5, %v6682_v59  ;;  %v6704_v46 = vld [vmem:[%s5127_s30 + $0x7c8] sm:$0xff]  ;;  %v6760_v0 = vld [vmem:[%s5127_s30 + $0x820] sm:$0xff] }
 0x16c   : > { %v4361_v55 = vpop.eup %4360  ;;  %3443 = vst [vmem:[%s5391_s17 + $0x748] sm:$0xff] %v2931_v6  ;;  %v2933_v28 = vmul.f32 %v2421_v39, %v6606_v19  ;;  %v2423_v33 = vadd.f32 0.5, %v1911_v51  ;;  %v1913_v34 = vmul.f32 0.5, %v4359_v47  ;;  %v896_v25 = vmul.f32 0.5, %v6687_v27  ;;  %v6763_v49 = vld [vmem:[%s5127_s30 + $0x828] sm:$0xff]  ;;  %v6768_v51 = vld [vmem:[%s5127_s30 + $0x830] sm:$0xff] }
 0x16d   : > { %3444 = vst [vmem:[%s5391_s17 + $0x750] sm:$0xff] %v2932_v42  ;;  %v2934_v35 = vmul.f32 %v2422_v9, %v6612_v41  ;;  %v2424_v52 = vadd.f32 0.5, %v1912_v43  ;;  %v1914_v8 = vmul.f32 0.5, %v4361_v55  ;;  %4370 = vtanh.f32 %v895_v62  ;;  %v6774_v9 = vld [vmem:[%s5127_s30 + $0x838] sm:$0xff] }
 0x16e   : > { %3445 = vst [vmem:[%s5391_s17 + $0x758] sm:$0xff] %v2933_v28  ;;  %v2935_v19 = vmul.f32 %v2423_v33, %v6615_v5  ;;  %v2425_v56 = vadd.f32 0.5, %v1913_v34  ;;  %4372 = vtanh.f32 %v896_v25  ;;  %v897_v15 = vmul.f32 0.5, %v6695_v48  ;;  %v6722_v5 = vld [vmem:[%s5127_s30 + $0x7e0] sm:$0xff]  ;;  %v6783_v33 = vld [vmem:[%s5127_s30 + $0x848] sm:$0xff] }
 0x16f   : > { %v4363_v41 = vpop.eup %4362  ;;  %3446 = vst [vmem:[%s5391_s17 + $0x760] sm:$0xff] %v2934_v35  ;;  %v2936_v10 = vmul.f32 %v2424_v52, %v6620_v40  ;;  %v2426_v61 = vadd.f32 0.5, %v1914_v8  ;;  %v898_v57 = vmul.f32 0.5, %v6701_v20  ;;  %v899_v44 = vmul.f32 0.5, %v6704_v46  ;;  %v6780_v28 = vld [vmem:[%s5127_s30 + $0x840] sm:$0xff]  ;;  %v6788_v8 = vld [vmem:[%s5127_s30 + $0x850] sm:$0xff] }
 0x170   : > { %v4365_v50 = vpop.eup %4364  ;;  %3447 = vst [vmem:[%s5391_s17 + $0x768] sm:$0xff] %v2935_v19  ;;  %v2937_v3 = vmul.f32 %v2425_v56, %v6625_v63  ;;  %v1915_v58 = vmul.f32 0.5, %v4363_v41  ;;  %4374 = vtanh.f32 %v897_v15  ;;  %v900_v40 = vmul.f32 0.5, %v6709_v53  ;;  %v6740_v63 = vld [vmem:[%s5127_s30 + $0x800] sm:$0xff]  ;;  %v6793_v41 = vld [vmem:[%s5127_s30 + $0x858] sm:$0xff] }
 0x171   : > { %3448 = vst [vmem:[%s5391_s17 + $0x770] sm:$0xff] %v2936_v10  ;;  %v2938_v37 = vmul.f32 %v2426_v61, %v6633_v17  ;;  %v1916_v12 = vmul.f32 0.5, %v4365_v50  ;;  %4376 = vtanh.f32 %v898_v57  ;;  %v901_v29 = vmul.f32 0.5, %v6715_v60 }
 0x172   : > { %3449 = vst [vmem:[%s5391_s17 + $0x778] sm:$0xff] %v2937_v3  ;;  %v2427_v32 = vadd.f32 0.5, %v1915_v58  ;;  %4378 = vtanh.f32 %v899_v44  ;;  %v902_v23 = vmul.f32 0.5, %v6722_v5  ;;  %v903_v36 = vmul.f32 0.5, %v6725_v14  ;;  %v6801_v58 = vld [vmem:[%s5127_s30 + $0x860] sm:$0xff] }
 0x173   : > { %v4367_v17 = vpop.eup %4366  ;;  %3450 = vst [vmem:[%s5391_s17 + $0x780] sm:$0xff] %v2938_v37  ;;  %v2428_v31 = vadd.f32 0.5, %v1916_v12  ;;  %4380 = vtanh.f32 %v900_v40  ;;  %v904_v21 = vmul.f32 0.5, %v6731_v30  ;;  %v905_v38 = vmul.f32 0.5, %v6734_v7 }
 0x174   : > { %v4369_v11 = vpop.eup %4368  ;;  %v2939_v2 = vmul.f32 %v2427_v32, %v6650_v18  ;;  %v1917_v1 = vmul.f32 0.5, %v4367_v17  ;;  %4382 = vtanh.f32 %v901_v29  ;;  %v906_v13 = vmul.f32 0.5, %v6740_v63 }
 0x175   : > { %v2940_v16 = vmul.f32 %v2428_v31, %v6655_v4  ;;  %v1918_v6 = vmul.f32 0.5, %v4369_v11  ;;  %4384 = vtanh.f32 %v902_v23  ;;  %v907_v39 = vmul.f32 0.5, %v6746_v26 }
 0x176   : > { %3451 = vst [vmem:[%s5391_s17 + $0x788] sm:$0xff] %v2939_v2  ;;  %v2429_v18 = vadd.f32 0.5, %v1917_v1  ;;  %4386 = vtanh.f32 %v903_v36  ;;  %v908_v47 = vmul.f32 0.5, %v6752_v54  ;;  %v909_v42 = vmul.f32 0.5, %v6755_v24 }
 0x177   : > { %v4371_v43 = vpop.eup %4370  ;;  %3452 = vst [vmem:[%s5391_s17 + $0x790] sm:$0xff] %v2940_v16  ;;  %v2430_v4 = vadd.f32 0.5, %v1918_v6  ;;  %4388 = vtanh.f32 %v904_v21  ;;  %v910_v62 = vmul.f32 0.5, %v6760_v0  ;;  %v911_v55 = vmul.f32 0.5, %v6763_v49 }
 0x178   : > { %v4373_v34 = vpop.eup %4372  ;;  %v2941_v25 = vmul.f32 %v2429_v18, %v6666_v45  ;;  %v1919_v35 = vmul.f32 0.5, %v4371_v43  ;;  %4390 = vtanh.f32 %v905_v38  ;;  %v912_v52 = vmul.f32 0.5, %v6768_v51 }
 0x179   : > { %v2942_v19 = vmul.f32 %v2430_v4, %v6671_v22  ;;  %v1920_v56 = vmul.f32 0.5, %v4373_v34  ;;  %4392 = vtanh.f32 %v906_v13  ;;  %v913_v15 = vmul.f32 0.5, %v6774_v9 }
 0x17a   : > { %v4375_v10 = vpop.eup %4374  ;;  %3453 = vst [vmem:[%s5391_s17 + $0x798] sm:$0xff] %v2941_v25  ;;  %v2431_v61 = vadd.f32 0.5, %v1919_v35  ;;  %4394 = vtanh.f32 %v907_v39  ;;  %v914_v45 = vmul.f32 0.5, %v6780_v28  ;;  %v915_v57 = vmul.f32 0.5, %v6783_v33  ;;  %v6818_v35 = vld [vmem:[%s5127_s30 + $0x868] sm:$0xff] }
 0x17b   : > { %v4377_v44 = vpop.eup %4376  ;;  %3454 = vst [vmem:[%s5391_s17 + $0x7a0] sm:$0xff] %v2942_v19  ;;  %v2432_v50 = vadd.f32 0.5, %v1920_v56  ;;  %v1921_v22 = vmul.f32 0.5, %v4375_v10  ;;  %4396 = vtanh.f32 %v908_v47  ;;  %v916_v3 = vmul.f32 0.5, %v6788_v8 }
 0x17c   : > { %v4379_v40 = vpop.eup %4378  ;;  %v2943_v37 = vmul.f32 %v2431_v61, %v6682_v59  ;;  %v1922_v12 = vmul.f32 0.5, %v4377_v44  ;;  %4398 = vtanh.f32 %v909_v42  ;;  %v917_v29 = vmul.f32 0.5, %v6793_v41 }
 0x17d   : > { %v4381_v32 = vpop.eup %4380  ;;  %v2944_v23 = vmul.f32 %v2432_v50, %v6687_v27  ;;  %v2433_v36 = vadd.f32 0.5, %v1921_v22  ;;  %v1923_v17 = vmul.f32 0.5, %v4379_v40  ;;  %4400 = vtanh.f32 %v910_v62 }
 0x17e   : > { %v4383_v31 = vpop.eup %4382  ;;  %3455 = vst [vmem:[%s5391_s17 + $0x7a8] sm:$0xff] %v2943_v37  ;;  %v2434_v21 = vadd.f32 0.5, %v1922_v12  ;;  %v1924_v38 = vmul.f32 0.5, %v4381_v32  ;;  %4402 = vtanh.f32 %v911_v55  ;;  %v918_v11 = vmul.f32 0.5, %v6801_v58 }
 0x17f   : > { %v4385_v59 = vpop.eup %4384  ;;  %3456 = vst [vmem:[%s5391_s17 + $0x7b0] sm:$0xff] %v2944_v23  ;;  %v2945_v2 = vmul.f32 %v2433_v36, %v6695_v48  ;;  %v2435_v1 = vadd.f32 0.5, %v1923_v17  ;;  %v1925_v13 = vmul.f32 0.5, %v4383_v31  ;;  %4404 = vtanh.f32 %v912_v52  ;;  %v6839_v17 = vld [vmem:[%s5127_s30 + $0x880] sm:$0xff] }
 0x180   : > { %v4387_v27 = vpop.eup %4386  ;;  %v2946_v16 = vmul.f32 %v2434_v21, %v6701_v20  ;;  %v2436_v6 = vadd.f32 0.5, %v1924_v38  ;;  %v1926_v39 = vmul.f32 0.5, %v4385_v59  ;;  %4406 = vtanh.f32 %v913_v15  ;;  %v6823_v15 = vld [vmem:[%s5127_s30 + $0x870] sm:$0xff] }
 0x181   : > { %v4389_v18 = vpop.eup %4388  ;;  %3457 = vst [vmem:[%s5391_s17 + $0x7b8] sm:$0xff] %v2945_v2  ;;  %v2947_v47 = vmul.f32 %v2435_v1, %v6704_v46  ;;  %v2437_v42 = vadd.f32 0.5, %v1925_v13  ;;  %v1927_v43 = vmul.f32 0.5, %v4387_v27  ;;  %4408 = vtanh.f32 %v914_v45 }
 0x182   : > { %v4391_v48 = vpop.eup %4390  ;;  %3458 = vst [vmem:[%s5391_s17 + $0x7c0] sm:$0xff] %v2946_v16  ;;  %v2948_v4 = vmul.f32 %v2436_v6, %v6709_v53  ;;  %v2438_v62 = vadd.f32 0.5, %v1926_v39  ;;  %v1928_v20 = vmul.f32 0.5, %v4389_v18  ;;  %4410 = vtanh.f32 %v915_v57  ;;  %v6850_v39 = vld [vmem:[%s5127_s30 + $0x888] sm:$0xff] }
 0x183   : > { %v4393_v55 = vpop.eup %4392  ;;  %3459 = vst [vmem:[%s5391_s17 + $0x7c8] sm:$0xff] %v2947_v47  ;;  %v2949_v34 = vmul.f32 %v2437_v42, %v6715_v60  ;;  %v2439_v25 = vadd.f32 0.5, %v1927_v43  ;;  %v1929_v46 = vmul.f32 0.5, %v4391_v48  ;;  %4412 = vtanh.f32 %v916_v3  ;;  %v6855_v43 = vld [vmem:[%s5127_s30 + $0x890] sm:$0xff] }
 0x184   : > { %v4395_v52 = vpop.eup %4394  ;;  %3460 = vst [vmem:[%s5391_s17 + $0x7d0] sm:$0xff] %v2948_v4  ;;  %v2950_v19 = vmul.f32 %v2438_v62, %v6722_v5  ;;  %v2440_v53 = vadd.f32 0.5, %v1928_v20  ;;  %v1930_v56 = vmul.f32 0.5, %v4393_v55  ;;  %4414 = vtanh.f32 %v917_v29  ;;  %v6834_v29 = vld [vmem:[%s5127_s30 + $0x878] sm:$0xff] }
 0x185   : > { %v4397_v10 = vpop.eup %4396  ;;  %3461 = vst [vmem:[%s5391_s17 + $0x7d8] sm:$0xff] %v2949_v34  ;;  %v2951_v60 = vmul.f32 %v2439_v25, %v6725_v14  ;;  %v2441_v61 = vadd.f32 0.5, %v1929_v46  ;;  %v1931_v45 = vmul.f32 0.5, %v4395_v52  ;;  %4416 = vtanh.f32 %v918_v11  ;;  %v6863_v46 = vld [vmem:[%s5127_s30 + $0x898] sm:$0xff] }
 0x186   : > { %v4399_v57 = vpop.eup %4398  ;;  %3462 = vst [vmem:[%s5391_s17 + $0x7e0] sm:$0xff] %v2950_v19  ;;  %v2952_v44 = vmul.f32 %v2440_v53, %v6731_v30  ;;  %v2442_v5 = vadd.f32 0.5, %v1930_v56  ;;  %v1932_v50 = vmul.f32 0.5, %v4397_v10  ;;  %v919_v22 = vmul.f32 0.5, %v6818_v35  ;;  %v6869_v10 = vld [vmem:[%s5127_s30 + $0x8a0] sm:$0xff] }
 0x187   : > { %v4401_v3 = vpop.eup %4400  ;;  %3463 = vst [vmem:[%s5391_s17 + $0x7e8] sm:$0xff] %v2951_v60  ;;  %v2953_v40 = vmul.f32 %v2441_v61, %v6734_v7  ;;  %v2443_v14 = vadd.f32 0.5, %v1931_v45  ;;  %v1933_v37 = vmul.f32 0.5, %v4399_v57  ;;  %v920_v12 = vmul.f32 0.5, %v6823_v15  ;;  %v6877_v57 = vld [vmem:[%s5127_s30 + $0x8b0] sm:$0xff] }
 0x188   : > { %v4403_v32 = vpop.eup %4402  ;;  %3464 = vst [vmem:[%s5391_s17 + $0x7f0] sm:$0xff] %v2952_v44  ;;  %v2954_v30 = vmul.f32 %v2442_v5, %v6740_v63  ;;  %v2444_v23 = vadd.f32 0.5, %v1932_v50  ;;  %v1934_v36 = vmul.f32 0.5, %v4401_v3  ;;  %4418 = vtanh.f32 %v919_v22  ;;  %v6883_v50 = vld [vmem:[%s5127_s30 + $0x8b8] sm:$0xff] }
 0x189   : > { %v4405_v31 = vpop.eup %4404  ;;  %3465 = vst [vmem:[%s5391_s17 + $0x7f8] sm:$0xff] %v2953_v40  ;;  %v2955_v7 = vmul.f32 %v2443_v14, %v6746_v26  ;;  %v2445_v21 = vadd.f32 0.5, %v1933_v37  ;;  %v1935_v38 = vmul.f32 0.5, %v4403_v32  ;;  %4420 = vtanh.f32 %v920_v12  ;;  %v6893_v37 = vld [vmem:[%s5127_s30 + $0x8c8] sm:$0xff] }
 0x18a   : > { %v4407_v11 = vpop.eup %4406  ;;  %3466 = vst [vmem:[%s5391_s17 + $0x800] sm:$0xff] %v2954_v30  ;;  %v2956_v59 = vmul.f32 %v2444_v23, %v6752_v54  ;;  %v2446_v63 = vadd.f32 0.5, %v1934_v36  ;;  %v1936_v2 = vmul.f32 0.5, %v4405_v31  ;;  %v921_v1 = vmul.f32 0.5, %v6834_v29  ;;  %v6899_v23 = vld [vmem:[%s5127_s30 + $0x8d0] sm:$0xff]  ;;  %v6902_v36 = vld [vmem:[%s5127_s30 + $0x8d8] sm:$0xff] }
 0x18b   : > { %v4409_v13 = vpop.eup %4408  ;;  %3467 = vst [vmem:[%s5391_s17 + $0x808] sm:$0xff] %v2955_v7  ;;  %v2957_v27 = vmul.f32 %v2445_v21, %v6755_v24  ;;  %v2447_v26 = vadd.f32 0.5, %v1935_v38  ;;  %v1937_v16 = vmul.f32 0.5, %v4407_v11  ;;  %v922_v6 = vmul.f32 0.5, %v6839_v17 }
 0x18c   : > { %v4411_v18 = vpop.eup %4410  ;;  %3468 = vst [vmem:[%s5391_s17 + $0x810] sm:$0xff] %v2956_v59  ;;  %v2958_v54 = vmul.f32 %v2446_v63, %v6760_v0  ;;  %v2448_v47 = vadd.f32 0.5, %v1936_v2  ;;  %v1938_v42 = vmul.f32 0.5, %v4409_v13  ;;  %4422 = vtanh.f32 %v921_v1  ;;  %v6914_v63 = vld [vmem:[%s5127_s30 + $0x8e8] sm:$0xff] }
 0x18d   : > { %v4413_v48 = vpop.eup %4412  ;;  %3469 = vst [vmem:[%s5391_s17 + $0x818] sm:$0xff] %v2957_v27  ;;  %v2959_v24 = vmul.f32 %v2447_v26, %v6763_v49  ;;  %v2449_v4 = vadd.f32 0.5, %v1937_v16  ;;  %v1939_v62 = vmul.f32 0.5, %v4411_v18  ;;  %4424 = vtanh.f32 %v922_v6  ;;  %v6920_v27 = vld [vmem:[%s5127_s30 + $0x8f0] sm:$0xff]  ;;  %v6923_v26 = vld [vmem:[%s5127_s30 + $0x8f8] sm:$0xff] }
 0x18e   : > { %v4415_v20 = vpop.eup %4414  ;;  %3470 = vst [vmem:[%s5391_s17 + $0x820] sm:$0xff] %v2958_v54  ;;  %v2960_v0 = vmul.f32 %v2448_v47, %v6768_v51  ;;  %v2450_v55 = vadd.f32 0.5, %v1938_v42  ;;  %v1940_v34 = vmul.f32 0.5, %v4413_v48  ;;  %v923_v25 = vmul.f32 0.5, %v6850_v39  ;;  %v6872_v51 = vld [vmem:[%s5127_s30 + $0x8a8] sm:$0xff]  ;;  %v6928_v47 = vld [vmem:[%s5127_s30 + $0x900] sm:$0xff] }
 0x18f   : > { %v4417_v52 = vpop.eup %4416  ;;  %3471 = vst [vmem:[%s5391_s17 + $0x828] sm:$0xff] %v2959_v24  ;;  %v2961_v49 = vmul.f32 %v2449_v4, %v6774_v9  ;;  %v2451_v19 = vadd.f32 0.5, %v1939_v62  ;;  %v1941_v53 = vmul.f32 0.5, %v4415_v20  ;;  %v924_v56 = vmul.f32 0.5, %v6855_v43  ;;  %v6931_v42 = vld [vmem:[%s5127_s30 + $0x908] sm:$0xff]  ;;  %v6936_v62 = vld [vmem:[%s5127_s30 + $0x910] sm:$0xff] }
 0x190   : > { %3472 = vst [vmem:[%s5391_s17 + $0x830] sm:$0xff] %v2960_v0  ;;  %v2962_v60 = vmul.f32 %v2450_v55, %v6780_v28  ;;  %v2452_v61 = vadd.f32 0.5, %v1940_v34  ;;  %v1942_v45 = vmul.f32 0.5, %v4417_v52  ;;  %4426 = vtanh.f32 %v923_v25  ;;  %v6942_v55 = vld [vmem:[%s5127_s30 + $0x918] sm:$0xff] }
 0x191   : > { %3473 = vst [vmem:[%s5391_s17 + $0x838] sm:$0xff] %v2961_v49  ;;  %v2963_v9 = vmul.f32 %v2451_v19, %v6783_v33  ;;  %v2453_v44 = vadd.f32 0.5, %v1941_v53  ;;  %4428 = vtanh.f32 %v924_v56  ;;  %v925_v5 = vmul.f32 0.5, %v6863_v46  ;;  %v6890_v33 = vld [vmem:[%s5127_s30 + $0x8c0] sm:$0xff]  ;;  %v6951_v19 = vld [vmem:[%s5127_s30 + $0x928] sm:$0xff] }
 0x192   : > { %v4419_v28 = vpop.eup %4418  ;;  %3474 = vst [vmem:[%s5391_s17 + $0x840] sm:$0xff] %v2962_v60  ;;  %v2964_v22 = vmul.f32 %v2452_v61, %v6788_v8  ;;  %v2454_v3 = vadd.f32 0.5, %v1942_v45  ;;  %v926_v40 = vmul.f32 0.5, %v6869_v10  ;;  %v927_v14 = vmul.f32 0.5, %v6872_v51  ;;  %v6948_v49 = vld [vmem:[%s5127_s30 + $0x920] sm:$0xff]  ;;  %v6956_v45 = vld [vmem:[%s5127_s30 + $0x930] sm:$0xff] }
 0x193   : > { %v4421_v12 = vpop.eup %4420  ;;  %3475 = vst [vmem:[%s5391_s17 + $0x848] sm:$0xff] %v2963_v9  ;;  %v2965_v32 = vmul.f32 %v2453_v44, %v6793_v41  ;;  %v1943_v30 = vmul.f32 0.5, %v4419_v28  ;;  %4430 = vtanh.f32 %v925_v5  ;;  %v928_v8 = vmul.f32 0.5, %v6877_v57  ;;  %v6908_v41 = vld [vmem:[%s5127_s30 + $0x8e0] sm:$0xff]  ;;  %v6961_v28 = vld [vmem:[%s5127_s30 + $0x938] sm:$0xff] }
 0x194   : > { %3476 = vst [vmem:[%s5391_s17 + $0x850] sm:$0xff] %v2964_v22  ;;  %v2966_v31 = vmul.f32 %v2454_v3, %v6801_v58  ;;  %v1944_v7 = vmul.f32 0.5, %v4421_v12  ;;  %4432 = vtanh.f32 %v926_v40  ;;  %v929_v21 = vmul.f32 0.5, %v6883_v50 }
 0x195   : > { %3477 = vst [vmem:[%s5391_s17 + $0x858] sm:$0xff] %v2965_v32  ;;  %v2455_v38 = vadd.f32 0.5, %v1943_v30  ;;  %4434 = vtanh.f32 %v927_v14  ;;  %v930_v11 = vmul.f32 0.5, %v6890_v33  ;;  %v931_v59 = vmul.f32 0.5, %v6893_v37  ;;  %v6969_v30 = vld [vmem:[%s5127_s30 + $0x940] sm:$0xff] }
 0x196   : > { %v4423_v58 = vpop.eup %4422  ;;  %3478 = vst [vmem:[%s5391_s17 + $0x860] sm:$0xff] %v2966_v31  ;;  %v2456_v2 = vadd.f32 0.5, %v1944_v7  ;;  %4436 = vtanh.f32 %v928_v8  ;;  %v932_v1 = vmul.f32 0.5, %v6899_v23  ;;  %v933_v13 = vmul.f32 0.5, %v6902_v36 }
 0x197   : > { %v4425_v16 = vpop.eup %4424  ;;  %v2967_v6 = vmul.f32 %v2455_v38, %v6818_v35  ;;  %v1945_v18 = vmul.f32 0.5, %v4423_v58  ;;  %4438 = vtanh.f32 %v929_v21  ;;  %v934_v54 = vmul.f32 0.5, %v6908_v41 }
 0x198   : > { %v2968_v48 = vmul.f32 %v2456_v2, %v6823_v15  ;;  %v1946_v24 = vmul.f32 0.5, %v4425_v16  ;;  %4440 = vtanh.f32 %v930_v11  ;;  %v935_v4 = vmul.f32 0.5, %v6914_v63 }
 0x199   : > { %3479 = vst [vmem:[%s5391_s17 + $0x868] sm:$0xff] %v2967_v6  ;;  %v2457_v35 = vadd.f32 0.5, %v1945_v18  ;;  %4442 = vtanh.f32 %v931_v59  ;;  %v936_v20 = vmul.f32 0.5, %v6920_v27  ;;  %v937_v0 = vmul.f32 0.5, %v6923_v26 }
 0x19a   : > { %v4427_v34 = vpop.eup %4426  ;;  %3480 = vst [vmem:[%s5391_s17 + $0x870] sm:$0xff] %v2968_v48  ;;  %v2458_v15 = vadd.f32 0.5, %v1946_v24  ;;  %4444 = vtanh.f32 %v932_v1  ;;  %v938_v25 = vmul.f32 0.5, %v6928_v47  ;;  %v939_v52 = vmul.f32 0.5, %v6931_v42 }
 0x19b   : > { %v4429_v53 = vpop.eup %4428  ;;  %v2969_v56 = vmul.f32 %v2457_v35, %v6834_v29  ;;  %v1947_v60 = vmul.f32 0.5, %v4427_v34  ;;  %4446 = vtanh.f32 %v933_v13  ;;  %v940_v61 = vmul.f32 0.5, %v6936_v62 }
 0x19c   : > { %v2970_v9 = vmul.f32 %v2458_v15, %v6839_v17  ;;  %v1948_v44 = vmul.f32 0.5, %v4429_v53  ;;  %4448 = vtanh.f32 %v934_v54  ;;  %v941_v5 = vmul.f32 0.5, %v6942_v55 }
 0x19d   : > { %v4431_v22 = vpop.eup %4430  ;;  %3481 = vst [vmem:[%s5391_s17 + $0x878] sm:$0xff] %v2969_v56  ;;  %v2459_v3 = vadd.f32 0.5, %v1947_v60  ;;  %4450 = vtanh.f32 %v935_v4  ;;  %v942_v29 = vmul.f32 0.5, %v6948_v49  ;;  %v943_v40 = vmul.f32 0.5, %v6951_v19  ;;  %v6986_v60 = vld [vmem:[%s5127_s30 + $0x948] sm:$0xff] }
 0x19e   : > { %v4433_v14 = vpop.eup %4432  ;;  %3482 = vst [vmem:[%s5391_s17 + $0x880] sm:$0xff] %v2970_v9  ;;  %v2460_v12 = vadd.f32 0.5, %v1948_v44  ;;  %v1949_v17 = vmul.f32 0.5, %v4431_v22  ;;  %4452 = vtanh.f32 %v936_v20  ;;  %v944_v32 = vmul.f32 0.5, %v6956_v45 }
 0x19f   : > { %v4435_v8 = vpop.eup %4434  ;;  %v2971_v31 = vmul.f32 %v2459_v3, %v6850_v39  ;;  %v1950_v7 = vmul.f32 0.5, %v4433_v14  ;;  %4454 = vtanh.f32 %v937_v0  ;;  %v945_v21 = vmul.f32 0.5, %v6961_v28 }
 0x1a0   : > { %v4437_v38 = vpop.eup %4436  ;;  %v2972_v11 = vmul.f32 %v2460_v12, %v6855_v43  ;;  %v2461_v59 = vadd.f32 0.5, %v1949_v17  ;;  %v1951_v58 = vmul.f32 0.5, %v4435_v8  ;;  %4456 = vtanh.f32 %v938_v25 }
 0x1a1   : > { %v4439_v2 = vpop.eup %4438  ;;  %3483 = vst [vmem:[%s5391_s17 + $0x888] sm:$0xff] %v2971_v31  ;;  %v2462_v1 = vadd.f32 0.5, %v1950_v7  ;;  %v1952_v13 = vmul.f32 0.5, %v4437_v38  ;;  %4458 = vtanh.f32 %v939_v52  ;;  %v946_v16 = vmul.f32 0.5, %v6969_v30 }
 0x1a2   : > { %v4441_v39 = vpop.eup %4440  ;;  %3484 = vst [vmem:[%s5391_s17 + $0x890] sm:$0xff] %v2972_v11  ;;  %v2973_v6 = vmul.f32 %v2461_v59, %v6863_v46  ;;  %v2463_v18 = vadd.f32 0.5, %v1951_v58  ;;  %v1953_v54 = vmul.f32 0.5, %v4439_v2  ;;  %4460 = vtanh.f32 %v940_v61  ;;  %v7007_v58 = vld [vmem:[%s5127_s30 + $0x960] sm:$0xff] }
 0x1a3   : > { %v4443_v43 = vpop.eup %4442  ;;  %v2974_v48 = vmul.f32 %v2462_v1, %v6869_v10  ;;  %v2464_v24 = vadd.f32 0.5, %v1952_v13  ;;  %v1954_v4 = vmul.f32 0.5, %v4441_v39  ;;  %4462 = vtanh.f32 %v941_v5  ;;  %v6991_v5 = vld [vmem:[%s5127_s30 + $0x950] sm:$0xff] }
 0x1a4   : > { %v4445_v35 = vpop.eup %4444  ;;  %3485 = vst [vmem:[%s5391_s17 + $0x898] sm:$0xff] %v2973_v6  ;;  %v2975_v20 = vmul.f32 %v2463_v18, %v6872_v51  ;;  %v2465_v0 = vadd.f32 0.5, %v1953_v54  ;;  %v1955_v34 = vmul.f32 0.5, %v4443_v43  ;;  %4464 = vtanh.f32 %v942_v29 }
 0x1a5   : > { %v4447_v46 = vpop.eup %4446  ;;  %3486 = vst [vmem:[%s5391_s17 + $0x8a0] sm:$0xff] %v2974_v48  ;;  %v2976_v15 = vmul.f32 %v2464_v24, %v6877_v57  ;;  %v2466_v25 = vadd.f32 0.5, %v1954_v4  ;;  %v1956_v10 = vmul.f32 0.5, %v4445_v35  ;;  %4466 = vtanh.f32 %v943_v40  ;;  %v7018_v4 = vld [vmem:[%s5127_s30 + $0x968] sm:$0xff] }
 0x1a6   : > { %v4449_v52 = vpop.eup %4448  ;;  %3487 = vst [vmem:[%s5391_s17 + $0x8a8] sm:$0xff] %v2975_v20  ;;  %v2977_v53 = vmul.f32 %v2465_v0, %v6883_v50  ;;  %v2467_v56 = vadd.f32 0.5, %v1955_v34  ;;  %v1957_v51 = vmul.f32 0.5, %v4447_v46  ;;  %4468 = vtanh.f32 %v944_v32  ;;  %v7023_v34 = vld [vmem:[%s5127_s30 + $0x970] sm:$0xff] }
 0x1a7   : > { %v4451_v61 = vpop.eup %4450  ;;  %3488 = vst [vmem:[%s5391_s17 + $0x8b0] sm:$0xff] %v2976_v15  ;;  %v2978_v9 = vmul.f32 %v2466_v25, %v6890_v33  ;;  %v2468_v57 = vadd.f32 0.5, %v1956_v10  ;;  %v1958_v44 = vmul.f32 0.5, %v4449_v52  ;;  %4470 = vtanh.f32 %v945_v21  ;;  %v7002_v21 = vld [vmem:[%s5127_s30 + $0x958] sm:$0xff] }
 0x1a8   : > { %v4453_v22 = vpop.eup %4452  ;;  %3489 = vst [vmem:[%s5391_s17 + $0x8b8] sm:$0xff] %v2977_v53  ;;  %v2979_v50 = vmul.f32 %v2467_v56, %v6893_v37  ;;  %v2469_v3 = vadd.f32 0.5, %v1957_v51  ;;  %v1959_v29 = vmul.f32 0.5, %v4451_v61  ;;  %4472 = vtanh.f32 %v946_v16  ;;  %v7031_v51 = vld [vmem:[%s5127_s30 + $0x978] sm:$0xff] }
 0x1a9   : > { %v4455_v40 = vpop.eup %4454  ;;  %3490 = vst [vmem:[%s5391_s17 + $0x8c0] sm:$0xff] %v2978_v9  ;;  %v2980_v14 = vmul.f32 %v2468_v57, %v6899_v23  ;;  %v2470_v33 = vadd.f32 0.5, %v1958_v44  ;;  %v1960_v12 = vmul.f32 0.5, %v4453_v22  ;;  %v947_v17 = vmul.f32 0.5, %v6986_v60  ;;  %v7037_v22 = vld [vmem:[%s5127_s30 + $0x980] sm:$0xff] }
 0x1aa   : > { %v4457_v32 = vpop.eup %4456  ;;  %3491 = vst [vmem:[%s5391_s17 + $0x8c8] sm:$0xff] %v2979_v50  ;;  %v2981_v8 = vmul.f32 %v2469_v3, %v6902_v36  ;;  %v2471_v37 = vadd.f32 0.5, %v1959_v29  ;;  %v1961_v31 = vmul.f32 0.5, %v4455_v40  ;;  %v948_v7 = vmul.f32 0.5, %v6991_v5  ;;  %v7045_v40 = vld [vmem:[%s5127_s30 + $0x990] sm:$0xff] }
 0x1ab   : > { %v4459_v38 = vpop.eup %4458  ;;  %3492 = vst [vmem:[%s5391_s17 + $0x8d0] sm:$0xff] %v2980_v14  ;;  %v2982_v23 = vmul.f32 %v2470_v33, %v6908_v41  ;;  %v2472_v11 = vadd.f32 0.5, %v1960_v12  ;;  %v1962_v59 = vmul.f32 0.5, %v4457_v32  ;;  %4474 = vtanh.f32 %v947_v17  ;;  %v7051_v12 = vld [vmem:[%s5127_s30 + $0x998] sm:$0xff] }
 0x1ac   : > { %v4461_v2 = vpop.eup %4460  ;;  %3493 = vst [vmem:[%s5391_s17 + $0x8d8] sm:$0xff] %v2981_v8  ;;  %v2983_v36 = vmul.f32 %v2471_v37, %v6914_v63  ;;  %v2473_v1 = vadd.f32 0.5, %v1961_v31  ;;  %v1963_v13 = vmul.f32 0.5, %v4459_v38  ;;  %4476 = vtanh.f32 %v948_v7  ;;  %v7061_v31 = vld [vmem:[%s5127_s30 + $0x9a8] sm:$0xff] }
 0x1ad   : > { %v4463_v16 = vpop.eup %4462  ;;  %3494 = vst [vmem:[%s5391_s17 + $0x8e0] sm:$0xff] %v2982_v23  ;;  %v2984_v39 = vmul.f32 %v2472_v11, %v6920_v27  ;;  %v2474_v41 = vadd.f32 0.5, %v1962_v59  ;;  %v1964_v6 = vmul.f32 0.5, %v4461_v2  ;;  %v949_v18 = vmul.f32 0.5, %v7002_v21  ;;  %v7067_v11 = vld [vmem:[%s5127_s30 + $0x9b0] sm:$0xff]  ;;  %v7070_v59 = vld [vmem:[%s5127_s30 + $0x9b8] sm:$0xff] }
 0x1ae   : > { %v4465_v54 = vpop.eup %4464  ;;  %3495 = vst [vmem:[%s5391_s17 + $0x8e8] sm:$0xff] %v2983_v36  ;;  %v2985_v43 = vmul.f32 %v2473_v1, %v6923_v26  ;;  %v2475_v63 = vadd.f32 0.5, %v1963_v13  ;;  %v1965_v48 = vmul.f32 0.5, %v4463_v16  ;;  %v950_v24 = vmul.f32 0.5, %v7007_v58 }
 0x1af   : > { %v4467_v35 = vpop.eup %4466  ;;  %3496 = vst [vmem:[%s5391_s17 + $0x8f0] sm:$0xff] %v2984_v39  ;;  %v2986_v27 = vmul.f32 %v2474_v41, %v6928_v47  ;;  %v2476_v20 = vadd.f32 0.5, %v1964_v6  ;;  %v1966_v0 = vmul.f32 0.5, %v4465_v54  ;;  %4478 = vtanh.f32 %v949_v18  ;;  %v7082_v41 = vld [vmem:[%s5127_s30 + $0x9c8] sm:$0xff] }
 0x1b0   : > { %v4469_v46 = vpop.eup %4468  ;;  %3497 = vst [vmem:[%s5391_s17 + $0x8f8] sm:$0xff] %v2985_v43  ;;  %v2987_v26 = vmul.f32 %v2475_v63, %v6931_v42  ;;  %v2477_v15 = vadd.f32 0.5, %v1965_v48  ;;  %v1967_v25 = vmul.f32 0.5, %v4467_v35  ;;  %4480 = vtanh.f32 %v950_v24  ;;  %v7088_v43 = vld [vmem:[%s5127_s30 + $0x9d0] sm:$0xff]  ;;  %v7091_v63 = vld [vmem:[%s5127_s30 + $0x9d8] sm:$0xff] }
 0x1b1   : > { %v4471_v10 = vpop.eup %4470  ;;  %3498 = vst [vmem:[%s5391_s17 + $0x900] sm:$0xff] %v2986_v27  ;;  %v2988_v47 = vmul.f32 %v2476_v20, %v6936_v62  ;;  %v2478_v52 = vadd.f32 0.5, %v1966_v0  ;;  %v1968_v53 = vmul.f32 0.5, %v4469_v46  ;;  %v951_v56 = vmul.f32 0.5, %v7018_v4  ;;  %v7040_v62 = vld [vmem:[%s5127_s30 + $0x988] sm:$0xff]  ;;  %v7096_v20 = vld [vmem:[%s5127_s30 + $0x9e0] sm:$0xff] }
 0x1b2   : > { %v4473_v61 = vpop.eup %4472  ;;  %3499 = vst [vmem:[%s5391_s17 + $0x908] sm:$0xff] %v2987_v26  ;;  %v2989_v42 = vmul.f32 %v2477_v15, %v6942_v55  ;;  %v2479_v9 = vadd.f32 0.5, %v1967_v25  ;;  %v1969_v57 = vmul.f32 0.5, %v4471_v10  ;;  %v952_v44 = vmul.f32 0.5, %v7023_v34  ;;  %v7099_v0 = vld [vmem:[%s5127_s30 + $0x9e8] sm:$0xff]  ;;  %v7104_v25 = vld [vmem:[%s5127_s30 + $0x9f0] sm:$0xff] }
 0x1b3   : > { %3500 = vst [vmem:[%s5391_s17 + $0x910] sm:$0xff] %v2988_v47  ;;  %v2990_v50 = vmul.f32 %v2478_v52, %v6948_v49  ;;  %v2480_v3 = vadd.f32 0.5, %v1968_v53  ;;  %v1970_v29 = vmul.f32 0.5, %v4473_v61  ;;  %4482 = vtanh.f32 %v951_v56  ;;  %v7110_v52 = vld [vmem:[%s5127_s30 + $0x9f8] sm:$0xff] }
 0x1b4   : > { %3501 = vst [vmem:[%s5391_s17 + $0x918] sm:$0xff] %v2989_v42  ;;  %v2991_v55 = vmul.f32 %v2479_v9, %v6951_v19  ;;  %v2481_v14 = vadd.f32 0.5, %v1969_v57  ;;  %4484 = vtanh.f32 %v952_v44  ;;  %v953_v33 = vmul.f32 0.5, %v7031_v51  ;;  %v7058_v19 = vld [vmem:[%s5127_s30 + $0x9a0] sm:$0xff]  ;;  %v7119_v9 = vld [vmem:[%s5127_s30 + $0xa08] sm:$0xff] }
 0x1b5   : > { %v4475_v49 = vpop.eup %4474  ;;  %3502 = vst [vmem:[%s5391_s17 + $0x920] sm:$0xff] %v2990_v50  ;;  %v2992_v17 = vmul.f32 %v2480_v3, %v6956_v45  ;;  %v2482_v32 = vadd.f32 0.5, %v1970_v29  ;;  %v954_v8 = vmul.f32 0.5, %v7037_v22  ;;  %v955_v37 = vmul.f32 0.5, %v7040_v62  ;;  %v7116_v42 = vld [vmem:[%s5127_s30 + $0xa00] sm:$0xff]  ;;  %v7124_v29 = vld [vmem:[%s5127_s30 + $0xa10] sm:$0xff] }
 0x1b6   : > { %v4477_v7 = vpop.eup %4476  ;;  %3503 = vst [vmem:[%s5391_s17 + $0x928] sm:$0xff] %v2991_v55  ;;  %v2993_v38 = vmul.f32 %v2481_v14, %v6961_v28  ;;  %v1971_v23 = vmul.f32 0.5, %v4475_v49  ;;  %4486 = vtanh.f32 %v953_v33  ;;  %v956_v45 = vmul.f32 0.5, %v7045_v40  ;;  %v7076_v28 = vld [vmem:[%s5127_s30 + $0x9c0] sm:$0xff]  ;;  %v7129_v49 = vld [vmem:[%s5127_s30 + $0xa18] sm:$0xff] }
 0x1b7   : > { %3504 = vst [vmem:[%s5391_s17 + $0x930] sm:$0xff] %v2992_v17  ;;  %v2994_v2 = vmul.f32 %v2482_v32, %v6969_v30  ;;  %v1972_v36 = vmul.f32 0.5, %v4477_v7  ;;  %4488 = vtanh.f32 %v954_v8  ;;  %v957_v1 = vmul.f32 0.5, %v7051_v12 }
 0x1b8   : > { %3505 = vst [vmem:[%s5391_s17 + $0x938] sm:$0xff] %v2993_v38  ;;  %v2483_v13 = vadd.f32 0.5, %v1971_v23  ;;  %4490 = vtanh.f32 %v955_v37  ;;  %v958_v16 = vmul.f32 0.5, %v7058_v19  ;;  %v959_v39 = vmul.f32 0.5, %v7061_v31  ;;  %v7137_v23 = vld [vmem:[%s5127_s30 + $0xa20] sm:$0xff] }
 0x1b9   : > { %v4479_v30 = vpop.eup %4478  ;;  %3506 = vst [vmem:[%s5391_s17 + $0x940] sm:$0xff] %v2994_v2  ;;  %v2484_v6 = vadd.f32 0.5, %v1972_v36  ;;  %4492 = vtanh.f32 %v956_v45  ;;  %v960_v18 = vmul.f32 0.5, %v7067_v11  ;;  %v961_v54 = vmul.f32 0.5, %v7070_v59 }
 0x1ba   : > { %v4481_v48 = vpop.eup %4480  ;;  %v2995_v24 = vmul.f32 %v2483_v13, %v6986_v60  ;;  %v1973_v35 = vmul.f32 0.5, %v4479_v30  ;;  %4494 = vtanh.f32 %v957_v1  ;;  %v962_v27 = vmul.f32 0.5, %v7076_v28 }
 0x1bb   : > { %v2996_v46 = vmul.f32 %v2484_v6, %v6991_v5  ;;  %v1974_v26 = vmul.f32 0.5, %v4481_v48  ;;  %4496 = vtanh.f32 %v958_v16  ;;  %v963_v15 = vmul.f32 0.5, %v7082_v41 }
 0x1bc   : > { %3507 = vst [vmem:[%s5391_s17 + $0x948] sm:$0xff] %v2995_v24  ;;  %v2485_v60 = vadd.f32 0.5, %v1973_v35  ;;  %4498 = vtanh.f32 %v959_v39  ;;  %v964_v10 = vmul.f32 0.5, %v7088_v43  ;;  %v965_v47 = vmul.f32 0.5, %v7091_v63 }
 0x1bd   : > { %v4483_v53 = vpop.eup %4482  ;;  %3508 = vst [vmem:[%s5391_s17 + $0x950] sm:$0xff] %v2996_v46  ;;  %v2486_v5 = vadd.f32 0.5, %v1974_v26  ;;  %4500 = vtanh.f32 %v960_v18  ;;  %v966_v56 = vmul.f32 0.5, %v7096_v20  ;;  %v967_v61 = vmul.f32 0.5, %v7099_v0 }
 0x1be   : > { %v4485_v57 = vpop.eup %4484  ;;  %v2997_v44 = vmul.f32 %v2485_v60, %v7002_v21  ;;  %v1975_v50 = vmul.f32 0.5, %v4483_v53  ;;  %4502 = vtanh.f32 %v961_v54  ;;  %v968_v3 = vmul.f32 0.5, %v7104_v25 }
 0x1bf   : > { %v2998_v55 = vmul.f32 %v2486_v5, %v7007_v58  ;;  %v1976_v14 = vmul.f32 0.5, %v4485_v57  ;;  %4504 = vtanh.f32 %v962_v27  ;;  %v969_v33 = vmul.f32 0.5, %v7110_v52 }
 0x1c0   : > { %v4487_v17 = vpop.eup %4486  ;;  %3509 = vst [vmem:[%s5391_s17 + $0x958] sm:$0xff] %v2997_v44  ;;  %v2487_v32 = vadd.f32 0.5, %v1975_v50  ;;  %4506 = vtanh.f32 %v963_v15  ;;  %v970_v21 = vmul.f32 0.5, %v7116_v42  ;;  %v971_v8 = vmul.f32 0.5, %v7119_v9  ;;  %v7154_v50 = vld [vmem:[%s5127_s30 + $0xa28] sm:$0xff] }
 0x1c1   : > { %v4489_v37 = vpop.eup %4488  ;;  %3510 = vst [vmem:[%s5391_s17 + $0x960] sm:$0xff] %v2998_v55  ;;  %v2488_v7 = vadd.f32 0.5, %v1976_v14  ;;  %v1977_v58 = vmul.f32 0.5, %v4487_v17  ;;  %4508 = vtanh.f32 %v964_v10  ;;  %v972_v38 = vmul.f32 0.5, %v7124_v29 }
 0x1c2   : > { %v4491_v45 = vpop.eup %4490  ;;  %v2999_v2 = vmul.f32 %v2487_v32, %v7018_v4  ;;  %v1978_v36 = vmul.f32 0.5, %v4489_v37  ;;  %4510 = vtanh.f32 %v965_v47  ;;  %v973_v1 = vmul.f32 0.5, %v7129_v49 }
 0x1c3   : > { %v4493_v13 = vpop.eup %4492  ;;  %v3000_v16 = vmul.f32 %v2488_v7, %v7023_v34  ;;  %v2489_v39 = vadd.f32 0.5, %v1977_v58  ;;  %v1979_v30 = vmul.f32 0.5, %v4491_v45  ;;  %4512 = vtanh.f32 %v966_v56 }
 0x1c4   : > { %v4495_v6 = vpop.eup %4494  ;;  %3511 = vst [vmem:[%s5391_s17 + $0x968] sm:$0xff] %v2999_v2  ;;  %v2490_v18 = vadd.f32 0.5, %v1978_v36  ;;  %v1980_v54 = vmul.f32 0.5, %v4493_v13  ;;  %4514 = vtanh.f32 %v967_v61  ;;  %v974_v48 = vmul.f32 0.5, %v7137_v23 }
 0x1c5   : > { %v4497_v4 = vpop.eup %4496  ;;  %3512 = vst [vmem:[%s5391_s17 + $0x970] sm:$0xff] %v3000_v16  ;;  %v3001_v24 = vmul.f32 %v2489_v39, %v7031_v51  ;;  %v2491_v35 = vadd.f32 0.5, %v1979_v30  ;;  %v1981_v27 = vmul.f32 0.5, %v4495_v6  ;;  %4516 = vtanh.f32 %v968_v3  ;;  %v7175_v30 = vld [vmem:[%s5127_s30 + $0xa40] sm:$0xff] }
 0x1c6   : > { %v4499_v34 = vpop.eup %4498  ;;  %v3002_v46 = vmul.f32 %v2490_v18, %v7037_v22  ;;  %v2492_v26 = vadd.f32 0.5, %v1980_v54  ;;  %v1982_v15 = vmul.f32 0.5, %v4497_v4  ;;  %4518 = vtanh.f32 %v969_v33  ;;  %v7159_v33 = vld [vmem:[%s5127_s30 + $0xa30] sm:$0xff] }
 0x1c7   : > { %v4501_v60 = vpop.eup %4500  ;;  %3513 = vst [vmem:[%s5391_s17 + $0x978] sm:$0xff] %v3001_v24  ;;  %v3003_v10 = vmul.f32 %v2491_v35, %v7040_v62  ;;  %v2493_v47 = vadd.f32 0.5, %v1981_v27  ;;  %v1983_v53 = vmul.f32 0.5, %v4499_v34  ;;  %4520 = vtanh.f32 %v970_v21 }
 0x1c8   : > { %v4503_v51 = vpop.eup %4502  ;;  %3514 = vst [vmem:[%s5391_s17 + $0x980] sm:$0xff] %v3002_v46  ;;  %v3004_v5 = vmul.f32 %v2492_v26, %v7045_v40  ;;  %v2494_v56 = vadd.f32 0.5, %v1982_v15  ;;  %v1984_v22 = vmul.f32 0.5, %v4501_v60  ;;  %4522 = vtanh.f32 %v971_v8  ;;  %v7186_v15 = vld [vmem:[%s5127_s30 + $0xa48] sm:$0xff] }
 0x1c9   : > { %v4505_v61 = vpop.eup %4504  ;;  %3515 = vst [vmem:[%s5391_s17 + $0x988] sm:$0xff] %v3003_v10  ;;  %v3005_v57 = vmul.f32 %v2493_v47, %v7051_v12  ;;  %v2495_v44 = vadd.f32 0.5, %v1983_v53  ;;  %v1985_v62 = vmul.f32 0.5, %v4503_v51  ;;  %4524 = vtanh.f32 %v972_v38  ;;  %v7191_v53 = vld [vmem:[%s5127_s30 + $0xa50] sm:$0xff] }
 0x1ca   : > { %v4507_v3 = vpop.eup %4506  ;;  %3516 = vst [vmem:[%s5391_s17 + $0x990] sm:$0xff] %v3004_v5  ;;  %v3006_v55 = vmul.f32 %v2494_v56, %v7058_v19  ;;  %v2496_v40 = vadd.f32 0.5, %v1984_v22  ;;  %v1986_v14 = vmul.f32 0.5, %v4505_v61  ;;  %4526 = vtanh.f32 %v973_v1  ;;  %v7170_v1 = vld [vmem:[%s5127_s30 + $0xa38] sm:$0xff] }
 0x1cb   : > { %v4509_v17 = vpop.eup %4508  ;;  %3517 = vst [vmem:[%s5391_s17 + $0x998] sm:$0xff] %v3005_v57  ;;  %v3007_v12 = vmul.f32 %v2495_v44, %v7061_v31  ;;  %v2497_v32 = vadd.f32 0.5, %v1985_v62  ;;  %v1987_v21 = vmul.f32 0.5, %v4507_v3  ;;  %4528 = vtanh.f32 %v974_v48  ;;  %v7199_v62 = vld [vmem:[%s5127_s30 + $0xa58] sm:$0xff] }
 0x1cc   : > { %v4511_v8 = vpop.eup %4510  ;;  %3518 = vst [vmem:[%s5391_s17 + $0x9a0] sm:$0xff] %v3006_v55  ;;  %v3008_v37 = vmul.f32 %v2496_v40, %v7067_v11  ;;  %v2498_v19 = vadd.f32 0.5, %v1986_v14  ;;  %v1988_v7 = vmul.f32 0.5, %v4509_v17  ;;  %v975_v58 = vmul.f32 0.5, %v7154_v50  ;;  %v7205_v17 = vld [vmem:[%s5127_s30 + $0xa60] sm:$0xff] }
 0x1cd   : > { %v4513_v38 = vpop.eup %4512  ;;  %3519 = vst [vmem:[%s5391_s17 + $0x9a8] sm:$0xff] %v3007_v12  ;;  %v3009_v45 = vmul.f32 %v2497_v32, %v7070_v59  ;;  %v2499_v31 = vadd.f32 0.5, %v1987_v21  ;;  %v1989_v2 = vmul.f32 0.5, %v4511_v8  ;;  %v976_v36 = vmul.f32 0.5, %v7159_v33  ;;  %v7213_v8 = vld [vmem:[%s5127_s30 + $0xa70] sm:$0xff] }
 0x1ce   : > { %v4515_v13 = vpop.eup %4514  ;;  %3520 = vst [vmem:[%s5391_s17 + $0x9b0] sm:$0xff] %v3008_v37  ;;  %v3010_v11 = vmul.f32 %v2498_v19, %v7076_v28  ;;  %v2500_v16 = vadd.f32 0.5, %v1988_v7  ;;  %v1990_v39 = vmul.f32 0.5, %v4513_v38  ;;  %4530 = vtanh.f32 %v975_v58  ;;  %v7219_v7 = vld [vmem:[%s5127_s30 + $0xa78] sm:$0xff] }
 0x1cf   : > { %v4517_v6 = vpop.eup %4516  ;;  %3521 = vst [vmem:[%s5391_s17 + $0x9b8] sm:$0xff] %v3009_v45  ;;  %v3011_v59 = vmul.f32 %v2499_v31, %v7082_v41  ;;  %v2501_v18 = vadd.f32 0.5, %v1989_v2  ;;  %v1991_v54 = vmul.f32 0.5, %v4515_v13  ;;  %4532 = vtanh.f32 %v976_v36  ;;  %v7229_v2 = vld [vmem:[%s5127_s30 + $0xa88] sm:$0xff] }
 0x1d0   : > { %v4519_v48 = vpop.eup %4518  ;;  %3522 = vst [vmem:[%s5391_s17 + $0x9c0] sm:$0xff] %v3010_v11  ;;  %v3012_v4 = vmul.f32 %v2500_v16, %v7088_v43  ;;  %v2502_v28 = vadd.f32 0.5, %v1990_v39  ;;  %v1992_v24 = vmul.f32 0.5, %v4517_v6  ;;  %v977_v35 = vmul.f32 0.5, %v7170_v1  ;;  %v7235_v16 = vld [vmem:[%s5127_s30 + $0xa90] sm:$0xff]  ;;  %v7238_v39 = vld [vmem:[%s5127_s30 + $0xa98] sm:$0xff] }
 0x1d1   : > { %v4521_v27 = vpop.eup %4520  ;;  %3523 = vst [vmem:[%s5391_s17 + $0x9c8] sm:$0xff] %v3011_v59  ;;  %v3013_v34 = vmul.f32 %v2501_v18, %v7091_v63  ;;  %v2503_v41 = vadd.f32 0.5, %v1991_v54  ;;  %v1993_v46 = vmul.f32 0.5, %v4519_v48  ;;  %v978_v26 = vmul.f32 0.5, %v7175_v30 }
 0x1d2   : > { %v4523_v60 = vpop.eup %4522  ;;  %3524 = vst [vmem:[%s5391_s17 + $0x9d0] sm:$0xff] %v3012_v4  ;;  %v3014_v43 = vmul.f32 %v2502_v28, %v7096_v20  ;;  %v2504_v10 = vadd.f32 0.5, %v1992_v24  ;;  %v1994_v47 = vmul.f32 0.5, %v4521_v27  ;;  %4534 = vtanh.f32 %v977_v35  ;;  %v7250_v28 = vld [vmem:[%s5127_s30 + $0xaa8] sm:$0xff] }
 0x1d3   : > { %v4525_v51 = vpop.eup %4524  ;;  %3525 = vst [vmem:[%s5391_s17 + $0x9d8] sm:$0xff] %v3013_v34  ;;  %v3015_v63 = vmul.f32 %v2503_v41, %v7099_v0  ;;  %v2505_v5 = vadd.f32 0.5, %v1993_v46  ;;  %v1995_v56 = vmul.f32 0.5, %v4523_v60  ;;  %4536 = vtanh.f32 %v978_v26  ;;  %v7256_v34 = vld [vmem:[%s5127_s30 + $0xab0] sm:$0xff]  ;;  %v7259_v41 = vld [vmem:[%s5127_s30 + $0xab8] sm:$0xff] }
 0x1d4   : > { %v4527_v22 = vpop.eup %4526  ;;  %3526 = vst [vmem:[%s5391_s17 + $0x9e0] sm:$0xff] %v3014_v43  ;;  %v3016_v20 = vmul.f32 %v2504_v10, %v7104_v25  ;;  %v2506_v61 = vadd.f32 0.5, %v1994_v47  ;;  %v1996_v57 = vmul.f32 0.5, %v4525_v51  ;;  %v979_v44 = vmul.f32 0.5, %v7186_v15  ;;  %v7208_v25 = vld [vmem:[%s5127_s30 + $0xa68] sm:$0xff]  ;;  %v7264_v10 = vld [vmem:[%s5127_s30 + $0xac0] sm:$0xff] }
 0x1d5   : > { %v4529_v3 = vpop.eup %4528  ;;  %3527 = vst [vmem:[%s5391_s17 + $0x9e8] sm:$0xff] %v3015_v63  ;;  %v3017_v0 = vmul.f32 %v2505_v5, %v7110_v52  ;;  %v2507_v55 = vadd.f32 0.5, %v1995_v56  ;;  %v1997_v40 = vmul.f32 0.5, %v4527_v22  ;;  %v980_v14 = vmul.f32 0.5, %v7191_v53  ;;  %v7267_v47 = vld [vmem:[%s5127_s30 + $0xac8] sm:$0xff]  ;;  %v7272_v56 = vld [vmem:[%s5127_s30 + $0xad0] sm:$0xff] }
 0x1d6   : > { %3528 = vst [vmem:[%s5391_s17 + $0x9f0] sm:$0xff] %v3016_v20  ;;  %v3018_v12 = vmul.f32 %v2506_v61, %v7116_v42  ;;  %v2508_v32 = vadd.f32 0.5, %v1996_v57  ;;  %v1998_v21 = vmul.f32 0.5, %v4529_v3  ;;  %4538 = vtanh.f32 %v979_v44  ;;  %v7278_v61 = vld [vmem:[%s5127_s30 + $0xad8] sm:$0xff] }
 0x1d7   : > { %3529 = vst [vmem:[%s5391_s17 + $0x9f8] sm:$0xff] %v3017_v0  ;;  %v3019_v52 = vmul.f32 %v2507_v55, %v7119_v9  ;;  %v2509_v37 = vadd.f32 0.5, %v1997_v40  ;;  %4540 = vtanh.f32 %v980_v14  ;;  %v981_v19 = vmul.f32 0.5, %v7199_v62  ;;  %v7226_v9 = vld [vmem:[%s5127_s30 + $0xa80] sm:$0xff]  ;;  %v7287_v55 = vld [vmem:[%s5127_s30 + $0xae8] sm:$0xff] }
 0x1d8   : > { %v4531_v42 = vpop.eup %4530  ;;  %3530 = vst [vmem:[%s5391_s17 + $0xa00] sm:$0xff] %v3018_v12  ;;  %v3020_v58 = vmul.f32 %v2508_v32, %v7124_v29  ;;  %v2510_v38 = vadd.f32 0.5, %v1998_v21  ;;  %v982_v45 = vmul.f32 0.5, %v7205_v17  ;;  %v983_v31 = vmul.f32 0.5, %v7208_v25  ;;  %v7284_v0 = vld [vmem:[%s5127_s30 + $0xae0] sm:$0xff]  ;;  %v7292_v21 = vld [vmem:[%s5127_s30 + $0xaf0] sm:$0xff] }
 0x1d9   : > { %v4533_v36 = vpop.eup %4532  ;;  %3531 = vst [vmem:[%s5391_s17 + $0xa08] sm:$0xff] %v3019_v52  ;;  %v3021_v13 = vmul.f32 %v2509_v37, %v7129_v49  ;;  %v1999_v11 = vmul.f32 0.5, %v4531_v42  ;;  %4542 = vtanh.f32 %v981_v19  ;;  %v984_v29 = vmul.f32 0.5, %v7213_v8  ;;  %v7244_v49 = vld [vmem:[%s5127_s30 + $0xaa0] sm:$0xff]  ;;  %v7297_v42 = vld [vmem:[%s5127_s30 + $0xaf8] sm:$0xff] }
 0x1da   : > { %3532 = vst [vmem:[%s5391_s17 + $0xa10] sm:$0xff] %v3020_v58  ;;  %v3022_v6 = vmul.f32 %v2510_v38, %v7137_v23  ;;  %v2000_v59 = vmul.f32 0.5, %v4533_v36  ;;  %4544 = vtanh.f32 %v982_v45  ;;  %v985_v18 = vmul.f32 0.5, %v7219_v7 }
 0x1db   : > { %3533 = vst [vmem:[%s5391_s17 + $0xa18] sm:$0xff] %v3021_v13  ;;  %v2511_v54 = vadd.f32 0.5, %v1999_v11  ;;  %4546 = vtanh.f32 %v983_v31  ;;  %v986_v48 = vmul.f32 0.5, %v7226_v9  ;;  %v987_v4 = vmul.f32 0.5, %v7229_v2  ;;  %v7305_v11 = vld [vmem:[%s5127_s30 + $0xb00] sm:$0xff] }
 0x1dc   : > { %v4535_v23 = vpop.eup %4534  ;;  %3534 = vst [vmem:[%s5391_s17 + $0xa20] sm:$0xff] %v3022_v6  ;;  %v2512_v24 = vadd.f32 0.5, %v2000_v59  ;;  %4548 = vtanh.f32 %v984_v29  ;;  %v988_v35 = vmul.f32 0.5, %v7235_v16  ;;  %v989_v27 = vmul.f32 0.5, %v7238_v39 }
 0x1dd   : > { %v4537_v46 = vpop.eup %4536  ;;  %v3023_v26 = vmul.f32 %v2511_v54, %v7154_v50  ;;  %v2001_v60 = vmul.f32 0.5, %v4535_v23  ;;  %4550 = vtanh.f32 %v985_v18  ;;  %v990_v43 = vmul.f32 0.5, %v7244_v49 }
 0x1de   : > { %v3024_v51 = vmul.f32 %v2512_v24, %v7159_v33  ;;  %v2002_v63 = vmul.f32 0.5, %v4537_v46  ;;  %4552 = vtanh.f32 %v986_v48  ;;  %v991_v5 = vmul.f32 0.5, %v7250_v28 }
 0x1df   : > { %3535 = vst [vmem:[%s5391_s17 + $0xa28] sm:$0xff] %v3023_v26  ;;  %v2513_v50 = vadd.f32 0.5, %v2001_v60  ;;  %4554 = vtanh.f32 %v987_v4  ;;  %v992_v22 = vmul.f32 0.5, %v7256_v34  ;;  %v993_v20 = vmul.f32 0.5, %v7259_v41 }
 0x1e0   : > { %v4539_v57 = vpop.eup %4538  ;;  %3536 = vst [vmem:[%s5391_s17 + $0xa30] sm:$0xff] %v3024_v51  ;;  %v2514_v33 = vadd.f32 0.5, %v2002_v63  ;;  %4556 = vtanh.f32 %v988_v35  ;;  %v994_v44 = vmul.f32 0.5, %v7264_v10  ;;  %v995_v3 = vmul.f32 0.5, %v7267_v47 }
 0x1e1   : > { %v4541_v40 = vpop.eup %4540  ;;  %v3025_v14 = vmul.f32 %v2513_v50, %v7170_v1  ;;  %v2003_v12 = vmul.f32 0.5, %v4539_v57  ;;  %4558 = vtanh.f32 %v989_v27  ;;  %v996_v32 = vmul.f32 0.5, %v7272_v56 }
 0x1e2   : > { %v3026_v52 = vmul.f32 %v2514_v33, %v7175_v30  ;;  %v2004_v37 = vmul.f32 0.5, %v4541_v40  ;;  %4560 = vtanh.f32 %v990_v43  ;;  %v997_v19 = vmul.f32 0.5, %v7278_v61 }
 0x1e3   : > { %v4543_v58 = vpop.eup %4542  ;;  %3537 = vst [vmem:[%s5391_s17 + $0xa38] sm:$0xff] %v3025_v14  ;;  %v2515_v38 = vadd.f32 0.5, %v2003_v12  ;;  %4562 = vtanh.f32 %v991_v5  ;;  %v998_v1 = vmul.f32 0.5, %v7284_v0  ;;  %v999_v45 = vmul.f32 0.5, %v7287_v55  ;;  %v7322_v12 = vld [vmem:[%s5127_s30 + $0xb08] sm:$0xff] }
 0x1e4   : > { %v4545_v31 = vpop.eup %4544  ;;  %3538 = vst [vmem:[%s5391_s17 + $0xa40] sm:$0xff] %v3026_v52  ;;  %v2516_v36 = vadd.f32 0.5, %v2004_v37  ;;  %v2005_v30 = vmul.f32 0.5, %v4543_v58  ;;  %4564 = vtanh.f32 %v992_v22  ;;  %v1000_v13 = vmul.f32 0.5, %v7292_v21 }
 0x1e5   : > { %v4547_v29 = vpop.eup %4546  ;;  %v3027_v6 = vmul.f32 %v2515_v38, %v7186_v15  ;;  %v2006_v59 = vmul.f32 0.5, %v4545_v31  ;;  %4566 = vtanh.f32 %v993_v20  ;;  %v1001_v18 = vmul.f32 0.5, %v7297_v42 }
 0x1e6   : > { %v4549_v54 = vpop.eup %4548  ;;  %v3028_v48 = vmul.f32 %v2516_v36, %v7191_v53  ;;  %v2517_v4 = vadd.f32 0.5, %v2005_v30  ;;  %v2007_v23 = vmul.f32 0.5, %v4547_v29  ;;  %4568 = vtanh.f32 %v994_v44 }
 0x1e7   : > { %v4551_v24 = vpop.eup %4550  ;;  %3539 = vst [vmem:[%s5391_s17 + $0xa48] sm:$0xff] %v3027_v6  ;;  %v2518_v35 = vadd.f32 0.5, %v2006_v59  ;;  %v2008_v27 = vmul.f32 0.5, %v4549_v54  ;;  %4570 = vtanh.f32 %v995_v3  ;;  %v1002_v46 = vmul.f32 0.5, %v7305_v11 }
 0x1e8   : > { %v4553_v15 = vpop.eup %4552  ;;  %3540 = vst [vmem:[%s5391_s17 + $0xa50] sm:$0xff] %v3028_v48  ;;  %v3029_v26 = vmul.f32 %v2517_v4, %v7199_v62  ;;  %v2519_v60 = vadd.f32 0.5, %v2007_v23  ;;  %v2009_v43 = vmul.f32 0.5, %v4551_v24  ;;  %4572 = vtanh.f32 %v996_v32  ;;  %v7343_v23 = vld [vmem:[%s5127_s30 + $0xb20] sm:$0xff] }
 0x1e9   : > { %v4555_v53 = vpop.eup %4554  ;;  %v3030_v51 = vmul.f32 %v2518_v35, %v7205_v17  ;;  %v2520_v63 = vadd.f32 0.5, %v2008_v27  ;;  %v2010_v5 = vmul.f32 0.5, %v4553_v15  ;;  %4574 = vtanh.f32 %v997_v19  ;;  %v7327_v19 = vld [vmem:[%s5127_s30 + $0xb10] sm:$0xff] }
 0x1ea   : > { %v4557_v50 = vpop.eup %4556  ;;  %3541 = vst [vmem:[%s5391_s17 + $0xa58] sm:$0xff] %v3029_v26  ;;  %v3031_v22 = vmul.f32 %v2519_v60, %v7208_v25  ;;  %v2521_v20 = vadd.f32 0.5, %v2009_v43  ;;  %v2011_v57 = vmul.f32 0.5, %v4555_v53  ;;  %4576 = vtanh.f32 %v998_v1 }
 0x1eb   : > { %v4559_v62 = vpop.eup %4558  ;;  %3542 = vst [vmem:[%s5391_s17 + $0xa60] sm:$0xff] %v3030_v51  ;;  %v3032_v33 = vmul.f32 %v2520_v63, %v7213_v8  ;;  %v2522_v44 = vadd.f32 0.5, %v2010_v5  ;;  %v2012_v17 = vmul.f32 0.5, %v4557_v50  ;;  %4578 = vtanh.f32 %v999_v45  ;;  %v7354_v5 = vld [vmem:[%s5127_s30 + $0xb28] sm:$0xff] }
 0x1ec   : > { %v4561_v3 = vpop.eup %4560  ;;  %3543 = vst [vmem:[%s5391_s17 + $0xa68] sm:$0xff] %v3031_v22  ;;  %v3033_v40 = vmul.f32 %v2521_v20, %v7219_v7  ;;  %v2523_v14 = vadd.f32 0.5, %v2011_v57  ;;  %v2013_v25 = vmul.f32 0.5, %v4559_v62  ;;  %4580 = vtanh.f32 %v1000_v13  ;;  %v7359_v57 = vld [vmem:[%s5127_s30 + $0xb30] sm:$0xff] }
 0x1ed   : > { %v4563_v32 = vpop.eup %4562  ;;  %3544 = vst [vmem:[%s5391_s17 + $0xa70] sm:$0xff] %v3032_v33  ;;  %v3034_v52 = vmul.f32 %v2522_v44, %v7226_v9  ;;  %v2524_v8 = vadd.f32 0.5, %v2012_v17  ;;  %v2014_v37 = vmul.f32 0.5, %v4561_v3  ;;  %4582 = vtanh.f32 %v1001_v18  ;;  %v7338_v18 = vld [vmem:[%s5127_s30 + $0xb18] sm:$0xff] }
 0x1ee   : > { %v4565_v58 = vpop.eup %4564  ;;  %3545 = vst [vmem:[%s5391_s17 + $0xa78] sm:$0xff] %v3033_v40  ;;  %v3035_v7 = vmul.f32 %v2523_v14, %v7229_v2  ;;  %v2525_v38 = vadd.f32 0.5, %v2013_v25  ;;  %v2015_v1 = vmul.f32 0.5, %v4563_v32  ;;  %4584 = vtanh.f32 %v1002_v46  ;;  %v7367_v25 = vld [vmem:[%s5127_s30 + $0xb38] sm:$0xff] }
 0x1ef   : > { %v4567_v45 = vpop.eup %4566  ;;  %3546 = vst [vmem:[%s5391_s17 + $0xa80] sm:$0xff] %v3034_v52  ;;  %v3036_v31 = vmul.f32 %v2524_v8, %v7235_v16  ;;  %v2526_v9 = vadd.f32 0.5, %v2014_v37  ;;  %v2016_v36 = vmul.f32 0.5, %v4565_v58  ;;  %v1003_v30 = vmul.f32 0.5, %v7322_v12  ;;  %v7373_v58 = vld [vmem:[%s5127_s30 + $0xb40] sm:$0xff] }
 0x1f0   : > { %v4569_v13 = vpop.eup %4568  ;;  %3547 = vst [vmem:[%s5391_s17 + $0xa88] sm:$0xff] %v3035_v7  ;;  %v3037_v29 = vmul.f32 %v2525_v38, %v7238_v39  ;;  %v2527_v2 = vadd.f32 0.5, %v2015_v1  ;;  %v2017_v6 = vmul.f32 0.5, %v4567_v45  ;;  %v1004_v59 = vmul.f32 0.5, %v7327_v19  ;;  %v7381_v45 = vld [vmem:[%s5127_s30 + $0xb50] sm:$0xff] }
 0x1f1   : > { %v4571_v54 = vpop.eup %4570  ;;  %3548 = vst [vmem:[%s5391_s17 + $0xa90] sm:$0xff] %v3036_v31  ;;  %v3038_v16 = vmul.f32 %v2526_v9, %v7244_v49  ;;  %v2528_v48 = vadd.f32 0.5, %v2016_v36  ;;  %v2018_v4 = vmul.f32 0.5, %v4569_v13  ;;  %4586 = vtanh.f32 %v1003_v30  ;;  %v7387_v36 = vld [vmem:[%s5127_s30 + $0xb58] sm:$0xff] }
 0x1f2   : > { %v4573_v24 = vpop.eup %4572  ;;  %3549 = vst [vmem:[%s5391_s17 + $0xa98] sm:$0xff] %v3037_v29  ;;  %v3039_v39 = vmul.f32 %v2527_v2, %v7250_v28  ;;  %v2529_v35 = vadd.f32 0.5, %v2017_v6  ;;  %v2019_v27 = vmul.f32 0.5, %v4571_v54  ;;  %4588 = vtanh.f32 %v1004_v59  ;;  %v7397_v6 = vld [vmem:[%s5127_s30 + $0xb68] sm:$0xff] }
 0x1f3   : > { %v4575_v46 = vpop.eup %4574  ;;  %3550 = vst [vmem:[%s5391_s17 + $0xaa0] sm:$0xff] %v3038_v16  ;;  %v3040_v15 = vmul.f32 %v2528_v48, %v7256_v34  ;;  %v2530_v49 = vadd.f32 0.5, %v2018_v4  ;;  %v2020_v26 = vmul.f32 0.5, %v4573_v24  ;;  %v1005_v60 = vmul.f32 0.5, %v7338_v18  ;;  %v7403_v48 = vld [vmem:[%s5127_s30 + $0xb70] sm:$0xff]  ;;  %v7406_v4 = vld [vmem:[%s5127_s30 + $0xb78] sm:$0xff] }
 0x1f4   : > { %v4577_v43 = vpop.eup %4576  ;;  %3551 = vst [vmem:[%s5391_s17 + $0xaa8] sm:$0xff] %v3039_v39  ;;  %v3041_v53 = vmul.f32 %v2529_v35, %v7259_v41  ;;  %v2531_v28 = vadd.f32 0.5, %v2019_v27  ;;  %v2021_v51 = vmul.f32 0.5, %v4575_v46  ;;  %v1006_v63 = vmul.f32 0.5, %v7343_v23 }
 0x1f5   : > { %v4579_v50 = vpop.eup %4578  ;;  %3552 = vst [vmem:[%s5391_s17 + $0xab0] sm:$0xff] %v3040_v15  ;;  %v3042_v34 = vmul.f32 %v2530_v49, %v7264_v10  ;;  %v2532_v22 = vadd.f32 0.5, %v2020_v26  ;;  %v2022_v20 = vmul.f32 0.5, %v4577_v43  ;;  %4590 = vtanh.f32 %v1005_v60  ;;  %v7418_v49 = vld [vmem:[%s5127_s30 + $0xb88] sm:$0xff] }
 0x1f6   : > { %v4581_v62 = vpop.eup %4580  ;;  %3553 = vst [vmem:[%s5391_s17 + $0xab8] sm:$0xff] %v3041_v53  ;;  %v3043_v41 = vmul.f32 %v2531_v28, %v7267_v47  ;;  %v2533_v33 = vadd.f32 0.5, %v2021_v51  ;;  %v2023_v44 = vmul.f32 0.5, %v4579_v50  ;;  %4592 = vtanh.f32 %v1006_v63  ;;  %v7424_v53 = vld [vmem:[%s5127_s30 + $0xb90] sm:$0xff]  ;;  %v7427_v28 = vld [vmem:[%s5127_s30 + $0xb98] sm:$0xff] }
 0x1f7   : > { %v4583_v17 = vpop.eup %4582  ;;  %3554 = vst [vmem:[%s5391_s17 + $0xac0] sm:$0xff] %v3042_v34  ;;  %v3044_v10 = vmul.f32 %v2532_v22, %v7272_v56  ;;  %v2534_v3 = vadd.f32 0.5, %v2022_v20  ;;  %v2024_v40 = vmul.f32 0.5, %v4581_v62  ;;  %v1007_v14 = vmul.f32 0.5, %v7354_v5  ;;  %v7376_v56 = vld [vmem:[%s5127_s30 + $0xb48] sm:$0xff]  ;;  %v7432_v22 = vld [vmem:[%s5127_s30 + $0xba0] sm:$0xff] }
 0x1f8   : > { %v4585_v32 = vpop.eup %4584  ;;  %3555 = vst [vmem:[%s5391_s17 + $0xac8] sm:$0xff] %v3043_v41  ;;  %v3045_v47 = vmul.f32 %v2533_v33, %v7278_v61  ;;  %v2535_v52 = vadd.f32 0.5, %v2023_v44  ;;  %v2025_v8 = vmul.f32 0.5, %v4583_v17  ;;  %v1008_v37 = vmul.f32 0.5, %v7359_v57  ;;  %v7435_v20 = vld [vmem:[%s5127_s30 + $0xba8] sm:$0xff]  ;;  %v7440_v44 = vld [vmem:[%s5127_s30 + $0xbb0] sm:$0xff] }
 0x1f9   : > { %3556 = vst [vmem:[%s5391_s17 + $0xad0] sm:$0xff] %v3044_v10  ;;  %v3046_v7 = vmul.f32 %v2534_v3, %v7284_v0  ;;  %v2536_v38 = vadd.f32 0.5, %v2024_v40  ;;  %v2026_v1 = vmul.f32 0.5, %v4585_v32  ;;  %4594 = vtanh.f32 %v1007_v14  ;;  %v7446_v3 = vld [vmem:[%s5127_s30 + $0xbb8] sm:$0xff] }
 0x1fa   : > { %3557 = vst [vmem:[%s5391_s17 + $0xad8] sm:$0xff] %v3045_v47  ;;  %v3047_v61 = vmul.f32 %v2535_v52, %v7287_v55  ;;  %v2537_v31 = vadd.f32 0.5, %v2025_v8  ;;  %4596 = vtanh.f32 %v1008_v37  ;;  %v1009_v9 = vmul.f32 0.5, %v7367_v25  ;;  %v7394_v55 = vld [vmem:[%s5127_s30 + $0xb60] sm:$0xff]  ;;  %v7455_v52 = vld [vmem:[%s5127_s30 + $0xbc8] sm:$0xff] }
 0x1fb   : > { %v4587_v0 = vpop.eup %4586  ;;  %3558 = vst [vmem:[%s5391_s17 + $0xae0] sm:$0xff] %v3046_v7  ;;  %v3048_v30 = vmul.f32 %v2536_v38, %v7292_v21  ;;  %v2538_v13 = vadd.f32 0.5, %v2026_v1  ;;  %v1010_v29 = vmul.f32 0.5, %v7373_v58  ;;  %v1011_v2 = vmul.f32 0.5, %v7376_v56  ;;  %v7452_v47 = vld [vmem:[%s5127_s30 + $0xbc0] sm:$0xff]  ;;  %v7460_v1 = vld [vmem:[%s5127_s30 + $0xbd0] sm:$0xff] }
 0x1fc   : > { %v4589_v59 = vpop.eup %4588  ;;  %3559 = vst [vmem:[%s5391_s17 + $0xae8] sm:$0xff] %v3047_v61  ;;  %v3049_v54 = vmul.f32 %v2537_v31, %v7297_v42  ;;  %v2027_v16 = vmul.f32 0.5, %v4587_v0  ;;  %4598 = vtanh.f32 %v1009_v9  ;;  %v1012_v21 = vmul.f32 0.5, %v7381_v45  ;;  %v7412_v42 = vld [vmem:[%s5127_s30 + $0xb80] sm:$0xff]  ;;  %v7465_v0 = vld [vmem:[%s5127_s30 + $0xbd8] sm:$0xff] }
 0x1fd   : > { %3560 = vst [vmem:[%s5391_s17 + $0xaf0] sm:$0xff] %v3048_v30  ;;  %v3050_v24 = vmul.f32 %v2538_v13, %v7305_v11  ;;  %v2028_v39 = vmul.f32 0.5, %v4589_v59  ;;  %4600 = vtanh.f32 %v1010_v29  ;;  %v1013_v35 = vmul.f32 0.5, %v7387_v36 }
 0x1fe   : > { %3561 = vst [vmem:[%s5391_s17 + $0xaf8] sm:$0xff] %v3049_v54  ;;  %v2539_v27 = vadd.f32 0.5, %v2027_v16  ;;  %4602 = vtanh.f32 %v1011_v2  ;;  %v1014_v46 = vmul.f32 0.5, %v7394_v55  ;;  %v1015_v15 = vmul.f32 0.5, %v7397_v6  ;;  %v7473_v16 = vld [vmem:[%s5127_s30 + $0xbe0] sm:$0xff] }
 0x1ff   : > { %v4591_v11 = vpop.eup %4590  ;;  %3562 = vst [vmem:[%s5391_s17 + $0xb00] sm:$0xff] %v3050_v24  ;;  %v2540_v26 = vadd.f32 0.5, %v2028_v39  ;;  %4604 = vtanh.f32 %v1012_v21  ;;  %v1016_v60 = vmul.f32 0.5, %v7403_v48  ;;  %v1017_v43 = vmul.f32 0.5, %v7406_v4 }
 0x200   : > { %v4593_v51 = vpop.eup %4592  ;;  %v3051_v63 = vmul.f32 %v2539_v27, %v7322_v12  ;;  %v2029_v50 = vmul.f32 0.5, %v4591_v11  ;;  %4606 = vtanh.f32 %v1013_v35  ;;  %v1018_v34 = vmul.f32 0.5, %v7412_v42 }
 0x201   : > { %v3052_v62 = vmul.f32 %v2540_v26, %v7327_v19  ;;  %v2030_v41 = vmul.f32 0.5, %v4593_v51  ;;  %4608 = vtanh.f32 %v1014_v46  ;;  %v1019_v33 = vmul.f32 0.5, %v7418_v49 }
 0x202   : > { %3563 = vst [vmem:[%s5391_s17 + $0xb08] sm:$0xff] %v3051_v63  ;;  %v2541_v12 = vadd.f32 0.5, %v2029_v50  ;;  %4610 = vtanh.f32 %v1015_v15  ;;  %v1020_v17 = vmul.f32 0.5, %v7424_v53  ;;  %v1021_v10 = vmul.f32 0.5, %v7427_v28 }
 0x203   : > { %v4595_v40 = vpop.eup %4594  ;;  %3564 = vst [vmem:[%s5391_s17 + $0xb10] sm:$0xff] %v3052_v62  ;;  %v2542_v19 = vadd.f32 0.5, %v2030_v41  ;;  %4612 = vtanh.f32 %v1016_v60  ;;  %v1022_v14 = vmul.f32 0.5, %v7432_v22  ;;  %v1023_v32 = vmul.f32 0.5, %v7435_v20 }
 0x204   : > { %v4597_v8 = vpop.eup %4596  ;;  %v3053_v37 = vmul.f32 %v2541_v12, %v7338_v18  ;;  %v2031_v7 = vmul.f32 0.5, %v4595_v40  ;;  %4614 = vtanh.f32 %v1017_v43  ;;  %v1024_v38 = vmul.f32 0.5, %v7440_v44 }
 0x205   : > { %v3054_v61 = vmul.f32 %v2542_v19, %v7343_v23  ;;  %v2032_v31 = vmul.f32 0.5, %v4597_v8  ;;  %4616 = vtanh.f32 %v1018_v34  ;;  %v1025_v9 = vmul.f32 0.5, %v7446_v3 }
 0x206   : > { %v4599_v30 = vpop.eup %4598  ;;  %3565 = vst [vmem:[%s5391_s17 + $0xb18] sm:$0xff] %v3053_v37  ;;  %v2543_v13 = vadd.f32 0.5, %v2031_v7  ;;  %4618 = vtanh.f32 %v1019_v33  ;;  %v1026_v18 = vmul.f32 0.5, %v7452_v47  ;;  %v1027_v29 = vmul.f32 0.5, %v7455_v52  ;;  %v7490_v7 = vld [vmem:[%s5127_s30 + $0xbe8] sm:$0xff] }
 0x207   : > { %v4601_v2 = vpop.eup %4600  ;;  %3566 = vst [vmem:[%s5391_s17 + $0xb20] sm:$0xff] %v3054_v61  ;;  %v2544_v59 = vadd.f32 0.5, %v2032_v31  ;;  %v2033_v23 = vmul.f32 0.5, %v4599_v30  ;;  %4620 = vtanh.f32 %v1020_v17  ;;  %v1028_v54 = vmul.f32 0.5, %v7460_v1 }
 0x208   : > { %v4603_v21 = vpop.eup %4602  ;;  %v3055_v24 = vmul.f32 %v2543_v13, %v7354_v5  ;;  %v2034_v39 = vmul.f32 0.5, %v4601_v2  ;;  %4622 = vtanh.f32 %v1021_v10  ;;  %v1029_v35 = vmul.f32 0.5, %v7465_v0 }
 0x209   : > { %v4605_v27 = vpop.eup %4604  ;;  %v3056_v46 = vmul.f32 %v2544_v59, %v7359_v57  ;;  %v2545_v15 = vadd.f32 0.5, %v2033_v23  ;;  %v2035_v11 = vmul.f32 0.5, %v4603_v21  ;;  %4624 = vtanh.f32 %v1022_v14 }
 0x20a   : > { %v4607_v26 = vpop.eup %4606  ;;  %3567 = vst [vmem:[%s5391_s17 + $0xb28] sm:$0xff] %v3055_v24  ;;  %v2546_v60 = vadd.f32 0.5, %v2034_v39  ;;  %v2036_v43 = vmul.f32 0.5, %v4605_v27  ;;  %4626 = vtanh.f32 %v1023_v32  ;;  %v1030_v51 = vmul.f32 0.5, %v7473_v16 }
 0x20b   : > { %v4609_v5 = vpop.eup %4608  ;;  %3568 = vst [vmem:[%s5391_s17 + $0xb30] sm:$0xff] %v3056_v46  ;;  %v3057_v63 = vmul.f32 %v2545_v15, %v7367_v25  ;;  %v2547_v50 = vadd.f32 0.5, %v2035_v11  ;;  %v2037_v34 = vmul.f32 0.5, %v4607_v26  ;;  %4628 = vtanh.f32 %v1024_v38  ;;  %v7511_v11 = vld [vmem:[%s5127_s30 + $0xc00] sm:$0xff] }
 0x20c   : > { %v4611_v57 = vpop.eup %4610  ;;  %v3058_v62 = vmul.f32 %v2546_v60, %v7373_v58  ;;  %v2548_v41 = vadd.f32 0.5, %v2036_v43  ;;  %v2038_v33 = vmul.f32 0.5, %v4609_v5  ;;  %4630 = vtanh.f32 %v1025_v9  ;;  %v7495_v9 = vld [vmem:[%s5127_s30 + $0xbf0] sm:$0xff] }
 0x20d   : > { %v4613_v12 = vpop.eup %4612  ;;  %3569 = vst [vmem:[%s5391_s17 + $0xb38] sm:$0xff] %v3057_v63  ;;  %v3059_v17 = vmul.f32 %v2547_v50, %v7376_v56  ;;  %v2549_v10 = vadd.f32 0.5, %v2037_v34  ;;  %v2039_v40 = vmul.f32 0.5, %v4611_v57  ;;  %4632 = vtanh.f32 %v1026_v18 }
 0x20e   : > { %v4615_v25 = vpop.eup %4614  ;;  %3570 = vst [vmem:[%s5391_s17 + $0xb40] sm:$0xff] %v3058_v62  ;;  %v3060_v19 = vmul.f32 %v2548_v41, %v7381_v45  ;;  %v2550_v14 = vadd.f32 0.5, %v2038_v33  ;;  %v2040_v58 = vmul.f32 0.5, %v4613_v12  ;;  %4634 = vtanh.f32 %v1027_v29  ;;  %v7522_v33 = vld [vmem:[%s5127_s30 + $0xc08] sm:$0xff] }
 0x20f   : > { %v4617_v32 = vpop.eup %4616  ;;  %3571 = vst [vmem:[%s5391_s17 + $0xb48] sm:$0xff] %v3059_v17  ;;  %v3061_v8 = vmul.f32 %v2549_v10, %v7387_v36  ;;  %v2551_v37 = vadd.f32 0.5, %v2039_v40  ;;  %v2041_v56 = vmul.f32 0.5, %v4615_v25  ;;  %4636 = vtanh.f32 %v1028_v54  ;;  %v7527_v40 = vld [vmem:[%s5127_s30 + $0xc10] sm:$0xff] }
 0x210   : > { %v4619_v38 = vpop.eup %4618  ;;  %3572 = vst [vmem:[%s5391_s17 + $0xb50] sm:$0xff] %v3060_v19  ;;  %v3062_v61 = vmul.f32 %v2550_v14, %v7394_v55  ;;  %v2552_v45 = vadd.f32 0.5, %v2040_v58  ;;  %v2042_v31 = vmul.f32 0.5, %v4617_v32  ;;  %4638 = vtanh.f32 %v1029_v35  ;;  %v7506_v35 = vld [vmem:[%s5127_s30 + $0xbf8] sm:$0xff] }
 0x211   : > { %v4621_v30 = vpop.eup %4620  ;;  %3573 = vst [vmem:[%s5391_s17 + $0xb58] sm:$0xff] %v3061_v8  ;;  %v3063_v36 = vmul.f32 %v2551_v37, %v7397_v6  ;;  %v2553_v13 = vadd.f32 0.5, %v2041_v56  ;;  %v2043_v18 = vmul.f32 0.5, %v4619_v38  ;;  %4640 = vtanh.f32 %v1030_v51  ;;  %v7535_v56 = vld [vmem:[%s5127_s30 + $0xc18] sm:$0xff] }
 0x212   : > { %v4623_v29 = vpop.eup %4622  ;;  %3574 = vst [vmem:[%s5391_s17 + $0xb60] sm:$0xff] %v3062_v61  ;;  %v3064_v2 = vmul.f32 %v2552_v45, %v7403_v48  ;;  %v2554_v55 = vadd.f32 0.5, %v2042_v31  ;;  %v2044_v59 = vmul.f32 0.5, %v4621_v30  ;;  %v1031_v23 = vmul.f32 0.5, %v7490_v7  ;;  %v7541_v30 = vld [vmem:[%s5127_s30 + $0xc20] sm:$0xff] }
 0x213   : > { %v4625_v54 = vpop.eup %4624  ;;  %3575 = vst [vmem:[%s5391_s17 + $0xb68] sm:$0xff] %v3063_v36  ;;  %v3065_v21 = vmul.f32 %v2553_v13, %v7406_v4  ;;  %v2555_v6 = vadd.f32 0.5, %v2043_v18  ;;  %v2045_v24 = vmul.f32 0.5, %v4623_v29  ;;  %v1032_v39 = vmul.f32 0.5, %v7495_v9  ;;  %v7549_v29 = vld [vmem:[%s5127_s30 + $0xc30] sm:$0xff] }
 0x214   : > { %v4627_v27 = vpop.eup %4626  ;;  %3576 = vst [vmem:[%s5391_s17 + $0xb70] sm:$0xff] %v3064_v2  ;;  %v3066_v48 = vmul.f32 %v2554_v55, %v7412_v42  ;;  %v2556_v46 = vadd.f32 0.5, %v2044_v59  ;;  %v2046_v15 = vmul.f32 0.5, %v4625_v54  ;;  %4642 = vtanh.f32 %v1031_v23  ;;  %v7555_v59 = vld [vmem:[%s5127_s30 + $0xc38] sm:$0xff] }
 0x215   : > { %v4629_v26 = vpop.eup %4628  ;;  %3577 = vst [vmem:[%s5391_s17 + $0xb78] sm:$0xff] %v3065_v21  ;;  %v3067_v4 = vmul.f32 %v2555_v6, %v7418_v49  ;;  %v2557_v60 = vadd.f32 0.5, %v2045_v24  ;;  %v2047_v43 = vmul.f32 0.5, %v4627_v27  ;;  %4644 = vtanh.f32 %v1032_v39  ;;  %v7565_v24 = vld [vmem:[%s5127_s30 + $0xc48] sm:$0xff] }
 0x216   : > { %v4631_v51 = vpop.eup %4630  ;;  %3578 = vst [vmem:[%s5391_s17 + $0xb80] sm:$0xff] %v3066_v48  ;;  %v3068_v5 = vmul.f32 %v2556_v46, %v7424_v53  ;;  %v2558_v42 = vadd.f32 0.5, %v2046_v15  ;;  %v2048_v63 = vmul.f32 0.5, %v4629_v26  ;;  %v1033_v50 = vmul.f32 0.5, %v7506_v35  ;;  %v7571_v46 = vld [vmem:[%s5127_s30 + $0xc50] sm:$0xff]  ;;  %v7574_v15 = vld [vmem:[%s5127_s30 + $0xc58] sm:$0xff] }
 0x217   : > { %v4633_v34 = vpop.eup %4632  ;;  %3579 = vst [vmem:[%s5391_s17 + $0xb88] sm:$0xff] %v3067_v4  ;;  %v3069_v57 = vmul.f32 %v2557_v60, %v7427_v28  ;;  %v2559_v49 = vadd.f32 0.5, %v2047_v43  ;;  %v2049_v62 = vmul.f32 0.5, %v4631_v51  ;;  %v1034_v41 = vmul.f32 0.5, %v7511_v11 }
 0x218   : > { %v4635_v12 = vpop.eup %4634  ;;  %3580 = vst [vmem:[%s5391_s17 + $0xb90] sm:$0xff] %v3068_v5  ;;  %v3070_v53 = vmul.f32 %v2558_v42, %v7432_v22  ;;  %v2560_v17 = vadd.f32 0.5, %v2048_v63  ;;  %v2050_v10 = vmul.f32 0.5, %v4633_v34  ;;  %4646 = vtanh.f32 %v1033_v50  ;;  %v7586_v42 = vld [vmem:[%s5127_s30 + $0xc68] sm:$0xff] }
 0x219   : > { %v4637_v25 = vpop.eup %4636  ;;  %3581 = vst [vmem:[%s5391_s17 + $0xb98] sm:$0xff] %v3069_v57  ;;  %v3071_v28 = vmul.f32 %v2559_v49, %v7435_v20  ;;  %v2561_v19 = vadd.f32 0.5, %v2049_v62  ;;  %v2051_v14 = vmul.f32 0.5, %v4635_v12  ;;  %4648 = vtanh.f32 %v1034_v41  ;;  %v7592_v57 = vld [vmem:[%s5127_s30 + $0xc70] sm:$0xff]  ;;  %v7595_v49 = vld [vmem:[%s5127_s30 + $0xc78] sm:$0xff] }
 0x21a   : > { %v4639_v58 = vpop.eup %4638  ;;  %3582 = vst [vmem:[%s5391_s17 + $0xba0] sm:$0xff] %v3070_v53  ;;  %v3072_v22 = vmul.f32 %v2560_v17, %v7440_v44  ;;  %v2562_v32 = vadd.f32 0.5, %v2050_v10  ;;  %v2052_v8 = vmul.f32 0.5, %v4637_v25  ;;  %v1035_v37 = vmul.f32 0.5, %v7522_v33  ;;  %v7544_v44 = vld [vmem:[%s5127_s30 + $0xc28] sm:$0xff]  ;;  %v7600_v17 = vld [vmem:[%s5127_s30 + $0xc80] sm:$0xff] }
 0x21b   : > { %v4641_v38 = vpop.eup %4640  ;;  %3583 = vst [vmem:[%s5391_s17 + $0xba8] sm:$0xff] %v3071_v28  ;;  %v3073_v20 = vmul.f32 %v2561_v19, %v7446_v3  ;;  %v2563_v61 = vadd.f32 0.5, %v2051_v14  ;;  %v2053_v45 = vmul.f32 0.5, %v4639_v58  ;;  %v1036_v31 = vmul.f32 0.5, %v7527_v40  ;;  %v7603_v10 = vld [vmem:[%s5127_s30 + $0xc88] sm:$0xff]  ;;  %v7608_v14 = vld [vmem:[%s5127_s30 + $0xc90] sm:$0xff] }
 0x21c   : > { %3584 = vst [vmem:[%s5391_s17 + $0xbb0] sm:$0xff] %v3072_v22  ;;  %v3074_v36 = vmul.f32 %v2562_v32, %v7452_v47  ;;  %v2564_v13 = vadd.f32 0.5, %v2052_v8  ;;  %v2054_v18 = vmul.f32 0.5, %v4641_v38  ;;  %4650 = vtanh.f32 %v1035_v37  ;;  %v7614_v32 = vld [vmem:[%s5127_s30 + $0xc98] sm:$0xff] }
 0x21d   : > { %3585 = vst [vmem:[%s5391_s17 + $0xbb8] sm:$0xff] %v3073_v20  ;;  %v3075_v3 = vmul.f32 %v2563_v61, %v7455_v52  ;;  %v2565_v2 = vadd.f32 0.5, %v2053_v45  ;;  %4652 = vtanh.f32 %v1036_v31  ;;  %v1037_v55 = vmul.f32 0.5, %v7535_v56  ;;  %v7562_v52 = vld [vmem:[%s5127_s30 + $0xc40] sm:$0xff]  ;;  %v7623_v61 = vld [vmem:[%s5127_s30 + $0xca8] sm:$0xff] }
 0x21e   : > { %v4643_v47 = vpop.eup %4642  ;;  %3586 = vst [vmem:[%s5391_s17 + $0xbc0] sm:$0xff] %v3074_v36  ;;  %v3076_v23 = vmul.f32 %v2564_v13, %v7460_v1  ;;  %v2566_v54 = vadd.f32 0.5, %v2054_v18  ;;  %v1038_v21 = vmul.f32 0.5, %v7541_v30  ;;  %v1039_v6 = vmul.f32 0.5, %v7544_v44  ;;  %v7620_v20 = vld [vmem:[%s5127_s30 + $0xca0] sm:$0xff]  ;;  %v7628_v18 = vld [vmem:[%s5127_s30 + $0xcb0] sm:$0xff] }
 0x21f   : > { %v4645_v39 = vpop.eup %4644  ;;  %3587 = vst [vmem:[%s5391_s17 + $0xbc8] sm:$0xff] %v3075_v3  ;;  %v3077_v27 = vmul.f32 %v2565_v2, %v7465_v0  ;;  %v2055_v48 = vmul.f32 0.5, %v4643_v47  ;;  %4654 = vtanh.f32 %v1037_v55  ;;  %v1040_v1 = vmul.f32 0.5, %v7549_v29  ;;  %v7580_v0 = vld [vmem:[%s5127_s30 + $0xc60] sm:$0xff]  ;;  %v7633_v47 = vld [vmem:[%s5127_s30 + $0xcb8] sm:$0xff] }
 0x220   : > { %3588 = vst [vmem:[%s5391_s17 + $0xbd0] sm:$0xff] %v3076_v23  ;;  %v3078_v26 = vmul.f32 %v2566_v54, %v7473_v16  ;;  %v2056_v4 = vmul.f32 0.5, %v4645_v39  ;;  %4656 = vtanh.f32 %v1038_v21  ;;  %v1041_v60 = vmul.f32 0.5, %v7555_v59 }
 0x221   : > { %3589 = vst [vmem:[%s5391_s17 + $0xbd8] sm:$0xff] %v3077_v27  ;;  %v2567_v43 = vadd.f32 0.5, %v2055_v48  ;;  %4658 = vtanh.f32 %v1039_v6  ;;  %v1042_v51 = vmul.f32 0.5, %v7562_v52  ;;  %v1043_v5 = vmul.f32 0.5, %v7565_v24  ;;  %v7641_v48 = vld [vmem:[%s5127_s30 + $0xcc0] sm:$0xff] }
 0x222   : > { %v4647_v16 = vpop.eup %4646  ;;  %3590 = vst [vmem:[%s5391_s17 + $0xbe0] sm:$0xff] %v3078_v26  ;;  %v2568_v63 = vadd.f32 0.5, %v2056_v4  ;;  %4660 = vtanh.f32 %v1040_v1  ;;  %v1044_v50 = vmul.f32 0.5, %v7571_v46  ;;  %v1045_v34 = vmul.f32 0.5, %v7574_v15 }
 0x223   : > { %v4649_v62 = vpop.eup %4648  ;;  %v3079_v41 = vmul.f32 %v2567_v43, %v7490_v7  ;;  %v2057_v12 = vmul.f32 0.5, %v4647_v16  ;;  %4662 = vtanh.f32 %v1041_v60  ;;  %v1046_v53 = vmul.f32 0.5, %v7580_v0 }
 0x224   : > { %v3080_v25 = vmul.f32 %v2568_v63, %v7495_v9  ;;  %v2058_v28 = vmul.f32 0.5, %v4649_v62  ;;  %4664 = vtanh.f32 %v1042_v51  ;;  %v1047_v19 = vmul.f32 0.5, %v7586_v42 }
 0x225   : > { %3591 = vst [vmem:[%s5391_s17 + $0xbe8] sm:$0xff] %v3079_v41  ;;  %v2569_v7 = vadd.f32 0.5, %v2057_v12  ;;  %4666 = vtanh.f32 %v1043_v5  ;;  %v1048_v58 = vmul.f32 0.5, %v7592_v57  ;;  %v1049_v22 = vmul.f32 0.5, %v7595_v49 }
 0x226   : > { %v4651_v8 = vpop.eup %4650  ;;  %3592 = vst [vmem:[%s5391_s17 + $0xbf0] sm:$0xff] %v3080_v25  ;;  %v2570_v9 = vadd.f32 0.5, %v2058_v28  ;;  %4668 = vtanh.f32 %v1044_v50  ;;  %v1050_v37 = vmul.f32 0.5, %v7600_v17  ;;  %v1051_v38 = vmul.f32 0.5, %v7603_v10 }
 0x227   : > { %v4653_v45 = vpop.eup %4652  ;;  %v3081_v31 = vmul.f32 %v2569_v7, %v7506_v35  ;;  %v2059_v36 = vmul.f32 0.5, %v4651_v8  ;;  %4670 = vtanh.f32 %v1045_v34  ;;  %v1052_v13 = vmul.f32 0.5, %v7608_v14 }
 0x228   : > { %v3082_v3 = vmul.f32 %v2570_v9, %v7511_v11  ;;  %v2060_v2 = vmul.f32 0.5, %v4653_v45  ;;  %4672 = vtanh.f32 %v1046_v53  ;;  %v1053_v55 = vmul.f32 0.5, %v7614_v32 }
 0x229   : > { %v4655_v23 = vpop.eup %4654  ;;  %3593 = vst [vmem:[%s5391_s17 + $0xbf8] sm:$0xff] %v3081_v31  ;;  %v2571_v54 = vadd.f32 0.5, %v2059_v36  ;;  %4674 = vtanh.f32 %v1047_v19  ;;  %v1054_v35 = vmul.f32 0.5, %v7620_v20  ;;  %v1055_v21 = vmul.f32 0.5, %v7623_v61  ;;  %v7658_v36 = vld [vmem:[%s5127_s30 + $0xcc8] sm:$0xff] }
 0x22a   : > { %v4657_v6 = vpop.eup %4656  ;;  %3594 = vst [vmem:[%s5391_s17 + $0xc00] sm:$0xff] %v3082_v3  ;;  %v2572_v39 = vadd.f32 0.5, %v2060_v2  ;;  %v2061_v11 = vmul.f32 0.5, %v4655_v23  ;;  %4676 = vtanh.f32 %v1048_v58  ;;  %v1056_v27 = vmul.f32 0.5, %v7628_v18 }
 0x22b   : > { %v4659_v1 = vpop.eup %4658  ;;  %v3083_v26 = vmul.f32 %v2571_v54, %v7522_v33  ;;  %v2062_v4 = vmul.f32 0.5, %v4657_v6  ;;  %4678 = vtanh.f32 %v1049_v22  ;;  %v1057_v60 = vmul.f32 0.5, %v7633_v47 }
 0x22c   : > { %v4661_v43 = vpop.eup %4660  ;;  %v3084_v51 = vmul.f32 %v2572_v39, %v7527_v40  ;;  %v2573_v5 = vadd.f32 0.5, %v2061_v11  ;;  %v2063_v16 = vmul.f32 0.5, %v4659_v1  ;;  %4680 = vtanh.f32 %v1050_v37 }
 0x22d   : > { %v4663_v63 = vpop.eup %4662  ;;  %3595 = vst [vmem:[%s5391_s17 + $0xc08] sm:$0xff] %v3083_v26  ;;  %v2574_v50 = vadd.f32 0.5, %v2062_v4  ;;  %v2064_v34 = vmul.f32 0.5, %v4661_v43  ;;  %4682 = vtanh.f32 %v1051_v38  ;;  %v1058_v62 = vmul.f32 0.5, %v7641_v48 }
 0x22e   : > { %v4665_v33 = vpop.eup %4664  ;;  %3596 = vst [vmem:[%s5391_s17 + $0xc10] sm:$0xff] %v3084_v51  ;;  %v3085_v41 = vmul.f32 %v2573_v5, %v7535_v56  ;;  %v2575_v12 = vadd.f32 0.5, %v2063_v16  ;;  %v2065_v53 = vmul.f32 0.5, %v4663_v63  ;;  %4684 = vtanh.f32 %v1052_v13  ;;  %v7679_v16 = vld [vmem:[%s5127_s30 + $0xce0] sm:$0xff] }
 0x22f   : > { %v4667_v40 = vpop.eup %4666  ;;  %v3086_v25 = vmul.f32 %v2574_v50, %v7541_v30  ;;  %v2576_v28 = vadd.f32 0.5, %v2064_v34  ;;  %v2066_v19 = vmul.f32 0.5, %v4665_v33  ;;  %4686 = vtanh.f32 %v1053_v55  ;;  %v7663_v55 = vld [vmem:[%s5127_s30 + $0xcd0] sm:$0xff] }
 0x230   : > { %v4669_v7 = vpop.eup %4668  ;;  %3597 = vst [vmem:[%s5391_s17 + $0xc18] sm:$0xff] %v3085_v41  ;;  %v3087_v58 = vmul.f32 %v2575_v12, %v7544_v44  ;;  %v2577_v22 = vadd.f32 0.5, %v2065_v53  ;;  %v2067_v8 = vmul.f32 0.5, %v4667_v40  ;;  %4688 = vtanh.f32 %v1054_v35 }
 0x231   : > { %v4671_v56 = vpop.eup %4670  ;;  %3598 = vst [vmem:[%s5391_s17 + $0xc20] sm:$0xff] %v3086_v25  ;;  %v3088_v9 = vmul.f32 %v2576_v28, %v7549_v29  ;;  %v2578_v37 = vadd.f32 0.5, %v2066_v19  ;;  %v2068_v30 = vmul.f32 0.5, %v4669_v7  ;;  %4690 = vtanh.f32 %v1055_v21  ;;  %v7690_v19 = vld [vmem:[%s5127_s30 + $0xce8] sm:$0xff] }
 0x232   : > { %v4673_v38 = vpop.eup %4672  ;;  %3599 = vst [vmem:[%s5391_s17 + $0xc28] sm:$0xff] %v3087_v58  ;;  %v3089_v45 = vmul.f32 %v2577_v22, %v7555_v59  ;;  %v2579_v31 = vadd.f32 0.5, %v2067_v8  ;;  %v2069_v44 = vmul.f32 0.5, %v4671_v56  ;;  %4692 = vtanh.f32 %v1056_v27  ;;  %v7695_v8 = vld [vmem:[%s5127_s30 + $0xcf0] sm:$0xff] }
 0x233   : > { %v4675_v13 = vpop.eup %4674  ;;  %3600 = vst [vmem:[%s5391_s17 + $0xc30] sm:$0xff] %v3088_v9  ;;  %v3090_v3 = vmul.f32 %v2578_v37, %v7562_v52  ;;  %v2580_v29 = vadd.f32 0.5, %v2068_v30  ;;  %v2070_v2 = vmul.f32 0.5, %v4673_v38  ;;  %4694 = vtanh.f32 %v1057_v60  ;;  %v7674_v60 = vld [vmem:[%s5127_s30 + $0xcd8] sm:$0xff] }
 0x234   : > { %v4677_v23 = vpop.eup %4676  ;;  %3601 = vst [vmem:[%s5391_s17 + $0xc38] sm:$0xff] %v3089_v45  ;;  %v3091_v59 = vmul.f32 %v2579_v31, %v7565_v24  ;;  %v2581_v54 = vadd.f32 0.5, %v2069_v44  ;;  %v2071_v35 = vmul.f32 0.5, %v4675_v13  ;;  %4696 = vtanh.f32 %v1058_v62  ;;  %v7703_v44 = vld [vmem:[%s5127_s30 + $0xcf8] sm:$0xff] }
 0x235   : > { %v4679_v21 = vpop.eup %4678  ;;  %3602 = vst [vmem:[%s5391_s17 + $0xc40] sm:$0xff] %v3090_v3  ;;  %v3092_v6 = vmul.f32 %v2580_v29, %v7571_v46  ;;  %v2582_v52 = vadd.f32 0.5, %v2070_v2  ;;  %v2072_v39 = vmul.f32 0.5, %v4677_v23  ;;  %v1059_v11 = vmul.f32 0.5, %v7658_v36  ;;  %v7709_v23 = vld [vmem:[%s5127_s30 + $0xd00] sm:$0xff] }
 0x236   : > { %v4681_v27 = vpop.eup %4680  ;;  %3603 = vst [vmem:[%s5391_s17 + $0xc48] sm:$0xff] %v3091_v59  ;;  %v3093_v1 = vmul.f32 %v2581_v54, %v7574_v15  ;;  %v2583_v24 = vadd.f32 0.5, %v2071_v35  ;;  %v2073_v26 = vmul.f32 0.5, %v4679_v21  ;;  %v1060_v4 = vmul.f32 0.5, %v7663_v55  ;;  %v7717_v21 = vld [vmem:[%s5127_s30 + $0xd10] sm:$0xff] }
 0x237   : > { %v4683_v43 = vpop.eup %4682  ;;  %3604 = vst [vmem:[%s5391_s17 + $0xc50] sm:$0xff] %v3092_v6  ;;  %v3094_v46 = vmul.f32 %v2582_v52, %v7580_v0  ;;  %v2584_v51 = vadd.f32 0.5, %v2072_v39  ;;  %v2074_v5 = vmul.f32 0.5, %v4681_v27  ;;  %4698 = vtanh.f32 %v1059_v11  ;;  %v7723_v39 = vld [vmem:[%s5127_s30 + $0xd18] sm:$0xff] }
 0x238   : > { %v4685_v63 = vpop.eup %4684  ;;  %3605 = vst [vmem:[%s5391_s17 + $0xc58] sm:$0xff] %v3093_v1  ;;  %v3095_v15 = vmul.f32 %v2583_v24, %v7586_v42  ;;  %v2585_v50 = vadd.f32 0.5, %v2073_v26  ;;  %v2075_v34 = vmul.f32 0.5, %v4683_v43  ;;  %4700 = vtanh.f32 %v1060_v4  ;;  %v7733_v26 = vld [vmem:[%s5127_s30 + $0xd28] sm:$0xff] }
 0x239   : > { %v4687_v62 = vpop.eup %4686  ;;  %3606 = vst [vmem:[%s5391_s17 + $0xc60] sm:$0xff] %v3094_v46  ;;  %v3096_v33 = vmul.f32 %v2584_v51, %v7592_v57  ;;  %v2586_v0 = vadd.f32 0.5, %v2074_v5  ;;  %v2076_v41 = vmul.f32 0.5, %v4685_v63  ;;  %v1061_v12 = vmul.f32 0.5, %v7674_v60  ;;  %v7739_v51 = vld [vmem:[%s5127_s30 + $0xd30] sm:$0xff]  ;;  %v7742_v5 = vld [vmem:[%s5127_s30 + $0xd38] sm:$0xff] }
 0x23a   : > { %v4689_v53 = vpop.eup %4688  ;;  %3607 = vst [vmem:[%s5391_s17 + $0xc68] sm:$0xff] %v3095_v15  ;;  %v3097_v40 = vmul.f32 %v2585_v50, %v7595_v49  ;;  %v2587_v42 = vadd.f32 0.5, %v2075_v34  ;;  %v2077_v25 = vmul.f32 0.5, %v4687_v62  ;;  %v1062_v28 = vmul.f32 0.5, %v7679_v16 }
 0x23b   : > { %v4691_v7 = vpop.eup %4690  ;;  %3608 = vst [vmem:[%s5391_s17 + $0xc70] sm:$0xff] %v3096_v33  ;;  %v3098_v57 = vmul.f32 %v2586_v0, %v7600_v17  ;;  %v2588_v58 = vadd.f32 0.5, %v2076_v41  ;;  %v2078_v22 = vmul.f32 0.5, %v4689_v53  ;;  %4702 = vtanh.f32 %v1061_v12  ;;  %v7754_v0 = vld [vmem:[%s5127_s30 + $0xd48] sm:$0xff] }
 0x23c   : > { %v4693_v56 = vpop.eup %4692  ;;  %3609 = vst [vmem:[%s5391_s17 + $0xc78] sm:$0xff] %v3097_v40  ;;  %v3099_v49 = vmul.f32 %v2587_v42, %v7603_v10  ;;  %v2589_v9 = vadd.f32 0.5, %v2077_v25  ;;  %v2079_v37 = vmul.f32 0.5, %v4691_v7  ;;  %4704 = vtanh.f32 %v1062_v28  ;;  %v7760_v40 = vld [vmem:[%s5127_s30 + $0xd50] sm:$0xff]  ;;  %v7763_v42 = vld [vmem:[%s5127_s30 + $0xd58] sm:$0xff] }
 0x23d   : > { %v4695_v30 = vpop.eup %4694  ;;  %3610 = vst [vmem:[%s5391_s17 + $0xc80] sm:$0xff] %v3098_v57  ;;  %v3100_v17 = vmul.f32 %v2588_v58, %v7608_v14  ;;  %v2590_v38 = vadd.f32 0.5, %v2078_v22  ;;  %v2080_v45 = vmul.f32 0.5, %v4693_v56  ;;  %v1063_v31 = vmul.f32 0.5, %v7690_v19  ;;  %v7712_v14 = vld [vmem:[%s5127_s30 + $0xd08] sm:$0xff]  ;;  %v7768_v58 = vld [vmem:[%s5127_s30 + $0xd60] sm:$0xff] }
 0x23e   : > { %v4697_v13 = vpop.eup %4696  ;;  %3611 = vst [vmem:[%s5391_s17 + $0xc88] sm:$0xff] %v3099_v49  ;;  %v3101_v10 = vmul.f32 %v2589_v9, %v7614_v32  ;;  %v2591_v3 = vadd.f32 0.5, %v2079_v37  ;;  %v2081_v29 = vmul.f32 0.5, %v4695_v30  ;;  %v1064_v2 = vmul.f32 0.5, %v7695_v8  ;;  %v7771_v22 = vld [vmem:[%s5127_s30 + $0xd68] sm:$0xff]  ;;  %v7776_v37 = vld [vmem:[%s5127_s30 + $0xd70] sm:$0xff] }
 0x23f   : > { %3612 = vst [vmem:[%s5391_s17 + $0xc90] sm:$0xff] %v3100_v17  ;;  %v3102_v59 = vmul.f32 %v2590_v38, %v7620_v20  ;;  %v2592_v54 = vadd.f32 0.5, %v2080_v45  ;;  %v2082_v35 = vmul.f32 0.5, %v4697_v13  ;;  %4706 = vtanh.f32 %v1063_v31  ;;  %v7782_v38 = vld [vmem:[%s5127_s30 + $0xd78] sm:$0xff] }
 0x240   : > { %3613 = vst [vmem:[%s5391_s17 + $0xc98] sm:$0xff] %v3101_v10  ;;  %v3103_v32 = vmul.f32 %v2591_v3, %v7623_v61  ;;  %v2593_v6 = vadd.f32 0.5, %v2081_v29  ;;  %4708 = vtanh.f32 %v1064_v2  ;;  %v1065_v52 = vmul.f32 0.5, %v7703_v44  ;;  %v7730_v61 = vld [vmem:[%s5127_s30 + $0xd20] sm:$0xff]  ;;  %v7791_v3 = vld [vmem:[%s5127_s30 + $0xd88] sm:$0xff] }
 0x241   : > { %v4699_v20 = vpop.eup %4698  ;;  %3614 = vst [vmem:[%s5391_s17 + $0xca0] sm:$0xff] %v3102_v59  ;;  %v3104_v11 = vmul.f32 %v2592_v54, %v7628_v18  ;;  %v2594_v27 = vadd.f32 0.5, %v2082_v35  ;;  %v1066_v1 = vmul.f32 0.5, %v7709_v23  ;;  %v1067_v24 = vmul.f32 0.5, %v7712_v14  ;;  %v7788_v10 = vld [vmem:[%s5127_s30 + $0xd80] sm:$0xff]  ;;  %v7796_v35 = vld [vmem:[%s5127_s30 + $0xd90] sm:$0xff] }
 0x242   : > { %v4701_v4 = vpop.eup %4700  ;;  %3615 = vst [vmem:[%s5391_s17 + $0xca8] sm:$0xff] %v3103_v32  ;;  %v3105_v43 = vmul.f32 %v2593_v6, %v7633_v47  ;;  %v2083_v46 = vmul.f32 0.5, %v4699_v20  ;;  %4710 = vtanh.f32 %v1065_v52  ;;  %v1068_v18 = vmul.f32 0.5, %v7717_v21  ;;  %v7748_v47 = vld [vmem:[%s5127_s30 + $0xd40] sm:$0xff]  ;;  %v7801_v20 = vld [vmem:[%s5127_s30 + $0xd98] sm:$0xff] }
 0x243   : > { %3616 = vst [vmem:[%s5391_s17 + $0xcb0] sm:$0xff] %v3104_v11  ;;  %v3106_v63 = vmul.f32 %v2594_v27, %v7641_v48  ;;  %v2084_v15 = vmul.f32 0.5, %v4701_v4  ;;  %4712 = vtanh.f32 %v1066_v1  ;;  %v1069_v50 = vmul.f32 0.5, %v7723_v39 }
 0x244   : > { %3617 = vst [vmem:[%s5391_s17 + $0xcb8] sm:$0xff] %v3105_v43  ;;  %v2595_v34 = vadd.f32 0.5, %v2083_v46  ;;  %4714 = vtanh.f32 %v1067_v24  ;;  %v1070_v62 = vmul.f32 0.5, %v7730_v61  ;;  %v1071_v33 = vmul.f32 0.5, %v7733_v26  ;;  %v7809_v46 = vld [vmem:[%s5127_s30 + $0xda0] sm:$0xff] }
 0x245   : > { %v4703_v48 = vpop.eup %4702  ;;  %3618 = vst [vmem:[%s5391_s17 + $0xcc0] sm:$0xff] %v3106_v63  ;;  %v2596_v41 = vadd.f32 0.5, %v2084_v15  ;;  %4716 = vtanh.f32 %v1068_v18  ;;  %v1072_v12 = vmul.f32 0.5, %v7739_v51  ;;  %v1073_v53 = vmul.f32 0.5, %v7742_v5 }
 0x246   : > { %v4705_v25 = vpop.eup %4704  ;;  %v3107_v28 = vmul.f32 %v2595_v34, %v7658_v36  ;;  %v2085_v7 = vmul.f32 0.5, %v4703_v48  ;;  %4718 = vtanh.f32 %v1069_v50  ;;  %v1074_v57 = vmul.f32 0.5, %v7748_v47 }
 0x247   : > { %v3108_v56 = vmul.f32 %v2596_v41, %v7663_v55  ;;  %v2086_v49 = vmul.f32 0.5, %v4705_v25  ;;  %4720 = vtanh.f32 %v1070_v62  ;;  %v1075_v9 = vmul.f32 0.5, %v7754_v0 }
 0x248   : > { %3619 = vst [vmem:[%s5391_s17 + $0xcc8] sm:$0xff] %v3107_v28  ;;  %v2597_v36 = vadd.f32 0.5, %v2085_v7  ;;  %4722 = vtanh.f32 %v1071_v33  ;;  %v1076_v30 = vmul.f32 0.5, %v7760_v40  ;;  %v1077_v17 = vmul.f32 0.5, %v7763_v42 }
 0x249   : > { %v4707_v45 = vpop.eup %4706  ;;  %3620 = vst [vmem:[%s5391_s17 + $0xcd0] sm:$0xff] %v3108_v56  ;;  %v2598_v55 = vadd.f32 0.5, %v2086_v49  ;;  %4724 = vtanh.f32 %v1072_v12  ;;  %v1078_v31 = vmul.f32 0.5, %v7768_v58  ;;  %v1079_v13 = vmul.f32 0.5, %v7771_v22 }
 0x24a   : > { %v4709_v29 = vpop.eup %4708  ;;  %v3109_v2 = vmul.f32 %v2597_v36, %v7674_v60  ;;  %v2087_v59 = vmul.f32 0.5, %v4707_v45  ;;  %4726 = vtanh.f32 %v1073_v53  ;;  %v1080_v54 = vmul.f32 0.5, %v7776_v37 }
 0x24b   : > { %v3110_v32 = vmul.f32 %v2598_v55, %v7679_v16  ;;  %v2088_v6 = vmul.f32 0.5, %v4709_v29  ;;  %4728 = vtanh.f32 %v1074_v57  ;;  %v1081_v52 = vmul.f32 0.5, %v7782_v38 }
 0x24c   : > { %v4711_v11 = vpop.eup %4710  ;;  %3621 = vst [vmem:[%s5391_s17 + $0xcd8] sm:$0xff] %v3109_v2  ;;  %v2599_v27 = vadd.f32 0.5, %v2087_v59  ;;  %4730 = vtanh.f32 %v1075_v9  ;;  %v1082_v60 = vmul.f32 0.5, %v7788_v10  ;;  %v1083_v1 = vmul.f32 0.5, %v7791_v3  ;;  %v7826_v59 = vld [vmem:[%s5127_s30 + $0xda8] sm:$0xff] }
 0x24d   : > { %v4713_v24 = vpop.eup %4712  ;;  %3622 = vst [vmem:[%s5391_s17 + $0xce0] sm:$0xff] %v3110_v32  ;;  %v2600_v4 = vadd.f32 0.5, %v2088_v6  ;;  %v2089_v16 = vmul.f32 0.5, %v4711_v11  ;;  %4732 = vtanh.f32 %v1076_v30  ;;  %v1084_v43 = vmul.f32 0.5, %v7796_v35 }
 0x24e   : > { %v4715_v18 = vpop.eup %4714  ;;  %v3111_v63 = vmul.f32 %v2599_v27, %v7690_v19  ;;  %v2090_v15 = vmul.f32 0.5, %v4713_v24  ;;  %4734 = vtanh.f32 %v1077_v17  ;;  %v1085_v50 = vmul.f32 0.5, %v7801_v20 }
 0x24f   : > { %v4717_v34 = vpop.eup %4716  ;;  %v3112_v62 = vmul.f32 %v2600_v4, %v7695_v8  ;;  %v2601_v33 = vadd.f32 0.5, %v2089_v16  ;;  %v2091_v48 = vmul.f32 0.5, %v4715_v18  ;;  %4736 = vtanh.f32 %v1078_v31 }
 0x250   : > { %v4719_v41 = vpop.eup %4718  ;;  %3623 = vst [vmem:[%s5391_s17 + $0xce8] sm:$0xff] %v3111_v63  ;;  %v2602_v12 = vadd.f32 0.5, %v2090_v15  ;;  %v2092_v53 = vmul.f32 0.5, %v4717_v34  ;;  %4738 = vtanh.f32 %v1079_v13  ;;  %v1086_v25 = vmul.f32 0.5, %v7809_v46 }
 0x251   : > { %v4721_v19 = vpop.eup %4720  ;;  %3624 = vst [vmem:[%s5391_s17 + $0xcf0] sm:$0xff] %v3112_v62  ;;  %v3113_v28 = vmul.f32 %v2601_v33, %v7703_v44  ;;  %v2603_v7 = vadd.f32 0.5, %v2091_v48  ;;  %v2093_v57 = vmul.f32 0.5, %v4719_v41  ;;  %4740 = vtanh.f32 %v1080_v54  ;;  %v7847_v48 = vld [vmem:[%s5127_s30 + $0xdc0] sm:$0xff] }
 0x252   : > { %v4723_v8 = vpop.eup %4722  ;;  %v3114_v56 = vmul.f32 %v2602_v12, %v7709_v23  ;;  %v2604_v49 = vadd.f32 0.5, %v2092_v53  ;;  %v2094_v9 = vmul.f32 0.5, %v4721_v19  ;;  %4742 = vtanh.f32 %v1081_v52  ;;  %v7831_v52 = vld [vmem:[%s5127_s30 + $0xdb0] sm:$0xff] }
 0x253   : > { %v4725_v36 = vpop.eup %4724  ;;  %3625 = vst [vmem:[%s5391_s17 + $0xcf8] sm:$0xff] %v3113_v28  ;;  %v3115_v30 = vmul.f32 %v2603_v7, %v7712_v14  ;;  %v2605_v17 = vadd.f32 0.5, %v2093_v57  ;;  %v2095_v45 = vmul.f32 0.5, %v4723_v8  ;;  %4744 = vtanh.f32 %v1082_v60 }
 0x254   : > { %v4727_v44 = vpop.eup %4726  ;;  %3626 = vst [vmem:[%s5391_s17 + $0xd00] sm:$0xff] %v3114_v56  ;;  %v3116_v55 = vmul.f32 %v2604_v49, %v7717_v21  ;;  %v2606_v31 = vadd.f32 0.5, %v2094_v9  ;;  %v2096_v23 = vmul.f32 0.5, %v4725_v36  ;;  %4746 = vtanh.f32 %v1083_v1  ;;  %v7858_v9 = vld [vmem:[%s5127_s30 + $0xdc8] sm:$0xff] }
 0x255   : > { %v4729_v13 = vpop.eup %4728  ;;  %3627 = vst [vmem:[%s5391_s17 + $0xd08] sm:$0xff] %v3115_v30  ;;  %v3117_v29 = vmul.f32 %v2605_v17, %v7723_v39  ;;  %v2607_v2 = vadd.f32 0.5, %v2095_v45  ;;  %v2097_v14 = vmul.f32 0.5, %v4727_v44  ;;  %4748 = vtanh.f32 %v1084_v43  ;;  %v7863_v45 = vld [vmem:[%s5127_s30 + $0xdd0] sm:$0xff] }
 0x256   : > { %v4731_v54 = vpop.eup %4730  ;;  %3628 = vst [vmem:[%s5391_s17 + $0xd10] sm:$0xff] %v3116_v55  ;;  %v3118_v32 = vmul.f32 %v2606_v31, %v7730_v61  ;;  %v2608_v21 = vadd.f32 0.5, %v2096_v23  ;;  %v2098_v6 = vmul.f32 0.5, %v4729_v13  ;;  %4750 = vtanh.f32 %v1085_v50  ;;  %v7842_v50 = vld [vmem:[%s5127_s30 + $0xdb8] sm:$0xff] }
 0x257   : > { %v4733_v11 = vpop.eup %4732  ;;  %3629 = vst [vmem:[%s5391_s17 + $0xd18] sm:$0xff] %v3117_v29  ;;  %v3119_v39 = vmul.f32 %v2607_v2, %v7733_v26  ;;  %v2609_v27 = vadd.f32 0.5, %v2097_v14  ;;  %v2099_v60 = vmul.f32 0.5, %v4731_v54  ;;  %4752 = vtanh.f32 %v1086_v25  ;;  %v7871_v14 = vld [vmem:[%s5127_s30 + $0xdd8] sm:$0xff] }
 0x258   : > { %v4735_v1 = vpop.eup %4734  ;;  %3630 = vst [vmem:[%s5391_s17 + $0xd20] sm:$0xff] %v3118_v32  ;;  %v3120_v24 = vmul.f32 %v2608_v21, %v7739_v51  ;;  %v2610_v61 = vadd.f32 0.5, %v2098_v6  ;;  %v2100_v4 = vmul.f32 0.5, %v4733_v11  ;;  %v1087_v16 = vmul.f32 0.5, %v7826_v59  ;;  %v7877_v11 = vld [vmem:[%s5127_s30 + $0xde0] sm:$0xff] }
 0x259   : > { %v4737_v43 = vpop.eup %4736  ;;  %3631 = vst [vmem:[%s5391_s17 + $0xd28] sm:$0xff] %v3119_v39  ;;  %v3121_v18 = vmul.f32 %v2609_v27, %v7742_v5  ;;  %v2611_v26 = vadd.f32 0.5, %v2099_v60  ;;  %v2101_v63 = vmul.f32 0.5, %v4735_v1  ;;  %v1088_v15 = vmul.f32 0.5, %v7831_v52  ;;  %v7885_v1 = vld [vmem:[%s5127_s30 + $0xdf0] sm:$0xff] }
 0x25a   : > { %v4739_v34 = vpop.eup %4738  ;;  %3632 = vst [vmem:[%s5391_s17 + $0xd30] sm:$0xff] %v3120_v24  ;;  %v3122_v51 = vmul.f32 %v2610_v61, %v7748_v47  ;;  %v2612_v62 = vadd.f32 0.5, %v2100_v4  ;;  %v2102_v33 = vmul.f32 0.5, %v4737_v43  ;;  %4754 = vtanh.f32 %v1087_v16  ;;  %v7891_v4 = vld [vmem:[%s5127_s30 + $0xdf8] sm:$0xff] }
 0x25b   : > { %v4741_v41 = vpop.eup %4740  ;;  %3633 = vst [vmem:[%s5391_s17 + $0xd38] sm:$0xff] %v3121_v18  ;;  %v3123_v5 = vmul.f32 %v2611_v26, %v7754_v0  ;;  %v2613_v12 = vadd.f32 0.5, %v2101_v63  ;;  %v2103_v53 = vmul.f32 0.5, %v4739_v34  ;;  %4756 = vtanh.f32 %v1088_v15  ;;  %v7901_v63 = vld [vmem:[%s5127_s30 + $0xe08] sm:$0xff] }
 0x25c   : > { %v4743_v25 = vpop.eup %4742  ;;  %3634 = vst [vmem:[%s5391_s17 + $0xd40] sm:$0xff] %v3122_v51  ;;  %v3124_v19 = vmul.f32 %v2612_v62, %v7760_v40  ;;  %v2614_v47 = vadd.f32 0.5, %v2102_v33  ;;  %v2104_v28 = vmul.f32 0.5, %v4741_v41  ;;  %v1089_v7 = vmul.f32 0.5, %v7842_v50  ;;  %v7907_v62 = vld [vmem:[%s5127_s30 + $0xe10] sm:$0xff]  ;;  %v7910_v33 = vld [vmem:[%s5127_s30 + $0xe18] sm:$0xff] }
 0x25d   : > { %v4745_v57 = vpop.eup %4744  ;;  %3635 = vst [vmem:[%s5391_s17 + $0xd48] sm:$0xff] %v3123_v5  ;;  %v3125_v8 = vmul.f32 %v2613_v12, %v7763_v42  ;;  %v2615_v0 = vadd.f32 0.5, %v2103_v53  ;;  %v2105_v56 = vmul.f32 0.5, %v4743_v25  ;;  %v1090_v49 = vmul.f32 0.5, %v7847_v48 }
 0x25e   : > { %v4747_v36 = vpop.eup %4746  ;;  %3636 = vst [vmem:[%s5391_s17 + $0xd50] sm:$0xff] %v3124_v19  ;;  %v3126_v40 = vmul.f32 %v2614_v47, %v7768_v58  ;;  %v2616_v30 = vadd.f32 0.5, %v2104_v28  ;;  %v2106_v17 = vmul.f32 0.5, %v4745_v57  ;;  %4758 = vtanh.f32 %v1089_v7  ;;  %v7922_v47 = vld [vmem:[%s5127_s30 + $0xe28] sm:$0xff] }
 0x25f   : > { %v4749_v44 = vpop.eup %4748  ;;  %3637 = vst [vmem:[%s5391_s17 + $0xd58] sm:$0xff] %v3125_v8  ;;  %v3127_v42 = vmul.f32 %v2615_v0, %v7771_v22  ;;  %v2617_v55 = vadd.f32 0.5, %v2105_v56  ;;  %v2107_v31 = vmul.f32 0.5, %v4747_v36  ;;  %4760 = vtanh.f32 %v1090_v49  ;;  %v7928_v8 = vld [vmem:[%s5127_s30 + $0xe30] sm:$0xff]  ;;  %v7931_v0 = vld [vmem:[%s5127_s30 + $0xe38] sm:$0xff] }
 0x260   : > { %v4751_v23 = vpop.eup %4750  ;;  %3638 = vst [vmem:[%s5391_s17 + $0xd60] sm:$0xff] %v3126_v40  ;;  %v3128_v58 = vmul.f32 %v2616_v30, %v7776_v37  ;;  %v2618_v13 = vadd.f32 0.5, %v2106_v17  ;;  %v2108_v29 = vmul.f32 0.5, %v4749_v44  ;;  %v1091_v2 = vmul.f32 0.5, %v7858_v9  ;;  %v7880_v37 = vld [vmem:[%s5127_s30 + $0xde8] sm:$0xff]  ;;  %v7936_v30 = vld [vmem:[%s5127_s30 + $0xe40] sm:$0xff] }
 0x261   : > { %v4753_v54 = vpop.eup %4752  ;;  %3639 = vst [vmem:[%s5391_s17 + $0xd68] sm:$0xff] %v3127_v42  ;;  %v3129_v22 = vmul.f32 %v2617_v55, %v7782_v38  ;;  %v2619_v32 = vadd.f32 0.5, %v2107_v31  ;;  %v2109_v21 = vmul.f32 0.5, %v4751_v23  ;;  %v1092_v6 = vmul.f32 0.5, %v7863_v45  ;;  %v7939_v17 = vld [vmem:[%s5127_s30 + $0xe48] sm:$0xff]  ;;  %v7944_v31 = vld [vmem:[%s5127_s30 + $0xe50] sm:$0xff] }
 0x262   : > { %3640 = vst [vmem:[%s5391_s17 + $0xd70] sm:$0xff] %v3128_v58  ;;  %v3130_v39 = vmul.f32 %v2618_v13, %v7788_v10  ;;  %v2620_v27 = vadd.f32 0.5, %v2108_v29  ;;  %v2110_v60 = vmul.f32 0.5, %v4753_v54  ;;  %4762 = vtanh.f32 %v1091_v2  ;;  %v7950_v13 = vld [vmem:[%s5127_s30 + $0xe58] sm:$0xff] }
 0x263   : > { %3641 = vst [vmem:[%s5391_s17 + $0xd78] sm:$0xff] %v3129_v22  ;;  %v3131_v38 = vmul.f32 %v2619_v32, %v7791_v3  ;;  %v2621_v24 = vadd.f32 0.5, %v2109_v21  ;;  %4764 = vtanh.f32 %v1092_v6  ;;  %v1093_v61 = vmul.f32 0.5, %v7871_v14  ;;  %v7898_v3 = vld [vmem:[%s5127_s30 + $0xe00] sm:$0xff]  ;;  %v7959_v32 = vld [vmem:[%s5127_s30 + $0xe68] sm:$0xff] }
 0x264   : > { %v4755_v10 = vpop.eup %4754  ;;  %3642 = vst [vmem:[%s5391_s17 + $0xd80] sm:$0xff] %v3130_v39  ;;  %v3132_v16 = vmul.f32 %v2620_v27, %v7796_v35  ;;  %v2622_v43 = vadd.f32 0.5, %v2110_v60  ;;  %v1094_v18 = vmul.f32 0.5, %v7877_v11  ;;  %v1095_v26 = vmul.f32 0.5, %v7880_v37  ;;  %v7956_v22 = vld [vmem:[%s5127_s30 + $0xe60] sm:$0xff]  ;;  %v7964_v60 = vld [vmem:[%s5127_s30 + $0xe70] sm:$0xff] }
 0x265   : > { %v4757_v15 = vpop.eup %4756  ;;  %3643 = vst [vmem:[%s5391_s17 + $0xd88] sm:$0xff] %v3131_v38  ;;  %v3133_v34 = vmul.f32 %v2621_v24, %v7801_v20  ;;  %v2111_v51 = vmul.f32 0.5, %v4755_v10  ;;  %4766 = vtanh.f32 %v1093_v61  ;;  %v1096_v35 = vmul.f32 0.5, %v7885_v1  ;;  %v7916_v20 = vld [vmem:[%s5127_s30 + $0xe20] sm:$0xff]  ;;  %v7969_v10 = vld [vmem:[%s5127_s30 + $0xe78] sm:$0xff] }
 0x266   : > { %3644 = vst [vmem:[%s5391_s17 + $0xd90] sm:$0xff] %v3132_v16  ;;  %v3134_v41 = vmul.f32 %v2622_v43, %v7809_v46  ;;  %v2112_v5 = vmul.f32 0.5, %v4757_v15  ;;  %4768 = vtanh.f32 %v1094_v18  ;;  %v1097_v12 = vmul.f32 0.5, %v7891_v4 }
 0x267   : > { %3645 = vst [vmem:[%s5391_s17 + $0xd98] sm:$0xff] %v3133_v34  ;;  %v2623_v53 = vadd.f32 0.5, %v2111_v51  ;;  %4770 = vtanh.f32 %v1095_v26  ;;  %v1098_v25 = vmul.f32 0.5, %v7898_v3  ;;  %v1099_v19 = vmul.f32 0.5, %v7901_v63  ;;  %v7977_v51 = vld [vmem:[%s5127_s30 + $0xe80] sm:$0xff] }
 0x268   : > { %v4759_v46 = vpop.eup %4758  ;;  %3646 = vst [vmem:[%s5391_s17 + $0xda0] sm:$0xff] %v3134_v41  ;;  %v2624_v28 = vadd.f32 0.5, %v2112_v5  ;;  %4772 = vtanh.f32 %v1096_v35  ;;  %v1100_v7 = vmul.f32 0.5, %v7907_v62  ;;  %v1101_v57 = vmul.f32 0.5, %v7910_v33 }
 0x269   : > { %v4761_v56 = vpop.eup %4760  ;;  %v3135_v49 = vmul.f32 %v2623_v53, %v7826_v59  ;;  %v2113_v36 = vmul.f32 0.5, %v4759_v46  ;;  %4774 = vtanh.f32 %v1097_v12  ;;  %v1102_v40 = vmul.f32 0.5, %v7916_v20 }
 0x26a   : > { %v3136_v44 = vmul.f32 %v2624_v28, %v7831_v52  ;;  %v2114_v42 = vmul.f32 0.5, %v4761_v56  ;;  %4776 = vtanh.f32 %v1098_v25  ;;  %v1103_v55 = vmul.f32 0.5, %v7922_v47 }
 0x26b   : > { %3647 = vst [vmem:[%s5391_s17 + $0xda8] sm:$0xff] %v3135_v49  ;;  %v2625_v59 = vadd.f32 0.5, %v2113_v36  ;;  %4778 = vtanh.f32 %v1099_v19  ;;  %v1104_v23 = vmul.f32 0.5, %v7928_v8  ;;  %v1105_v58 = vmul.f32 0.5, %v7931_v0 }
 0x26c   : > { %v4763_v29 = vpop.eup %4762  ;;  %3648 = vst [vmem:[%s5391_s17 + $0xdb0] sm:$0xff] %v3136_v44  ;;  %v2626_v52 = vadd.f32 0.5, %v2114_v42  ;;  %4780 = vtanh.f32 %v1100_v7  ;;  %v1106_v2 = vmul.f32 0.5, %v7936_v30  ;;  %v1107_v54 = vmul.f32 0.5, %v7939_v17 }
 0x26d   : > { %v4765_v21 = vpop.eup %4764  ;;  %v3137_v6 = vmul.f32 %v2625_v59, %v7842_v50  ;;  %v2115_v39 = vmul.f32 0.5, %v4763_v29  ;;  %4782 = vtanh.f32 %v1101_v57  ;;  %v1108_v27 = vmul.f32 0.5, %v7944_v31 }
 0x26e   : > { %v3138_v38 = vmul.f32 %v2626_v52, %v7847_v48  ;;  %v2116_v24 = vmul.f32 0.5, %v4765_v21  ;;  %4784 = vtanh.f32 %v1102_v40  ;;  %v1109_v61 = vmul.f32 0.5, %v7950_v13 }
 0x26f   : > { %v4767_v16 = vpop.eup %4766  ;;  %3649 = vst [vmem:[%s5391_s17 + $0xdb8] sm:$0xff] %v3137_v6  ;;  %v2627_v43 = vadd.f32 0.5, %v2115_v39  ;;  %4786 = vtanh.f32 %v1103_v55  ;;  %v1110_v50 = vmul.f32 0.5, %v7956_v22  ;;  %v1111_v18 = vmul.f32 0.5, %v7959_v32  ;;  %v7994_v39 = vld [vmem:[%s5127_s30 + $0xe88] sm:$0xff] }
 0x270   : > { %v4769_v26 = vpop.eup %4768  ;;  %3650 = vst [vmem:[%s5391_s17 + $0xdc0] sm:$0xff] %v3138_v38  ;;  %v2628_v15 = vadd.f32 0.5, %v2116_v24  ;;  %v2117_v48 = vmul.f32 0.5, %v4767_v16  ;;  %4788 = vtanh.f32 %v1104_v23  ;;  %v1112_v34 = vmul.f32 0.5, %v7964_v60 }
 0x271   : > { %v4771_v35 = vpop.eup %4770  ;;  %v3139_v41 = vmul.f32 %v2627_v43, %v7858_v9  ;;  %v2118_v5 = vmul.f32 0.5, %v4769_v26  ;;  %4790 = vtanh.f32 %v1105_v58  ;;  %v1113_v12 = vmul.f32 0.5, %v7969_v10 }
 0x272   : > { %v4773_v53 = vpop.eup %4772  ;;  %v3140_v25 = vmul.f32 %v2628_v15, %v7863_v45  ;;  %v2629_v19 = vadd.f32 0.5, %v2117_v48  ;;  %v2119_v46 = vmul.f32 0.5, %v4771_v35  ;;  %4792 = vtanh.f32 %v1106_v2 }
 0x273   : > { %v4775_v28 = vpop.eup %4774  ;;  %3651 = vst [vmem:[%s5391_s17 + $0xdc8] sm:$0xff] %v3139_v41  ;;  %v2630_v7 = vadd.f32 0.5, %v2118_v5  ;;  %v2120_v57 = vmul.f32 0.5, %v4773_v53  ;;  %4794 = vtanh.f32 %v1107_v54  ;;  %v1114_v56 = vmul.f32 0.5, %v7977_v51 }
 0x274   : > { %v4777_v9 = vpop.eup %4776  ;;  %3652 = vst [vmem:[%s5391_s17 + $0xdd0] sm:$0xff] %v3140_v25  ;;  %v3141_v49 = vmul.f32 %v2629_v19, %v7871_v14  ;;  %v2631_v36 = vadd.f32 0.5, %v2119_v46  ;;  %v2121_v40 = vmul.f32 0.5, %v4775_v28  ;;  %4796 = vtanh.f32 %v1108_v27  ;;  %v8015_v46 = vld [vmem:[%s5127_s30 + $0xea0] sm:$0xff] }
 0x275   : > { %v4779_v45 = vpop.eup %4778  ;;  %v3142_v44 = vmul.f32 %v2630_v7, %v7877_v11  ;;  %v2632_v42 = vadd.f32 0.5, %v2120_v57  ;;  %v2122_v55 = vmul.f32 0.5, %v4777_v9  ;;  %4798 = vtanh.f32 %v1109_v61  ;;  %v7999_v61 = vld [vmem:[%s5127_s30 + $0xe90] sm:$0xff] }
 0x276   : > { %v4781_v59 = vpop.eup %4780  ;;  %3653 = vst [vmem:[%s5391_s17 + $0xdd8] sm:$0xff] %v3141_v49  ;;  %v3143_v23 = vmul.f32 %v2631_v36, %v7880_v37  ;;  %v2633_v58 = vadd.f32 0.5, %v2121_v40  ;;  %v2123_v29 = vmul.f32 0.5, %v4779_v45  ;;  %4800 = vtanh.f32 %v1110_v50 }
 0x277   : > { %v4783_v14 = vpop.eup %4782  ;;  %3654 = vst [vmem:[%s5391_s17 + $0xde0] sm:$0xff] %v3142_v44  ;;  %v3144_v52 = vmul.f32 %v2632_v42, %v7885_v1  ;;  %v2634_v2 = vadd.f32 0.5, %v2122_v55  ;;  %v2124_v11 = vmul.f32 0.5, %v4781_v59  ;;  %4802 = vtanh.f32 %v1111_v18  ;;  %v8026_v55 = vld [vmem:[%s5127_s30 + $0xea8] sm:$0xff] }
 0x278   : > { %v4785_v54 = vpop.eup %4784  ;;  %3655 = vst [vmem:[%s5391_s17 + $0xde8] sm:$0xff] %v3143_v23  ;;  %v3145_v21 = vmul.f32 %v2633_v58, %v7891_v4  ;;  %v2635_v6 = vadd.f32 0.5, %v2123_v29  ;;  %v2125_v37 = vmul.f32 0.5, %v4783_v14  ;;  %4804 = vtanh.f32 %v1112_v34  ;;  %v8031_v29 = vld [vmem:[%s5127_s30 + $0xeb0] sm:$0xff] }
 0x279   : > { %v4787_v27 = vpop.eup %4786  ;;  %3656 = vst [vmem:[%s5391_s17 + $0xdf0] sm:$0xff] %v3144_v52  ;;  %v3146_v38 = vmul.f32 %v2634_v2, %v7898_v3  ;;  %v2636_v1 = vadd.f32 0.5, %v2124_v11  ;;  %v2126_v24 = vmul.f32 0.5, %v4785_v54  ;;  %4806 = vtanh.f32 %v1113_v12  ;;  %v8010_v12 = vld [vmem:[%s5127_s30 + $0xe98] sm:$0xff] }
 0x27a   : > { %v4789_v16 = vpop.eup %4788  ;;  %3657 = vst [vmem:[%s5391_s17 + $0xdf8] sm:$0xff] %v3145_v21  ;;  %v3147_v4 = vmul.f32 %v2635_v6, %v7901_v63  ;;  %v2637_v43 = vadd.f32 0.5, %v2125_v37  ;;  %v2127_v50 = vmul.f32 0.5, %v4787_v27  ;;  %4808 = vtanh.f32 %v1114_v56  ;;  %v8039_v37 = vld [vmem:[%s5127_s30 + $0xeb8] sm:$0xff] }
 0x27b   : > { %v4791_v18 = vpop.eup %4790  ;;  %3658 = vst [vmem:[%s5391_s17 + $0xe00] sm:$0xff] %v3146_v38  ;;  %v3148_v26 = vmul.f32 %v2636_v1, %v7907_v62  ;;  %v2638_v3 = vadd.f32 0.5, %v2126_v24  ;;  %v2128_v15 = vmul.f32 0.5, %v4789_v16  ;;  %v1115_v48 = vmul.f32 0.5, %v7994_v39  ;;  %v8045_v16 = vld [vmem:[%s5127_s30 + $0xec0] sm:$0xff] }
 0x27c   : > { %v4793_v34 = vpop.eup %4792  ;;  %3659 = vst [vmem:[%s5391_s17 + $0xe08] sm:$0xff] %v3147_v4  ;;  %v3149_v35 = vmul.f32 %v2637_v43, %v7910_v33  ;;  %v2639_v63 = vadd.f32 0.5, %v2127_v50  ;;  %v2129_v41 = vmul.f32 0.5, %v4791_v18  ;;  %v1116_v5 = vmul.f32 0.5, %v7999_v61  ;;  %v8053_v18 = vld [vmem:[%s5127_s30 + $0xed0] sm:$0xff] }
 0x27d   : > { %v4795_v53 = vpop.eup %4794  ;;  %3660 = vst [vmem:[%s5391_s17 + $0xe10] sm:$0xff] %v3148_v26  ;;  %v3150_v62 = vmul.f32 %v2638_v3, %v7916_v20  ;;  %v2640_v25 = vadd.f32 0.5, %v2128_v15  ;;  %v2130_v19 = vmul.f32 0.5, %v4793_v34  ;;  %4810 = vtanh.f32 %v1115_v48  ;;  %v8059_v15 = vld [vmem:[%s5127_s30 + $0xed8] sm:$0xff] }
 0x27e   : > { %v4797_v28 = vpop.eup %4796  ;;  %3661 = vst [vmem:[%s5391_s17 + $0xe18] sm:$0xff] %v3149_v35  ;;  %v3151_v33 = vmul.f32 %v2639_v63, %v7922_v47  ;;  %v2641_v7 = vadd.f32 0.5, %v2129_v41  ;;  %v2131_v57 = vmul.f32 0.5, %v4795_v53  ;;  %4812 = vtanh.f32 %v1116_v5  ;;  %v8069_v41 = vld [vmem:[%s5127_s30 + $0xee8] sm:$0xff] }
 0x27f   : > { %v4799_v56 = vpop.eup %4798  ;;  %3662 = vst [vmem:[%s5391_s17 + $0xe20] sm:$0xff] %v3150_v62  ;;  %v3152_v9 = vmul.f32 %v2640_v25, %v7928_v8  ;;  %v2642_v20 = vadd.f32 0.5, %v2130_v19  ;;  %v2132_v49 = vmul.f32 0.5, %v4797_v28  ;;  %v1117_v36 = vmul.f32 0.5, %v8010_v12  ;;  %v8075_v25 = vld [vmem:[%s5127_s30 + $0xef0] sm:$0xff]  ;;  %v8078_v19 = vld [vmem:[%s5127_s30 + $0xef8] sm:$0xff] }
 0x280   : > { %v4801_v40 = vpop.eup %4800  ;;  %3663 = vst [vmem:[%s5391_s17 + $0xe28] sm:$0xff] %v3151_v33  ;;  %v3153_v45 = vmul.f32 %v2641_v7, %v7931_v0  ;;  %v2643_v47 = vadd.f32 0.5, %v2131_v57  ;;  %v2133_v44 = vmul.f32 0.5, %v4799_v56  ;;  %v1118_v42 = vmul.f32 0.5, %v8015_v46 }
 0x281   : > { %v4803_v59 = vpop.eup %4802  ;;  %3664 = vst [vmem:[%s5391_s17 + $0xe30] sm:$0xff] %v3152_v9  ;;  %v3154_v8 = vmul.f32 %v2642_v20, %v7936_v30  ;;  %v2644_v23 = vadd.f32 0.5, %v2132_v49  ;;  %v2134_v58 = vmul.f32 0.5, %v4801_v40  ;;  %4814 = vtanh.f32 %v1117_v36  ;;  %v8090_v20 = vld [vmem:[%s5127_s30 + $0xf08] sm:$0xff] }
 0x282   : > { %v4805_v14 = vpop.eup %4804  ;;  %3665 = vst [vmem:[%s5391_s17 + $0xe38] sm:$0xff] %v3153_v45  ;;  %v3155_v0 = vmul.f32 %v2643_v47, %v7939_v17  ;;  %v2645_v52 = vadd.f32 0.5, %v2133_v44  ;;  %v2135_v2 = vmul.f32 0.5, %v4803_v59  ;;  %4816 = vtanh.f32 %v1118_v42  ;;  %v8096_v45 = vld [vmem:[%s5127_s30 + $0xf10] sm:$0xff]  ;;  %v8099_v47 = vld [vmem:[%s5127_s30 + $0xf18] sm:$0xff] }
 0x283   : > { %v4807_v11 = vpop.eup %4806  ;;  %3666 = vst [vmem:[%s5391_s17 + $0xe40] sm:$0xff] %v3154_v8  ;;  %v3156_v30 = vmul.f32 %v2644_v23, %v7944_v31  ;;  %v2646_v54 = vadd.f32 0.5, %v2134_v58  ;;  %v2136_v21 = vmul.f32 0.5, %v4805_v14  ;;  %v1119_v6 = vmul.f32 0.5, %v8026_v55  ;;  %v8048_v31 = vld [vmem:[%s5127_s30 + $0xec8] sm:$0xff]  ;;  %v8104_v23 = vld [vmem:[%s5127_s30 + $0xf20] sm:$0xff] }
 0x284   : > { %v4809_v27 = vpop.eup %4808  ;;  %3667 = vst [vmem:[%s5391_s17 + $0xe48] sm:$0xff] %v3155_v0  ;;  %v3157_v17 = vmul.f32 %v2645_v52, %v7950_v13  ;;  %v2647_v38 = vadd.f32 0.5, %v2135_v2  ;;  %v2137_v1 = vmul.f32 0.5, %v4807_v11  ;;  %v1120_v24 = vmul.f32 0.5, %v8031_v29  ;;  %v8107_v58 = vld [vmem:[%s5127_s30 + $0xf28] sm:$0xff]  ;;  %v8112_v2 = vld [vmem:[%s5127_s30 + $0xf30] sm:$0xff] }
 0x285   : > { %3668 = vst [vmem:[%s5391_s17 + $0xe50] sm:$0xff] %v3156_v30  ;;  %v3158_v4 = vmul.f32 %v2646_v54, %v7956_v22  ;;  %v2648_v43 = vadd.f32 0.5, %v2136_v21  ;;  %v2138_v50 = vmul.f32 0.5, %v4809_v27  ;;  %4818 = vtanh.f32 %v1119_v6  ;;  %v8118_v54 = vld [vmem:[%s5127_s30 + $0xf38] sm:$0xff] }
 0x286   : > { %3669 = vst [vmem:[%s5391_s17 + $0xe58] sm:$0xff] %v3157_v17  ;;  %v3159_v13 = vmul.f32 %v2647_v38, %v7959_v32  ;;  %v2649_v26 = vadd.f32 0.5, %v2137_v1  ;;  %4820 = vtanh.f32 %v1120_v24  ;;  %v1121_v3 = vmul.f32 0.5, %v8039_v37  ;;  %v8066_v32 = vld [vmem:[%s5127_s30 + $0xee0] sm:$0xff]  ;;  %v8127_v38 = vld [vmem:[%s5127_s30 + $0xf48] sm:$0xff] }
 0x287   : > { %v4811_v22 = vpop.eup %4810  ;;  %3670 = vst [vmem:[%s5391_s17 + $0xe60] sm:$0xff] %v3158_v4  ;;  %v3160_v48 = vmul.f32 %v2648_v43, %v7964_v60  ;;  %v2650_v34 = vadd.f32 0.5, %v2138_v50  ;;  %v1122_v35 = vmul.f32 0.5, %v8045_v16  ;;  %v1123_v63 = vmul.f32 0.5, %v8048_v31  ;;  %v8124_v17 = vld [vmem:[%s5127_s30 + $0xf40] sm:$0xff]  ;;  %v8132_v50 = vld [vmem:[%s5127_s30 + $0xf50] sm:$0xff] }
 0x288   : > { %v4813_v5 = vpop.eup %4812  ;;  %3671 = vst [vmem:[%s5391_s17 + $0xe68] sm:$0xff] %v3159_v13  ;;  %v3161_v53 = vmul.f32 %v2649_v26, %v7969_v10  ;;  %v2139_v62 = vmul.f32 0.5, %v4811_v22  ;;  %4822 = vtanh.f32 %v1121_v3  ;;  %v1124_v60 = vmul.f32 0.5, %v8053_v18  ;;  %v8084_v10 = vld [vmem:[%s5127_s30 + $0xf00] sm:$0xff]  ;;  %v8137_v22 = vld [vmem:[%s5127_s30 + $0xf58] sm:$0xff] }
 0x289   : > { %3672 = vst [vmem:[%s5391_s17 + $0xe70] sm:$0xff] %v3160_v48  ;;  %v3162_v28 = vmul.f32 %v2650_v34, %v7977_v51  ;;  %v2140_v33 = vmul.f32 0.5, %v4813_v5  ;;  %4824 = vtanh.f32 %v1122_v35  ;;  %v1125_v7 = vmul.f32 0.5, %v8059_v15 }
 0x28a   : > { %3673 = vst [vmem:[%s5391_s17 + $0xe78] sm:$0xff] %v3161_v53  ;;  %v2651_v57 = vadd.f32 0.5, %v2139_v62  ;;  %4826 = vtanh.f32 %v1123_v63  ;;  %v1126_v56 = vmul.f32 0.5, %v8066_v32  ;;  %v1127_v9 = vmul.f32 0.5, %v8069_v41  ;;  %v8145_v62 = vld [vmem:[%s5127_s30 + $0xf60] sm:$0xff] }
 0x28b   : > { %v4815_v51 = vpop.eup %4814  ;;  %3674 = vst [vmem:[%s5391_s17 + $0xe80] sm:$0xff] %v3162_v28  ;;  %v2652_v49 = vadd.f32 0.5, %v2140_v33  ;;  %4828 = vtanh.f32 %v1124_v60  ;;  %v1128_v36 = vmul.f32 0.5, %v8075_v25  ;;  %v1129_v40 = vmul.f32 0.5, %v8078_v19 }
 0x28c   : > { %v4817_v44 = vpop.eup %4816  ;;  %v3163_v42 = vmul.f32 %v2651_v57, %v7994_v39  ;;  %v2141_v59 = vmul.f32 0.5, %v4815_v51  ;;  %4830 = vtanh.f32 %v1125_v7  ;;  %v1130_v8 = vmul.f32 0.5, %v8084_v10 }
 0x28d   : > { %v3164_v14 = vmul.f32 %v2652_v49, %v7999_v61  ;;  %v2142_v0 = vmul.f32 0.5, %v4817_v44  ;;  %4832 = vtanh.f32 %v1126_v56  ;;  %v1131_v52 = vmul.f32 0.5, %v8090_v20 }
 0x28e   : > { %3675 = vst [vmem:[%s5391_s17 + $0xe88] sm:$0xff] %v3163_v42  ;;  %v2653_v39 = vadd.f32 0.5, %v2141_v59  ;;  %4834 = vtanh.f32 %v1127_v9  ;;  %v1132_v11 = vmul.f32 0.5, %v8096_v45  ;;  %v1133_v30 = vmul.f32 0.5, %v8099_v47 }
 0x28f   : > { %v4819_v21 = vpop.eup %4818  ;;  %3676 = vst [vmem:[%s5391_s17 + $0xe90] sm:$0xff] %v3164_v14  ;;  %v2654_v61 = vadd.f32 0.5, %v2142_v0  ;;  %4836 = vtanh.f32 %v1128_v36  ;;  %v1134_v6 = vmul.f32 0.5, %v8104_v23  ;;  %v1135_v27 = vmul.f32 0.5, %v8107_v58 }
 0x290   : > { %v4821_v1 = vpop.eup %4820  ;;  %v3165_v24 = vmul.f32 %v2653_v39, %v8010_v12  ;;  %v2143_v4 = vmul.f32 0.5, %v4819_v21  ;;  %4838 = vtanh.f32 %v1129_v40  ;;  %v1136_v43 = vmul.f32 0.5, %v8112_v2 }
 0x291   : > { %v3166_v13 = vmul.f32 %v2654_v61, %v8015_v46  ;;  %v2144_v26 = vmul.f32 0.5, %v4821_v1  ;;  %4840 = vtanh.f32 %v1130_v8  ;;  %v1137_v3 = vmul.f32 0.5, %v8118_v54 }
 0x292   : > { %v4823_v48 = vpop.eup %4822  ;;  %3677 = vst [vmem:[%s5391_s17 + $0xe98] sm:$0xff] %v3165_v24  ;;  %v2655_v34 = vadd.f32 0.5, %v2143_v4  ;;  %4842 = vtanh.f32 %v1131_v52  ;;  %v1138_v12 = vmul.f32 0.5, %v8124_v17  ;;  %v1139_v35 = vmul.f32 0.5, %v8127_v38  ;;  %v8162_v4 = vld [vmem:[%s5127_s30 + $0xf68] sm:$0xff] }
 0x293   : > { %v4825_v63 = vpop.eup %4824  ;;  %3678 = vst [vmem:[%s5391_s17 + $0xea0] sm:$0xff] %v3166_v13  ;;  %v2656_v5 = vadd.f32 0.5, %v2144_v26  ;;  %v2145_v46 = vmul.f32 0.5, %v4823_v48  ;;  %4844 = vtanh.f32 %v1132_v11  ;;  %v1140_v53 = vmul.f32 0.5, %v8132_v50 }
 0x294   : > { %v4827_v60 = vpop.eup %4826  ;;  %v3167_v28 = vmul.f32 %v2655_v34, %v8026_v55  ;;  %v2146_v33 = vmul.f32 0.5, %v4825_v63  ;;  %4846 = vtanh.f32 %v1133_v30  ;;  %v1141_v7 = vmul.f32 0.5, %v8137_v22 }
 0x295   : > { %v4829_v57 = vpop.eup %4828  ;;  %v3168_v56 = vmul.f32 %v2656_v5, %v8031_v29  ;;  %v2657_v9 = vadd.f32 0.5, %v2145_v46  ;;  %v2147_v51 = vmul.f32 0.5, %v4827_v60  ;;  %4848 = vtanh.f32 %v1134_v6 }
 0x296   : > { %v4831_v49 = vpop.eup %4830  ;;  %3679 = vst [vmem:[%s5391_s17 + $0xea8] sm:$0xff] %v3167_v28  ;;  %v2658_v36 = vadd.f32 0.5, %v2146_v33  ;;  %v2148_v40 = vmul.f32 0.5, %v4829_v57  ;;  %4850 = vtanh.f32 %v1135_v27  ;;  %v1142_v44 = vmul.f32 0.5, %v8145_v62 }
 0x297   : > { %v4833_v55 = vpop.eup %4832  ;;  %3680 = vst [vmem:[%s5391_s17 + $0xeb0] sm:$0xff] %v3168_v56  ;;  %v3169_v42 = vmul.f32 %v2657_v9, %v8039_v37  ;;  %v2659_v59 = vadd.f32 0.5, %v2147_v51  ;;  %v2149_v8 = vmul.f32 0.5, %v4831_v49  ;;  %4852 = vtanh.f32 %v1136_v43  ;;  %v8183_v51 = vld [vmem:[%s5127_s30 + $0xf80] sm:$0xff] }
 0x298   : > { %v4835_v29 = vpop.eup %4834  ;;  %v3170_v14 = vmul.f32 %v2658_v36, %v8045_v16  ;;  %v2660_v0 = vadd.f32 0.5, %v2148_v40  ;;  %v2150_v52 = vmul.f32 0.5, %v4833_v55  ;;  %4854 = vtanh.f32 %v1137_v3  ;;  %v8167_v3 = vld [vmem:[%s5127_s30 + $0xf70] sm:$0xff] }
 0x299   : > { %v4837_v39 = vpop.eup %4836  ;;  %3681 = vst [vmem:[%s5391_s17 + $0xeb8] sm:$0xff] %v3169_v42  ;;  %v3171_v11 = vmul.f32 %v2659_v59, %v8048_v31  ;;  %v2661_v30 = vadd.f32 0.5, %v2149_v8  ;;  %v2151_v21 = vmul.f32 0.5, %v4835_v29  ;;  %4856 = vtanh.f32 %v1138_v12 }
 0x29a   : > { %v4839_v37 = vpop.eup %4838  ;;  %3682 = vst [vmem:[%s5391_s17 + $0xec0] sm:$0xff] %v3170_v14  ;;  %v3172_v61 = vmul.f32 %v2660_v0, %v8053_v18  ;;  %v2662_v6 = vadd.f32 0.5, %v2150_v52  ;;  %v2152_v16 = vmul.f32 0.5, %v4837_v39  ;;  %4858 = vtanh.f32 %v1139_v35  ;;  %v8194_v52 = vld [vmem:[%s5127_s30 + $0xf88] sm:$0xff] }
 0x29b   : > { %v4841_v27 = vpop.eup %4840  ;;  %3683 = vst [vmem:[%s5391_s17 + $0xec8] sm:$0xff] %v3171_v11  ;;  %v3173_v1 = vmul.f32 %v2661_v30, %v8059_v15  ;;  %v2663_v24 = vadd.f32 0.5, %v2151_v21  ;;  %v2153_v31 = vmul.f32 0.5, %v4839_v37  ;;  %4860 = vtanh.f32 %v1140_v53  ;;  %v8199_v21 = vld [vmem:[%s5127_s30 + $0xf90] sm:$0xff] }
 0x29c   : > { %v4843_v43 = vpop.eup %4842  ;;  %3684 = vst [vmem:[%s5391_s17 + $0xed0] sm:$0xff] %v3172_v61  ;;  %v3174_v13 = vmul.f32 %v2662_v6, %v8066_v32  ;;  %v2664_v18 = vadd.f32 0.5, %v2152_v16  ;;  %v2154_v26 = vmul.f32 0.5, %v4841_v27  ;;  %4862 = vtanh.f32 %v1141_v7  ;;  %v8178_v7 = vld [vmem:[%s5127_s30 + $0xf78] sm:$0xff] }
 0x29d   : > { %v4845_v48 = vpop.eup %4844  ;;  %3685 = vst [vmem:[%s5391_s17 + $0xed8] sm:$0xff] %v3173_v1  ;;  %v3175_v15 = vmul.f32 %v2663_v24, %v8069_v41  ;;  %v2665_v34 = vadd.f32 0.5, %v2153_v31  ;;  %v2155_v12 = vmul.f32 0.5, %v4843_v43  ;;  %4864 = vtanh.f32 %v1142_v44  ;;  %v8207_v31 = vld [vmem:[%s5127_s30 + $0xf98] sm:$0xff] }
 0x29e   : > { %v4847_v35 = vpop.eup %4846  ;;  %3686 = vst [vmem:[%s5391_s17 + $0xee0] sm:$0xff] %v3174_v13  ;;  %v3176_v63 = vmul.f32 %v2664_v18, %v8075_v25  ;;  %v2666_v32 = vadd.f32 0.5, %v2154_v26  ;;  %v2156_v5 = vmul.f32 0.5, %v4845_v48  ;;  %v1143_v46 = vmul.f32 0.5, %v8162_v4  ;;  %v8213_v48 = vld [vmem:[%s5127_s30 + $0xfa0] sm:$0xff] }
 0x29f   : > { %v4849_v53 = vpop.eup %4848  ;;  %3687 = vst [vmem:[%s5391_s17 + $0xee8] sm:$0xff] %v3175_v15  ;;  %v3177_v60 = vmul.f32 %v2665_v34, %v8078_v19  ;;  %v2667_v41 = vadd.f32 0.5, %v2155_v12  ;;  %v2157_v28 = vmul.f32 0.5, %v4847_v35  ;;  %v1144_v33 = vmul.f32 0.5, %v8167_v3  ;;  %v8221_v35 = vld [vmem:[%s5127_s30 + $0xfb0] sm:$0xff] }
 0x2a0   : > { %v4851_v57 = vpop.eup %4850  ;;  %3688 = vst [vmem:[%s5391_s17 + $0xef0] sm:$0xff] %v3176_v63  ;;  %v3178_v25 = vmul.f32 %v2666_v32, %v8084_v10  ;;  %v2668_v56 = vadd.f32 0.5, %v2156_v5  ;;  %v2158_v9 = vmul.f32 0.5, %v4849_v53  ;;  %4866 = vtanh.f32 %v1143_v46  ;;  %v8227_v5 = vld [vmem:[%s5127_s30 + $0xfb8] sm:$0xff] }
 0x2a1   : > { %v4853_v49 = vpop.eup %4852  ;;  %3689 = vst [vmem:[%s5391_s17 + $0xef8] sm:$0xff] %v3177_v60  ;;  %v3179_v19 = vmul.f32 %v2667_v41, %v8090_v20  ;;  %v2669_v36 = vadd.f32 0.5, %v2157_v28  ;;  %v2159_v40 = vmul.f32 0.5, %v4851_v57  ;;  %4868 = vtanh.f32 %v1144_v33  ;;  %v8237_v28 = vld [vmem:[%s5127_s30 + $0xfc8] sm:$0xff] }
 0x2a2   : > { %v4855_v44 = vpop.eup %4854  ;;  %3690 = vst [vmem:[%s5391_s17 + $0xf00] sm:$0xff] %v3178_v25  ;;  %v3180_v55 = vmul.f32 %v2668_v56, %v8096_v45  ;;  %v2670_v10 = vadd.f32 0.5, %v2158_v9  ;;  %v2160_v42 = vmul.f32 0.5, %v4853_v49  ;;  %v1145_v59 = vmul.f32 0.5, %v8178_v7  ;;  %v8243_v56 = vld [vmem:[%s5127_s30 + $0xfd0] sm:$0xff] }
 0x2a3   : > { %v4857_v8 = vpop.eup %4856  ;;  %3691 = vst [vmem:[%s5391_s17 + $0xf08] sm:$0xff] %v3179_v19  ;;  %v3181_v29 = vmul.f32 %v2669_v36, %v8099_v47  ;;  %v2671_v20 = vadd.f32 0.5, %v2159_v40  ;;  %v2161_v14 = vmul.f32 0.5, %v4855_v44  ;;  %v1146_v0 = vmul.f32 0.5, %v8183_v51  ;;  %v8249_v36 = vld [vmem:[%s5127_s30 + $0xfd8] sm:$0xff] }
 0x2a4   : > { %v4859_v39 = vpop.eup %4858  ;;  %3692 = vst [vmem:[%s5391_s17 + $0xf10] sm:$0xff] %v3180_v55  ;;  %v3182_v45 = vmul.f32 %v2670_v10, %v8104_v23  ;;  %v2672_v11 = vadd.f32 0.5, %v2160_v42  ;;  %v2162_v30 = vmul.f32 0.5, %v4857_v8  ;;  %4870 = vtanh.f32 %v1145_v59  ;;  %v8255_v55 = vld [vmem:[%s5127_s30 + $0xfe0] sm:$0xff]  ;;  %v8260_v59 = vld [vmem:[%s5127_s30 + $0xfe8] sm:$0xff] }
 0x2a5   : > { %v4861_v37 = vpop.eup %4860  ;;  %3693 = vst [vmem:[%s5391_s17 + $0xf18] sm:$0xff] %v3181_v29  ;;  %v3183_v47 = vmul.f32 %v2671_v20, %v8107_v58  ;;  %v2673_v61 = vadd.f32 0.5, %v2161_v14  ;;  %v2163_v6 = vmul.f32 0.5, %v4859_v39  ;;  %4872 = vtanh.f32 %v1146_v0  ;;  %v8265_v0 = vld [vmem:[%s5127_s30 + $0xff0] sm:$0xff] }
 0x2a6   : > { %v4863_v16 = vpop.eup %4862  ;;  %3694 = vst [vmem:[%s5391_s17 + $0xf20] sm:$0xff] %v3182_v45  ;;  %v3184_v23 = vmul.f32 %v2672_v11, %v8112_v2  ;;  %v2674_v27 = vadd.f32 0.5, %v2162_v30  ;;  %v2164_v1 = vmul.f32 0.5, %v4861_v37  ;;  %v1147_v24 = vmul.f32 0.5, %v8194_v52  ;;  %v8216_v2 = vld [vmem:[%s5127_s30 + $0xfa8] sm:$0xff]  ;;  %v8270_v30 = vld [vmem:[%s5127_s30 + $0xff8] sm:$0xff] }
 0x2a7   : > { %v4865_v43 = vpop.eup %4864  ;;  %3695 = vst [vmem:[%s5391_s17 + $0xf28] sm:$0xff] %v3183_v47  ;;  %v3185_v58 = vmul.f32 %v2673_v61, %v8118_v54  ;;  %v2675_v13 = vadd.f32 0.5, %v2163_v6  ;;  %v2165_v18 = vmul.f32 0.5, %v4863_v16  ;;  %v1148_v26 = vmul.f32 0.5, %v8199_v21 }
 0x2a8   : > { %3696 = vst [vmem:[%s5391_s17 + $0xf30] sm:$0xff] %v3184_v23  ;;  %v3186_v15 = vmul.f32 %v2674_v27, %v8124_v17  ;;  %v2676_v34 = vadd.f32 0.5, %v2164_v1  ;;  %v2166_v12 = vmul.f32 0.5, %v4865_v43  ;;  %4874 = vtanh.f32 %v1147_v24 }
 0x2a9   : > { %3697 = vst [vmem:[%s5391_s17 + $0xf38] sm:$0xff] %v3185_v58  ;;  %v3187_v54 = vmul.f32 %v2675_v13, %v8127_v38  ;;  %v2677_v63 = vadd.f32 0.5, %v2165_v18  ;;  %4876 = vtanh.f32 %v1148_v26  ;;  %v1149_v32 = vmul.f32 0.5, %v8207_v31  ;;  %v8234_v38 = vld [vmem:[%s5127_s30 + $0xfc0] sm:$0xff] }
 0x2aa   : > { %v4867_v17 = vpop.eup %4866  ;;  %3698 = vst [vmem:[%s5391_s17 + $0xf40] sm:$0xff] %v3186_v15  ;;  %v3188_v46 = vmul.f32 %v2676_v34, %v8132_v50  ;;  %v2678_v53 = vadd.f32 0.5, %v2166_v12  ;;  %v1150_v60 = vmul.f32 0.5, %v8213_v48  ;;  %v1151_v41 = vmul.f32 0.5, %v8216_v2 }
 0x2ab   : > { %v4869_v33 = vpop.eup %4868  ;;  %3699 = vst [vmem:[%s5391_s17 + $0xf48] sm:$0xff] %v3187_v54  ;;  %v3189_v57 = vmul.f32 %v2677_v63, %v8137_v22  ;;  %v2167_v25 = vmul.f32 0.5, %v4867_v17  ;;  %4878 = vtanh.f32 %v1149_v32  ;;  %v1152_v50 = vmul.f32 0.5, %v8221_v35 }
 0x2ac   : > { %3700 = vst [vmem:[%s5391_s17 + $0xf50] sm:$0xff] %v3188_v46  ;;  %v3190_v9 = vmul.f32 %v2678_v53, %v8145_v62  ;;  %v2168_v49 = vmul.f32 0.5, %v4869_v33  ;;  %4880 = vtanh.f32 %v1150_v60  ;;  %v1153_v19 = vmul.f32 0.5, %v8227_v5 }
 0x2ad   : > { %3701 = vst [vmem:[%s5391_s17 + $0xf58] sm:$0xff] %v3189_v57  ;;  %v2679_v22 = vadd.f32 0.5, %v2167_v25  ;;  %4882 = vtanh.f32 %v1151_v41  ;;  %v1154_v40 = vmul.f32 0.5, %v8234_v38  ;;  %v1155_v44 = vmul.f32 0.5, %v8237_v28 }
 0x2ae   : > { %v4871_v10 = vpop.eup %4870  ;;  %3702 = vst [vmem:[%s5391_s17 + $0xf60] sm:$0xff] %v3190_v9  ;;  %v2680_v62 = vadd.f32 0.5, %v2168_v49  ;;  %4884 = vtanh.f32 %v1152_v50  ;;  %v1156_v42 = vmul.f32 0.5, %v8243_v56  ;;  %v1157_v14 = vmul.f32 0.5, %v8249_v36 }
 0x2af   : > { %v4873_v8 = vpop.eup %4872  ;;  %v3191_v29 = vmul.f32 %v2679_v22, %v8162_v4  ;;  %v2169_v20 = vmul.f32 0.5, %v4871_v10  ;;  %4886 = vtanh.f32 %v1153_v19  ;;  %v1158_v11 = vmul.f32 0.5, %v8255_v55 }
 0x2b0   : > { %v3192_v39 = vmul.f32 %v2680_v62, %v8167_v3  ;;  %v2170_v45 = vmul.f32 0.5, %v4873_v8  ;;  %4888 = vtanh.f32 %v1154_v40  ;;  %v1159_v4 = vmul.f32 0.5, %v8260_v59 }
 0x2b1   : > { %3703 = vst [vmem:[%s5391_s17 + $0xf68] sm:$0xff] %v3191_v29  ;;  %v2681_v37 = vadd.f32 0.5, %v2169_v20  ;;  %4890 = vtanh.f32 %v1155_v44  ;;  %v1160_v6 = vmul.f32 0.5, %v8265_v0  ;;  %v1161_v27 = vmul.f32 0.5, %v8270_v30 }
 0x2b2   : > { %v4875_v47 = vpop.eup %4874  ;;  %3704 = vst [vmem:[%s5391_s17 + $0xf70] sm:$0xff] %v3192_v39  ;;  %v2682_v61 = vadd.f32 0.5, %v2170_v45  ;;  %4892 = vtanh.f32 %v1156_v42 }
 0x2b3   : > { %v4877_v3 = vpop.eup %4876  ;;  %v3193_v16 = vmul.f32 %v2681_v37, %v8178_v7  ;;  %v2171_v23 = vmul.f32 0.5, %v4875_v47  ;;  %4894 = vtanh.f32 %v1157_v14 }
 0x2b4   : > { %v3194_v1 = vmul.f32 %v2682_v61, %v8183_v51  ;;  %v2172_v24 = vmul.f32 0.5, %v4877_v3  ;;  %4896 = vtanh.f32 %v1158_v11 }
 0x2b5   : > { %v4879_v43 = vpop.eup %4878  ;;  %3705 = vst [vmem:[%s5391_s17 + $0xf78] sm:$0xff] %v3193_v16  ;;  %v2683_v58 = vadd.f32 0.5, %v2171_v23  ;;  %4898 = vtanh.f32 %v1159_v4 }
 0x2b6   : > { %v4881_v13 = vpop.eup %4880  ;;  %3706 = vst [vmem:[%s5391_s17 + $0xf80] sm:$0xff] %v3194_v1  ;;  %v2684_v18 = vadd.f32 0.5, %v2172_v24  ;;  %v2173_v26 = vmul.f32 0.5, %v4879_v43  ;;  %4900 = vtanh.f32 %v1160_v6 }
 0x2b7   : > { %v4883_v7 = vpop.eup %4882  ;;  %v3195_v15 = vmul.f32 %v2683_v58, %v8194_v52  ;;  %v2174_v34 = vmul.f32 0.5, %v4881_v13  ;;  %4902 = vtanh.f32 %v1161_v27 }
 0x2b8   : > { %v4885_v12 = vpop.eup %4884  ;;  %v3196_v51 = vmul.f32 %v2684_v18, %v8199_v21  ;;  %v2685_v54 = vadd.f32 0.5, %v2173_v26  ;;  %v2175_v63 = vmul.f32 0.5, %v4883_v7 }
 0x2b9   : > { %v4887_v32 = vpop.eup %4886  ;;  %3707 = vst [vmem:[%s5391_s17 + $0xf88] sm:$0xff] %v3195_v15  ;;  %v2686_v17 = vadd.f32 0.5, %v2174_v34  ;;  %v2176_v46 = vmul.f32 0.5, %v4885_v12 }
 0x2ba   : > { %v4889_v53 = vpop.eup %4888  ;;  %3708 = vst [vmem:[%s5391_s17 + $0xf90] sm:$0xff] %v3196_v51  ;;  %v3197_v60 = vmul.f32 %v2685_v54, %v8207_v31  ;;  %v2687_v41 = vadd.f32 0.5, %v2175_v63  ;;  %v2177_v33 = vmul.f32 0.5, %v4887_v32 }
 0x2bb   : > { %v4891_v52 = vpop.eup %4890  ;;  %v3198_v57 = vmul.f32 %v2686_v17, %v8213_v48  ;;  %v2688_v25 = vadd.f32 0.5, %v2176_v46  ;;  %v2178_v21 = vmul.f32 0.5, %v4889_v53 }
 0x2bc   : > { %v4893_v50 = vpop.eup %4892  ;;  %3709 = vst [vmem:[%s5391_s17 + $0xf98] sm:$0xff] %v3197_v60  ;;  %v3199_v9 = vmul.f32 %v2687_v41, %v8216_v2  ;;  %v2689_v49 = vadd.f32 0.5, %v2177_v33  ;;  %v2179_v19 = vmul.f32 0.5, %v4891_v52 }
 0x2bd   : > { %v4895_v22 = vpop.eup %4894  ;;  %3710 = vst [vmem:[%s5391_s17 + $0xfa0] sm:$0xff] %v3198_v57  ;;  %v3200_v31 = vmul.f32 %v2688_v25, %v8221_v35  ;;  %v2690_v40 = vadd.f32 0.5, %v2178_v21  ;;  %v2180_v44 = vmul.f32 0.5, %v4893_v50 }
 0x2be   : > { %v4897_v10 = vpop.eup %4896  ;;  %3711 = vst [vmem:[%s5391_s17 + $0xfa8] sm:$0xff] %v3199_v9  ;;  %v3201_v48 = vmul.f32 %v2689_v49, %v8227_v5  ;;  %v2691_v62 = vadd.f32 0.5, %v2179_v19  ;;  %v2181_v42 = vmul.f32 0.5, %v4895_v22 }
 0x2bf   : > { %v4899_v8 = vpop.eup %4898  ;;  %3712 = vst [vmem:[%s5391_s17 + $0xfb0] sm:$0xff] %v3200_v31  ;;  %v3202_v2 = vmul.f32 %v2690_v40, %v8234_v38  ;;  %v2692_v29 = vadd.f32 0.5, %v2180_v44  ;;  %v2182_v20 = vmul.f32 0.5, %v4897_v10 }
 0x2c0   : > { %v4901_v14 = vpop.eup %4900  ;;  %3713 = vst [vmem:[%s5391_s17 + $0xfb8] sm:$0xff] %v3201_v48  ;;  %v3203_v35 = vmul.f32 %v2691_v62, %v8237_v28  ;;  %v2693_v39 = vadd.f32 0.5, %v2181_v42  ;;  %v2183_v45 = vmul.f32 0.5, %v4899_v8 }
 0x2c1   : > { %v4903_v5 = vpop.eup %4902  ;;  %3714 = vst [vmem:[%s5391_s17 + $0xfc0] sm:$0xff] %v3202_v2  ;;  %v3204_v11 = vmul.f32 %v2692_v29, %v8243_v56  ;;  %v2694_v37 = vadd.f32 0.5, %v2182_v20  ;;  %v2184_v4 = vmul.f32 0.5, %v4901_v14 }
 0x2c2   : > { %3715 = vst [vmem:[%s5391_s17 + $0xfc8] sm:$0xff] %v3203_v35  ;;  %v3205_v38 = vmul.f32 %v2693_v39, %v8249_v36  ;;  %v2695_v47 = vadd.f32 0.5, %v2183_v45  ;;  %v2185_v61 = vmul.f32 0.5, %v4903_v5 }
 0x2c3   : > { %3716 = vst [vmem:[%s5391_s17 + $0xfd0] sm:$0xff] %v3204_v11  ;;  %v3206_v28 = vmul.f32 %v2694_v37, %v8255_v55  ;;  %v2696_v6 = vadd.f32 0.5, %v2184_v4 }
 0x2c4   : > { %3717 = vst [vmem:[%s5391_s17 + $0xfd8] sm:$0xff] %v3205_v38  ;;  %v3207_v56 = vmul.f32 %v2695_v47, %v8260_v59  ;;  %v2697_v3 = vadd.f32 0.5, %v2185_v61 }
 0x2c5   : > { %3718 = vst [vmem:[%s5391_s17 + $0xfe0] sm:$0xff] %v3206_v28  ;;  %v3208_v16 = vmul.f32 %v2696_v6, %v8265_v0 }
 0x2c6   : > { %3719 = vst [vmem:[%s5391_s17 + $0xfe8] sm:$0xff] %v3207_v56  ;;  %v3209_v36 = vmul.f32 %v2697_v3, %v8270_v30 }
 0x2c7   : > { %3720 = vst [vmem:[%s5391_s17 + $0xff0] sm:$0xff] %v3208_v16 }
 0x2c8   : > { %3721 = vst [vmem:[%s5391_s17 + $0xff8] sm:$0xff] %v3209_v36 }
 0x2c9   : > { %4947 = shalt.err (!%p4944_p1)
}
 0x2ca   : > { %s4948_s13 = scalar_lea.hbm %s8312_s2, 65536  ;;  %s4952_s20 = scalar_lea.hbm %s8362_s1, 262144 }
 0x2cb   : > { %p4949_p3 = scmp.ne.s32.totalorder %s8312_s2, %s4948_s13  ;;  %p4953_p0 = scmp.lt.u32.totalorder %s8312_s2, %s8362_s1 }
 0x2cc   : > { %p4954_p2 = scmp.lt.u32.totalorder %s4952_s20, %s4948_s13  ;;  %p4956_p6 = scmp.lt.u32.totalorder %s4948_s13, %s8312_s2 }
 0x2cd   : > { %p4950_p4 = pnand %p4949_p3, %p8444_p10 }
 0x2ce   : > { %p4955_p7 = por %p4954_p2, %p4953_p0 }
 0x2cf   : > { %p4951_p5 = pneg %p4950_p4 }
 0x2d0   : > { %p4957_p11 = por %p4956_p6, %p4955_p7 }
 0x2d2   : > { %p4958_p12 = pnand %p4957_p11, %p4951_p5 }
 0x2d4   : > { %4961 = shalt.err (!%p4958_p12)
}
 0x2d5   : > { %s5006_s24 = smov 1024   ;;  %s5007_s26 = smov 64  }
 0x2d6   : > { %3832 = dma.vmem_to_hbm [thread:$0]  (%p8444_p10), %s8314_s27, 65536, %s8312_s2, %s3723_s10, %s5006_s24, %s5006_s24, %s5007_s26  }
 0x2d7 PF: > { %p3843_p8 = scmp.ge.s32.totalorder %s5000_s9, 2  ;;  %s3752_s30 = sand.u32 1, %s4988_s6  }
 0x2d8   : > { %p8445_p9 = scmp.ne.s32.totalorder %s8388_s19, 0  ;;  %s3753_s17 = scalar_lea.sflag [#allocation4], %s3752_s30 }
 0x2da   : > { %p3839_p13 = pnand %p3843_p8, %p8445_p9 }
 0x2dc   : > { %4983 = dma.done.wait (!%p3839_p13), %s3753_s17, 65536  }
 0x2dd   : > { %4985 = vsyncadd (!%p3839_p13), %s3753_s17, 4294901760  ;;  %p14_p1 = scmp.ge.s32.totalorder %s5043_s12, 6   ;;  %s8446_s6 = smov %s4992_s7 }
 0x2de   : > { %s8447_s7 = smov %s4996_s8  ;;  %s8448_s8 = smov %s5055_s15 }
 0x2df   : > { %s8449_s9 = smov %s5043_s12  ;;  %16 = sbr.rel (!%p14_p1) target bundleno = 5 (0x5), region = 69 }
 0x2e6   :  { %3758 = vsyncpa [#allocation3], 1 }
 0x2e7   :  { %3760 = vsyncpa [#allocation3 + $0x1], 1 }
 0x2e8   :  { %3761 = vsyncpa [#allocation4], 1 }
 0x2e9   :  { %3763 = vsyncpa [#allocation4 + $0x1], 1 }

</bundles_post_ra>
